<compile_context>
chip_gen: v6e
topology: v6e:2x2x1
jax: 0.10.0
libtpu: 0.0.40
codegen_flags: <defaults>
</compile_context>

<pallas_src>
import math

import jax
import jax.numpy as jnp
from jax.experimental import pallas as pl
from jax.experimental.pallas import tpu as pltpu


def _erf(x):
    # Eigen/XLA single-precision rational erf approximation (mul/add/clip only),
    # matching what XLA uses for exact GELU on f32. Lowers cleanly on Mosaic.
    x = jnp.clip(x, -4.0, 4.0)
    x2 = x * x
    p = x2 * (-2.72614225801306e-10) + 2.77068142495902e-08
    p = x2 * p + (-2.10102402082508e-06)
    p = x2 * p + (-5.69250639462346e-05)
    p = x2 * p + (-7.34990630326855e-04)
    p = x2 * p + (-2.95459980854025e-03)
    p = x2 * p + (-1.60960333262415e-02)
    p = x * p
    q = x2 * (-1.45660718464996e-05) + (-2.13374055278905e-04)
    q = x2 * q + (-1.68282697438203e-03)
    q = x2 * q + (-7.37332916720468e-03)
    q = x2 * q + (-1.42647390514189e-02)
    return p / q


def _gelu(x):
    # exact (erf-based) GELU, matching torch.nn.GELU() default
    return 0.5 * x * (1.0 + _erf(x * 0.7071067811865476))


def _make_kernel(D, H, W):
    """Builds the per-sample kernel; D, H, W are static Python ints."""
    S = D * H * W
    OFFSETS = [(od, oh, ow)
               for od in (-1, 0, 1) for oh in (-1, 0, 1) for ow in (-1, 0, 1)]

    def kernel(x_ref, mask_ref, w1_ref, g1w_ref, g1b_ref,
               w2_ref, g2w_ref, g2b_ref,
               fc1w_ref, fc1b_ref, fc2w_ref, fc2b_ref,
               out_ref, pat_ref):
        C = x_ref.shape[1]
        inv_n = 1.0 / float(C * S)
        eps = 1e-5

        x = x_ref[0].astype(jnp.float32)              # (C, S), lane-dense

        def conv3x3x3_gn(act, w_ref, gamma, beta):
            # im2col: 27 rolled+masked copies of `act` -> (27*C, S) patch,
            # then ONE deep-contraction MXU matmul (C, 27*C) @ (27*C, S).
            for k, (od, oh, ow) in enumerate(OFFSETS):
                delta = od * H * W + oh * W + ow       # flat spatial offset
                if delta == 0:
                    tap = act                          # center tap: mask is all-ones
                else:
                    # tap[s] = act[s + delta]  (valid positions), XLU lane roll
                    tap = pltpu.roll(act, (-delta) % S, axis=1)
                    tap = tap * mask_ref[k:k + 1, :]   # zero out-of-bounds (halo)
                pat_ref[k * C:(k + 1) * C, :] = tap    # aligned sublane block store
            y = jnp.dot(w_ref[...], pat_ref[...],
                        preferred_element_type=jnp.float32)   # (C, S)
            # GroupNorm(num_groups=1): single-pass stats over the whole sample.
            mean = jnp.sum(y) * inv_n
            var = jnp.sum(y * y) * inv_n - mean * mean
            y = (y - mean) * jax.lax.rsqrt(var + eps)
            return y * gamma + beta                    # per-channel affine (C,1)

        # ConvLayer3D #1: Conv3d(3x3x3, no bias) -> GroupNorm -> GELU
        h = _gelu(conv3x3x3_gn(x, w1_ref, g1w_ref[...], g1b_ref[...]))
        # ConvLayer3D #2: Conv3d(3x3x3, no bias) -> GroupNorm (no activation)
        h = conv3x3x3_gn(h, w2_ref, g2w_ref[...], g2b_ref[...])

        # AdaptiveAvgPool3d(1): global average over spatial positions
        pooled = jnp.mean(h, axis=1, keepdims=True)    # (C, 1)

        # 1x1x1 convs of the squeeze-excitation on the VPU (tiny, keep off MXU):
        #   t = GELU(fc1 @ pooled + b1);  z = fc2 @ t + b2;  gate = sigmoid(z)
        t = jnp.sum(fc1w_ref[...] * pooled, axis=0, keepdims=True) + fc1b_ref[...]  # (1, R)
        t = _gelu(t)
        z = jnp.sum(fc2w_ref[...] * t, axis=1, keepdims=True) + fc2b_ref[...]       # (C, 1)
        gate = 1.0 / (1.0 + jnp.exp(-z))               # Sigmoid

        out_ref[0] = (x + gate).astype(out_ref.dtype)  # residual broadcast add

    return kernel


def channel_attention_3d(x_ncdhw, params):
    """x_ncdhw: (N, C, D, H, W) float32 (PyTorch convention). Returns same layout."""
    (w1, g1w, g1b, w2, g2w, g2b, fc1w, fc1b, fc2w, fc2b) = params
    N, C, D, H, W = x_ncdhw.shape
    S = D * H * W
    R = fc1w.shape[0]

    # Channel-major flattened layout (N, C, S): a free, contiguous reshape of
    # NCDHW (no transpose), with S as the lane-dense last dim.
    x = x_ncdhw.reshape(N, C, S)

    # conv weights: torch (Cout, Cin, kd, kh, kw) -> (Cout, 27*Cin), column order
    # (kd, kh, kw, ci) matching the patch-row order built in the kernel.
    w1k = jnp.transpose(w1, (0, 2, 3, 4, 1)).reshape(C, 27 * C)
    w2k = jnp.transpose(w2, (0, 2, 3, 4, 1)).reshape(C, 27 * C)
    fc1wk = jnp.transpose(fc1w)                        # (C, R)
    fc1bk = fc1b.reshape(1, R)
    fc2wk = fc2w                                       # (C, R)
    fc2bk = fc2b.reshape(C, 1)
    g1wk, g1bk = g1w.reshape(C, 1), g1b.reshape(C, 1)
    g2wk, g2bk = g2w.reshape(C, 1), g2b.reshape(C, 1)

    # Precompute the 27 per-tap zero-padding masks (27, S) in {0,1} f32.
    sidx = jnp.arange(S, dtype=jnp.int32)
    d_id = sidx // (H * W)
    h_id = (sidx // W) % H
    w_id = sidx % W
    masks = []
    for od in (-1, 0, 1):
        for oh in (-1, 0, 1):
            for ow in (-1, 0, 1):
                m = ((d_id + od >= 0) & (d_id + od < D) &
                     (h_id + oh >= 0) & (h_id + oh < H) &
                     (w_id + ow >= 0) & (w_id + ow < W))
                masks.append(m)
    tap_mask = jnp.stack(masks, axis=0).astype(jnp.float32)   # (27, S)

    const = lambda n: (0, 0)
    out = pl.pallas_call(
        _make_kernel(D, H, W),
        out_shape=jax.ShapeDtypeStruct((N, C, S), x.dtype),
        grid_spec=pltpu.PrefetchScalarGridSpec(
            num_scalar_prefetch=0,
            grid=(N,),                                 # one sample per grid step
            in_specs=[
                pl.BlockSpec((1, C, S), lambda n: (n, 0, 0)),   # x (lane-dense)
                pl.BlockSpec((27, S), const),                   # tap masks
                pl.BlockSpec((C, 27 * C), const),               # conv1 weight
                pl.BlockSpec((C, 1), const),                    # gn1 gamma
                pl.BlockSpec((C, 1), const),                    # gn1 beta
                pl.BlockSpec((C, 27 * C), const),               # conv2 weight
                pl.BlockSpec((C, 1), const),                    # gn2 gamma
                pl.BlockSpec((C, 1), const),                    # gn2 beta
                pl.BlockSpec((C, R), const),                    # fc1 weight^T
                pl.BlockSpec((1, R), const),                    # fc1 bias
                pl.BlockSpec((C, R), const),                    # fc2 weight
                pl.BlockSpec((C, 1), const),                    # fc2 bias
            ],
            out_specs=pl.BlockSpec((1, C, S), lambda n: (n, 0, 0)),
            scratch_shapes=[pltpu.VMEM((27 * C, S), jnp.float32)],   # im2col patch
        ),
        compiler_params=pltpu.CompilerParams(
            dimension_semantics=("parallel",)),        # independent samples -> 2 TCs on v7x
    )(x, tap_mask, w1k, g1wk, g1bk, w2k, g2wk, g2bk,
      fc1wk, fc1bk, fc2wk, fc2bk)

    return out.reshape(N, C, D, H, W)


def _reference(x, params):
    """Pure-JAX reference of the PyTorch forward, NCDHW layout."""
    (w1, g1w, g1b, w2, g2w, g2b, fc1w, fc1b, fc2w, fc2b) = params
    hi = jax.lax.Precision.HIGHEST

    def conv3(v, w):
        return jax.lax.conv_general_dilated(
            v, w, window_strides=(1, 1, 1),
            padding=((1, 1), (1, 1), (1, 1)),
            dimension_numbers=("NCDHW", "OIDHW", "NCDHW"),
            precision=hi)

    def gn(v, gamma, beta):
        mean = jnp.mean(v, axis=(1, 2, 3, 4), keepdims=True)
        var = jnp.mean(jnp.square(v - mean), axis=(1, 2, 3, 4), keepdims=True)
        vn = (v - mean) / jnp.sqrt(var + 1e-5)
        return vn * gamma[None, :, None, None, None] + beta[None, :, None, None, None]

    def gelu(v):
        return 0.5 * v * (1.0 + jax.scipy.special.erf(v / math.sqrt(2.0)))

    h = gelu(gn(conv3(x, w1), g1w, g1b))
    h = gn(conv3(h, w2), g2w, g2b)
    pooled = jnp.mean(h, axis=(2, 3, 4))                              # (N, C)
    z = jnp.dot(pooled, fc1w.T, precision=hi) + fc1b
    z = gelu(z)
    z = jnp.dot(z, fc2w.T, precision=hi) + fc2b
    gate = jax.nn.sigmoid(z)
    return x + gate[:, :, None, None, None]


if __name__ == "__main__":
    key = jax.random.PRNGKey(0)
    keys = jax.random.split(key, 12)

    N, C, D, H, W = 2, 16, 8, 8, 8     # C=16 -> GroupNorm branch of ConvLayer3D
    R = C // 2                         # reduction=2

    # deterministic synthetic parameters (shapes follow the module __init__)
    fan_in = C * 27                    # kaiming_normal_(mode='fan_in') std for 3x3x3 conv
    w1 = jax.random.normal(keys[0], (C, C, 3, 3, 3), jnp.float32) * math.sqrt(2.0 / fan_in)
    w2 = jax.random.normal(keys[1], (C, C, 3, 3, 3), jnp.float32) * math.sqrt(2.0 / fan_in)
    g1w = 1.0 + 0.1 * jax.random.normal(keys[2], (C,), jnp.float32)
    g1b = 0.05 * jax.random.normal(keys[3], (C,), jnp.float32)
    g2w = 1.0 + 0.1 * jax.random.normal(keys[4], (C,), jnp.float32)
    g2b = 0.05 * jax.random.normal(keys[5], (C,), jnp.float32)
    fc1w = jax.random.normal(keys[6], (R, C), jnp.float32) * math.sqrt(1.0 / C)
    fc1b = 0.05 * jax.random.normal(keys[7], (R,), jnp.float32)
    fc2w = jax.random.normal(keys[8], (C, R), jnp.float32) * math.sqrt(1.0 / R)
    fc2b = 0.05 * jax.random.normal(keys[9], (C,), jnp.float32)
    params = (w1, g1w, g1b, w2, g2w, g2b, fc1w, fc1b, fc2w, fc2b)

    x = jax.random.normal(keys[10], (N, C, D, H, W), jnp.float32)

    out = jax.block_until_ready(channel_attention_3d(x, params))
    ref = jax.block_until_ready(_reference(x, params))

    assert out.shape == x.shape and out.dtype == x.dtype
    max_err = float(jnp.max(jnp.abs(out - ref)))
    assert max_err < 5e-3, f"max abs error vs reference: {max_err}"
    print("KERNEL_OK")
</pallas_src>

<mosaic_0001>
module attributes {stable_mosaic.version = 11 : i64} {
  func.func @kernel(%arg0: i32, %arg1: memref<1x16x512xf32, #tpu.memory_space<vmem>>, %arg2: memref<27x512xf32, #tpu.memory_space<vmem>>, %arg3: memref<16x432xf32, #tpu.memory_space<vmem>>, %arg4: memref<16x1xf32, #tpu.memory_space<vmem>>, %arg5: memref<16x1xf32, #tpu.memory_space<vmem>>, %arg6: memref<16x432xf32, #tpu.memory_space<vmem>>, %arg7: memref<16x1xf32, #tpu.memory_space<vmem>>, %arg8: memref<16x1xf32, #tpu.memory_space<vmem>>, %arg9: memref<16x8xf32, #tpu.memory_space<vmem>>, %arg10: memref<1x8xf32, #tpu.memory_space<vmem>>, %arg11: memref<16x8xf32, #tpu.memory_space<vmem>>, %arg12: memref<16x1xf32, #tpu.memory_space<vmem>>, %arg13: memref<1x16x512xf32, #tpu.memory_space<vmem>>, %arg14: memref<432x512xf32, #tpu.memory_space<vmem>>) attributes {dimension_semantics = [#tpu.dimension_semantics<parallel>], iteration_bounds = array<i64: 2>, scalar_prefetch = 0 : i64, scratch_operands = 1 : i64, tpu.core_type = #tpu.core_type<tc>, window_params = [{transform_indices = @transform_0, window_bounds = array<i64: 1, 16, 512>}, {pipeline_mode = #tpu.pipeline_mode<synchronous>, transform_indices = @transform_1, window_bounds = array<i64: 27, 512>}, {pipeline_mode = #tpu.pipeline_mode<synchronous>, transform_indices = @transform_2, window_bounds = array<i64: 16, 432>}, {pipeline_mode = #tpu.pipeline_mode<synchronous>, transform_indices = @transform_3, window_bounds = array<i64: 16, 1>}, {pipeline_mode = #tpu.pipeline_mode<synchronous>, transform_indices = @transform_4, window_bounds = array<i64: 16, 1>}, {pipeline_mode = #tpu.pipeline_mode<synchronous>, transform_indices = @transform_5, window_bounds = array<i64: 16, 432>}, {pipeline_mode = #tpu.pipeline_mode<synchronous>, transform_indices = @transform_6, window_bounds = array<i64: 16, 1>}, {pipeline_mode = #tpu.pipeline_mode<synchronous>, transform_indices = @transform_7, window_bounds = array<i64: 16, 1>}, {pipeline_mode = #tpu.pipeline_mode<synchronous>, transform_indices = @transform_8, window_bounds = array<i64: 16, 8>}, {pipeline_mode = #tpu.pipeline_mode<synchronous>, transform_indices = @transform_9, window_bounds = array<i64: 1, 8>}, {pipeline_mode = #tpu.pipeline_mode<synchronous>, transform_indices = @transform_10, window_bounds = array<i64: 16, 8>}, {pipeline_mode = #tpu.pipeline_mode<synchronous>, transform_indices = @transform_11, window_bounds = array<i64: 16, 1>}, {transform_indices = @transform_12, window_bounds = array<i64: 1, 16, 512>}]} {
    %c0 = arith.constant 0 : index
    %c0_0 = arith.constant 0 : index
    %c0_1 = arith.constant 0 : index
    %0 = vector.load %arg1[%c0, %c0_0, %c0_1] : memref<1x16x512xf32, #tpu.memory_space<vmem>>, vector<1x16x512xf32>
    %1 = vector.shape_cast %0 : vector<1x16x512xf32> to vector<16x512xf32>
    %c0_2 = arith.constant 0 : index
    %c0_3 = arith.constant 0 : index
    %2 = vector.load %arg4[%c0_2, %c0_3] : memref<16x1xf32, #tpu.memory_space<vmem>>, vector<16x1xf32>
    %c0_4 = arith.constant 0 : index
    %c0_5 = arith.constant 0 : index
    %3 = vector.load %arg5[%c0_4, %c0_5] : memref<16x1xf32, #tpu.memory_space<vmem>>, vector<16x1xf32>
    %c73_i32 = arith.constant 73 : i32
    %4 = tpu.dynamic_rotate %1 by %c73_i32 dim 1 : vector<16x512xf32>, i32 -> vector<16x512xf32>
    %c0_6 = arith.constant 0 : index
    %c0_7 = arith.constant 0 : index
    %5 = vector.load %arg2[%c0_6, %c0_7] : memref<27x512xf32, #tpu.memory_space<vmem>>, vector<1x512xf32>
    %6 = vector.broadcast %5 : vector<1x512xf32> to vector<16x512xf32>
    %7 = arith.mulf %4, %6 : vector<16x512xf32>
    %c0_8 = arith.constant 0 : index
    %c0_9 = arith.constant 0 : index
    %8 = vector.load %arg14[%c0_8, %c0_9] : memref<432x512xf32, #tpu.memory_space<vmem>>, vector<16x512xf32>
    tpu.vector_store %arg14[%c0_8, %c0_9], %7 {strides = array<i32>} : memref<432x512xf32, #tpu.memory_space<vmem>>, vector<16x512xf32>,
    %c72_i32 = arith.constant 72 : i32
    %9 = tpu.dynamic_rotate %1 by %c72_i32 dim 1 : vector<16x512xf32>, i32 -> vector<16x512xf32>
    %c1 = arith.constant 1 : index
    %c0_10 = arith.constant 0 : index
    %10 = vector.load %arg2[%c1, %c0_10] : memref<27x512xf32, #tpu.memory_space<vmem>>, vector<1x512xf32>
    %11 = vector.broadcast %10 : vector<1x512xf32> to vector<16x512xf32>
    %12 = arith.mulf %9, %11 : vector<16x512xf32>
    %c16 = arith.constant 16 : index
    %c0_11 = arith.constant 0 : index
    %13 = vector.load %arg14[%c16, %c0_11] : memref<432x512xf32, #tpu.memory_space<vmem>>, vector<16x512xf32>
    tpu.vector_store %arg14[%c16, %c0_11], %12 {strides = array<i32>} : memref<432x512xf32, #tpu.memory_space<vmem>>, vector<16x512xf32>,
    %c71_i32 = arith.constant 71 : i32
    %14 = tpu.dynamic_rotate %1 by %c71_i32 dim 1 : vector<16x512xf32>, i32 -> vector<16x512xf32>
    %c2 = arith.constant 2 : index
    %c0_12 = arith.constant 0 : index
    %15 = vector.load %arg2[%c2, %c0_12] : memref<27x512xf32, #tpu.memory_space<vmem>>, vector<1x512xf32>
    %16 = vector.broadcast %15 : vector<1x512xf32> to vector<16x512xf32>
    %17 = arith.mulf %14, %16 : vector<16x512xf32>
    %c32 = arith.constant 32 : index
    %c0_13 = arith.constant 0 : index
    %18 = vector.load %arg14[%c32, %c0_13] : memref<432x512xf32, #tpu.memory_space<vmem>>, vector<16x512xf32>
    tpu.vector_store %arg14[%c32, %c0_13], %17 {strides = array<i32>} : memref<432x512xf32, #tpu.memory_space<vmem>>, vector<16x512xf32>,
    %c65_i32 = arith.constant 65 : i32
    %19 = tpu.dynamic_rotate %1 by %c65_i32 dim 1 : vector<16x512xf32>, i32 -> vector<16x512xf32>
    %c3 = arith.constant 3 : index
    %c0_14 = arith.constant 0 : index
    %20 = vector.load %arg2[%c3, %c0_14] : memref<27x512xf32, #tpu.memory_space<vmem>>, vector<1x512xf32>
    %21 = vector.broadcast %20 : vector<1x512xf32> to vector<16x512xf32>
    %22 = arith.mulf %19, %21 : vector<16x512xf32>
    %c48 = arith.constant 48 : index
    %c0_15 = arith.constant 0 : index
    %23 = vector.load %arg14[%c48, %c0_15] : memref<432x512xf32, #tpu.memory_space<vmem>>, vector<16x512xf32>
    tpu.vector_store %arg14[%c48, %c0_15], %22 {strides = array<i32>} : memref<432x512xf32, #tpu.memory_space<vmem>>, vector<16x512xf32>,
    %c64_i32 = arith.constant 64 : i32
    %24 = tpu.dynamic_rotate %1 by %c64_i32 dim 1 : vector<16x512xf32>, i32 -> vector<16x512xf32>
    %c4 = arith.constant 4 : index
    %c0_16 = arith.constant 0 : index
    %25 = vector.load %arg2[%c4, %c0_16] : memref<27x512xf32, #tpu.memory_space<vmem>>, vector<1x512xf32>
    %26 = vector.broadcast %25 : vector<1x512xf32> to vector<16x512xf32>
    %27 = arith.mulf %24, %26 : vector<16x512xf32>
    %c64 = arith.constant 64 : index
    %c0_17 = arith.constant 0 : index
    %28 = vector.load %arg14[%c64, %c0_17] : memref<432x512xf32, #tpu.memory_space<vmem>>, vector<16x512xf32>
    tpu.vector_store %arg14[%c64, %c0_17], %27 {strides = array<i32>} : memref<432x512xf32, #tpu.memory_space<vmem>>, vector<16x512xf32>,
    %c63_i32 = arith.constant 63 : i32
    %29 = tpu.dynamic_rotate %1 by %c63_i32 dim 1 : vector<16x512xf32>, i32 -> vector<16x512xf32>
    %c5 = arith.constant 5 : index
    %c0_18 = arith.constant 0 : index
    %30 = vector.load %arg2[%c5, %c0_18] : memref<27x512xf32, #tpu.memory_space<vmem>>, vector<1x512xf32>
    %31 = vector.broadcast %30 : vector<1x512xf32> to vector<16x512xf32>
    %32 = arith.mulf %29, %31 : vector<16x512xf32>
    %c80 = arith.constant 80 : index
    %c0_19 = arith.constant 0 : index
    %33 = vector.load %arg14[%c80, %c0_19] : memref<432x512xf32, #tpu.memory_space<vmem>>, vector<16x512xf32>
    tpu.vector_store %arg14[%c80, %c0_19], %32 {strides = array<i32>} : memref<432x512xf32, #tpu.memory_space<vmem>>, vector<16x512xf32>,
    %c57_i32 = arith.constant 57 : i32
    %34 = tpu.dynamic_rotate %1 by %c57_i32 dim 1 : vector<16x512xf32>, i32 -> vector<16x512xf32>
    %c6 = arith.constant 6 : index
    %c0_20 = arith.constant 0 : index
    %35 = vector.load %arg2[%c6, %c0_20] : memref<27x512xf32, #tpu.memory_space<vmem>>, vector<1x512xf32>
    %36 = vector.broadcast %35 : vector<1x512xf32> to vector<16x512xf32>
    %37 = arith.mulf %34, %36 : vector<16x512xf32>
    %c96 = arith.constant 96 : index
    %c0_21 = arith.constant 0 : index
    %38 = vector.load %arg14[%c96, %c0_21] : memref<432x512xf32, #tpu.memory_space<vmem>>, vector<16x512xf32>
    tpu.vector_store %arg14[%c96, %c0_21], %37 {strides = array<i32>} : memref<432x512xf32, #tpu.memory_space<vmem>>, vector<16x512xf32>,
    %c56_i32 = arith.constant 56 : i32
    %39 = tpu.dynamic_rotate %1 by %c56_i32 dim 1 : vector<16x512xf32>, i32 -> vector<16x512xf32>
    %c7 = arith.constant 7 : index
    %c0_22 = arith.constant 0 : index
    %40 = vector.load %arg2[%c7, %c0_22] : memref<27x512xf32, #tpu.memory_space<vmem>>, vector<1x512xf32>
    %41 = vector.broadcast %40 : vector<1x512xf32> to vector<16x512xf32>
    %42 = arith.mulf %39, %41 : vector<16x512xf32>
    %c112 = arith.constant 112 : index
    %c0_23 = arith.constant 0 : index
    %43 = vector.load %arg14[%c112, %c0_23] : memref<432x512xf32, #tpu.memory_space<vmem>>, vector<16x512xf32>
    tpu.vector_store %arg14[%c112, %c0_23], %42 {strides = array<i32>} : memref<432x512xf32, #tpu.memory_space<vmem>>, vector<16x512xf32>,
    %c55_i32 = arith.constant 55 : i32
    %44 = tpu.dynamic_rotate %1 by %c55_i32 dim 1 : vector<16x512xf32>, i32 -> vector<16x512xf32>
    %c8 = arith.constant 8 : index
    %c0_24 = arith.constant 0 : index
    %45 = vector.load %arg2[%c8, %c0_24] : memref<27x512xf32, #tpu.memory_space<vmem>>, vector<1x512xf32>
    %46 = vector.broadcast %45 : vector<1x512xf32> to vector<16x512xf32>
    %47 = arith.mulf %44, %46 : vector<16x512xf32>
    %c128 = arith.constant 128 : index
    %c0_25 = arith.constant 0 : index
    %48 = vector.load %arg14[%c128, %c0_25] : memref<432x512xf32, #tpu.memory_space<vmem>>, vector<16x512xf32>
    tpu.vector_store %arg14[%c128, %c0_25], %47 {strides = array<i32>} : memref<432x512xf32, #tpu.memory_space<vmem>>, vector<16x512xf32>,
    %c9_i32 = arith.constant 9 : i32
    %49 = tpu.dynamic_rotate %1 by %c9_i32 dim 1 : vector<16x512xf32>, i32 -> vector<16x512xf32>
    %c9 = arith.constant 9 : index
    %c0_26 = arith.constant 0 : index
    %50 = vector.load %arg2[%c9, %c0_26] : memref<27x512xf32, #tpu.memory_space<vmem>>, vector<1x512xf32>
    %51 = vector.broadcast %50 : vector<1x512xf32> to vector<16x512xf32>
    %52 = arith.mulf %49, %51 : vector<16x512xf32>
    %c144 = arith.constant 144 : index
    %c0_27 = arith.constant 0 : index
    %53 = vector.load %arg14[%c144, %c0_27] : memref<432x512xf32, #tpu.memory_space<vmem>>, vector<16x512xf32>
    tpu.vector_store %arg14[%c144, %c0_27], %52 {strides = array<i32>} : memref<432x512xf32, #tpu.memory_space<vmem>>, vector<16x512xf32>,
    %c8_i32 = arith.constant 8 : i32
    %54 = tpu.dynamic_rotate %1 by %c8_i32 dim 1 : vector<16x512xf32>, i32 -> vector<16x512xf32>
    %c10 = arith.constant 10 : index
    %c0_28 = arith.constant 0 : index
    %55 = vector.load %arg2[%c10, %c0_28] : memref<27x512xf32, #tpu.memory_space<vmem>>, vector<1x512xf32>
    %56 = vector.broadcast %55 : vector<1x512xf32> to vector<16x512xf32>
    %57 = arith.mulf %54, %56 : vector<16x512xf32>
    %c160 = arith.constant 160 : index
    %c0_29 = arith.constant 0 : index
    %58 = vector.load %arg14[%c160, %c0_29] : memref<432x512xf32, #tpu.memory_space<vmem>>, vector<16x512xf32>
    tpu.vector_store %arg14[%c160, %c0_29], %57 {strides = array<i32>} : memref<432x512xf32, #tpu.memory_space<vmem>>, vector<16x512xf32>,
    %c7_i32 = arith.constant 7 : i32
    %59 = tpu.dynamic_rotate %1 by %c7_i32 dim 1 : vector<16x512xf32>, i32 -> vector<16x512xf32>
    %c11 = arith.constant 11 : index
    %c0_30 = arith.constant 0 : index
    %60 = vector.load %arg2[%c11, %c0_30] : memref<27x512xf32, #tpu.memory_space<vmem>>, vector<1x512xf32>
    %61 = vector.broadcast %60 : vector<1x512xf32> to vector<16x512xf32>
    %62 = arith.mulf %59, %61 : vector<16x512xf32>
    %c176 = arith.constant 176 : index
    %c0_31 = arith.constant 0 : index
    %63 = vector.load %arg14[%c176, %c0_31] : memref<432x512xf32, #tpu.memory_space<vmem>>, vector<16x512xf32>
    tpu.vector_store %arg14[%c176, %c0_31], %62 {strides = array<i32>} : memref<432x512xf32, #tpu.memory_space<vmem>>, vector<16x512xf32>,
    %c1_i32 = arith.constant 1 : i32
    %64 = tpu.dynamic_rotate %1 by %c1_i32 dim 1 : vector<16x512xf32>, i32 -> vector<16x512xf32>
    %c12 = arith.constant 12 : index
    %c0_32 = arith.constant 0 : index
    %65 = vector.load %arg2[%c12, %c0_32] : memref<27x512xf32, #tpu.memory_space<vmem>>, vector<1x512xf32>
    %66 = vector.broadcast %65 : vector<1x512xf32> to vector<16x512xf32>
    %67 = arith.mulf %64, %66 : vector<16x512xf32>
    %c192 = arith.constant 192 : index
    %c0_33 = arith.constant 0 : index
    %68 = vector.load %arg14[%c192, %c0_33] : memref<432x512xf32, #tpu.memory_space<vmem>>, vector<16x512xf32>
    tpu.vector_store %arg14[%c192, %c0_33], %67 {strides = array<i32>} : memref<432x512xf32, #tpu.memory_space<vmem>>, vector<16x512xf32>,
    %c208 = arith.constant 208 : index
    %c0_34 = arith.constant 0 : index
    %69 = vector.load %arg14[%c208, %c0_34] : memref<432x512xf32, #tpu.memory_space<vmem>>, vector<16x512xf32>
    tpu.vector_store %arg14[%c208, %c0_34], %1 {strides = array<i32>} : memref<432x512xf32, #tpu.memory_space<vmem>>, vector<16x512xf32>,
    %c511_i32 = arith.constant 511 : i32
    %70 = tpu.dynamic_rotate %1 by %c511_i32 dim 1 : vector<16x512xf32>, i32 -> vector<16x512xf32>
    %c14 = arith.constant 14 : index
    %c0_35 = arith.constant 0 : index
    %71 = vector.load %arg2[%c14, %c0_35] : memref<27x512xf32, #tpu.memory_space<vmem>>, vector<1x512xf32>
    %72 = vector.broadcast %71 : vector<1x512xf32> to vector<16x512xf32>
    %73 = arith.mulf %70, %72 : vector<16x512xf32>
    %c224 = arith.constant 224 : index
    %c0_36 = arith.constant 0 : index
    %74 = vector.load %arg14[%c224, %c0_36] : memref<432x512xf32, #tpu.memory_space<vmem>>, vector<16x512xf32>
    tpu.vector_store %arg14[%c224, %c0_36], %73 {strides = array<i32>} : memref<432x512xf32, #tpu.memory_space<vmem>>, vector<16x512xf32>,
    %c505_i32 = arith.constant 505 : i32
    %75 = tpu.dynamic_rotate %1 by %c505_i32 dim 1 : vector<16x512xf32>, i32 -> vector<16x512xf32>
    %c15 = arith.constant 15 : index
    %c0_37 = arith.constant 0 : index
    %76 = vector.load %arg2[%c15, %c0_37] : memref<27x512xf32, #tpu.memory_space<vmem>>, vector<1x512xf32>
    %77 = vector.broadcast %76 : vector<1x512xf32> to vector<16x512xf32>
    %78 = arith.mulf %75, %77 : vector<16x512xf32>
    %c240 = arith.constant 240 : index
    %c0_38 = arith.constant 0 : index
    %79 = vector.load %arg14[%c240, %c0_38] : memref<432x512xf32, #tpu.memory_space<vmem>>, vector<16x512xf32>
    tpu.vector_store %arg14[%c240, %c0_38], %78 {strides = array<i32>} : memref<432x512xf32, #tpu.memory_space<vmem>>, vector<16x512xf32>,
    %c504_i32 = arith.constant 504 : i32
    %80 = tpu.dynamic_rotate %1 by %c504_i32 dim 1 : vector<16x512xf32>, i32 -> vector<16x512xf32>
    %c16_39 = arith.constant 16 : index
    %c0_40 = arith.constant 0 : index
    %81 = vector.load %arg2[%c16_39, %c0_40] : memref<27x512xf32, #tpu.memory_space<vmem>>, vector<1x512xf32>
    %82 = vector.broadcast %81 : vector<1x512xf32> to vector<16x512xf32>
    %83 = arith.mulf %80, %82 : vector<16x512xf32>
    %c256 = arith.constant 256 : index
    %c0_41 = arith.constant 0 : index
    %84 = vector.load %arg14[%c256, %c0_41] : memref<432x512xf32, #tpu.memory_space<vmem>>, vector<16x512xf32>
    tpu.vector_store %arg14[%c256, %c0_41], %83 {strides = array<i32>} : memref<432x512xf32, #tpu.memory_space<vmem>>, vector<16x512xf32>,
    %c503_i32 = arith.constant 503 : i32
    %85 = tpu.dynamic_rotate %1 by %c503_i32 dim 1 : vector<16x512xf32>, i32 -> vector<16x512xf32>
    %c17 = arith.constant 17 : index
    %c0_42 = arith.constant 0 : index
    %86 = vector.load %arg2[%c17, %c0_42] : memref<27x512xf32, #tpu.memory_space<vmem>>, vector<1x512xf32>
    %87 = vector.broadcast %86 : vector<1x512xf32> to vector<16x512xf32>
    %88 = arith.mulf %85, %87 : vector<16x512xf32>
    %c272 = arith.constant 272 : index
    %c0_43 = arith.constant 0 : index
    %89 = vector.load %arg14[%c272, %c0_43] : memref<432x512xf32, #tpu.memory_space<vmem>>, vector<16x512xf32>
    tpu.vector_store %arg14[%c272, %c0_43], %88 {strides = array<i32>} : memref<432x512xf32, #tpu.memory_space<vmem>>, vector<16x512xf32>,
    %c457_i32 = arith.constant 457 : i32
    %90 = tpu.dynamic_rotate %1 by %c457_i32 dim 1 : vector<16x512xf32>, i32 -> vector<16x512xf32>
    %c18 = arith.constant 18 : index
    %c0_44 = arith.constant 0 : index
    %91 = vector.load %arg2[%c18, %c0_44] : memref<27x512xf32, #tpu.memory_space<vmem>>, vector<1x512xf32>
    %92 = vector.broadcast %91 : vector<1x512xf32> to vector<16x512xf32>
    %93 = arith.mulf %90, %92 : vector<16x512xf32>
    %c288 = arith.constant 288 : index
    %c0_45 = arith.constant 0 : index
    %94 = vector.load %arg14[%c288, %c0_45] : memref<432x512xf32, #tpu.memory_space<vmem>>, vector<16x512xf32>
    tpu.vector_store %arg14[%c288, %c0_45], %93 {strides = array<i32>} : memref<432x512xf32, #tpu.memory_space<vmem>>, vector<16x512xf32>,
    %c456_i32 = arith.constant 456 : i32
    %95 = tpu.dynamic_rotate %1 by %c456_i32 dim 1 : vector<16x512xf32>, i32 -> vector<16x512xf32>
    %c19 = arith.constant 19 : index
    %c0_46 = arith.constant 0 : index
    %96 = vector.load %arg2[%c19, %c0_46] : memref<27x512xf32, #tpu.memory_space<vmem>>, vector<1x512xf32>
    %97 = vector.broadcast %96 : vector<1x512xf32> to vector<16x512xf32>
    %98 = arith.mulf %95, %97 : vector<16x512xf32>
    %c304 = arith.constant 304 : index
    %c0_47 = arith.constant 0 : index
    %99 = vector.load %arg14[%c304, %c0_47] : memref<432x512xf32, #tpu.memory_space<vmem>>, vector<16x512xf32>
    tpu.vector_store %arg14[%c304, %c0_47], %98 {strides = array<i32>} : memref<432x512xf32, #tpu.memory_space<vmem>>, vector<16x512xf32>,
    %c455_i32 = arith.constant 455 : i32
    %100 = tpu.dynamic_rotate %1 by %c455_i32 dim 1 : vector<16x512xf32>, i32 -> vector<16x512xf32>
    %c20 = arith.constant 20 : index
    %c0_48 = arith.constant 0 : index
    %101 = vector.load %arg2[%c20, %c0_48] : memref<27x512xf32, #tpu.memory_space<vmem>>, vector<1x512xf32>
    %102 = vector.broadcast %101 : vector<1x512xf32> to vector<16x512xf32>
    %103 = arith.mulf %100, %102 : vector<16x512xf32>
    %c320 = arith.constant 320 : index
    %c0_49 = arith.constant 0 : index
    %104 = vector.load %arg14[%c320, %c0_49] : memref<432x512xf32, #tpu.memory_space<vmem>>, vector<16x512xf32>
    tpu.vector_store %arg14[%c320, %c0_49], %103 {strides = array<i32>} : memref<432x512xf32, #tpu.memory_space<vmem>>, vector<16x512xf32>,
    %c449_i32 = arith.constant 449 : i32
    %105 = tpu.dynamic_rotate %1 by %c449_i32 dim 1 : vector<16x512xf32>, i32 -> vector<16x512xf32>
    %c21 = arith.constant 21 : index
    %c0_50 = arith.constant 0 : index
    %106 = vector.load %arg2[%c21, %c0_50] : memref<27x512xf32, #tpu.memory_space<vmem>>, vector<1x512xf32>
    %107 = vector.broadcast %106 : vector<1x512xf32> to vector<16x512xf32>
    %108 = arith.mulf %105, %107 : vector<16x512xf32>
    %c336 = arith.constant 336 : index
    %c0_51 = arith.constant 0 : index
    %109 = vector.load %arg14[%c336, %c0_51] : memref<432x512xf32, #tpu.memory_space<vmem>>, vector<16x512xf32>
    tpu.vector_store %arg14[%c336, %c0_51], %108 {strides = array<i32>} : memref<432x512xf32, #tpu.memory_space<vmem>>, vector<16x512xf32>,
    %c448_i32 = arith.constant 448 : i32
    %110 = tpu.dynamic_rotate %1 by %c448_i32 dim 1 : vector<16x512xf32>, i32 -> vector<16x512xf32>
    %c22 = arith.constant 22 : index
    %c0_52 = arith.constant 0 : index
    %111 = vector.load %arg2[%c22, %c0_52] : memref<27x512xf32, #tpu.memory_space<vmem>>, vector<1x512xf32>
    %112 = vector.broadcast %111 : vector<1x512xf32> to vector<16x512xf32>
    %113 = arith.mulf %110, %112 : vector<16x512xf32>
    %c352 = arith.constant 352 : index
    %c0_53 = arith.constant 0 : index
    %114 = vector.load %arg14[%c352, %c0_53] : memref<432x512xf32, #tpu.memory_space<vmem>>, vector<16x512xf32>
    tpu.vector_store %arg14[%c352, %c0_53], %113 {strides = array<i32>} : memref<432x512xf32, #tpu.memory_space<vmem>>, vector<16x512xf32>,
    %c447_i32 = arith.constant 447 : i32
    %115 = tpu.dynamic_rotate %1 by %c447_i32 dim 1 : vector<16x512xf32>, i32 -> vector<16x512xf32>
    %c23 = arith.constant 23 : index
    %c0_54 = arith.constant 0 : index
    %116 = vector.load %arg2[%c23, %c0_54] : memref<27x512xf32, #tpu.memory_space<vmem>>, vector<1x512xf32>
    %117 = vector.broadcast %116 : vector<1x512xf32> to vector<16x512xf32>
    %118 = arith.mulf %115, %117 : vector<16x512xf32>
    %c368 = arith.constant 368 : index
    %c0_55 = arith.constant 0 : index
    %119 = vector.load %arg14[%c368, %c0_55] : memref<432x512xf32, #tpu.memory_space<vmem>>, vector<16x512xf32>
    tpu.vector_store %arg14[%c368, %c0_55], %118 {strides = array<i32>} : memref<432x512xf32, #tpu.memory_space<vmem>>, vector<16x512xf32>,
    %c441_i32 = arith.constant 441 : i32
    %120 = tpu.dynamic_rotate %1 by %c441_i32 dim 1 : vector<16x512xf32>, i32 -> vector<16x512xf32>
    %c24 = arith.constant 24 : index
    %c0_56 = arith.constant 0 : index
    %121 = vector.load %arg2[%c24, %c0_56] : memref<27x512xf32, #tpu.memory_space<vmem>>, vector<1x512xf32>
    %122 = vector.broadcast %121 : vector<1x512xf32> to vector<16x512xf32>
    %123 = arith.mulf %120, %122 : vector<16x512xf32>
    %c384 = arith.constant 384 : index
    %c0_57 = arith.constant 0 : index
    %124 = vector.load %arg14[%c384, %c0_57] : memref<432x512xf32, #tpu.memory_space<vmem>>, vector<16x512xf32>
    tpu.vector_store %arg14[%c384, %c0_57], %123 {strides = array<i32>} : memref<432x512xf32, #tpu.memory_space<vmem>>, vector<16x512xf32>,
    %c440_i32 = arith.constant 440 : i32
    %125 = tpu.dynamic_rotate %1 by %c440_i32 dim 1 : vector<16x512xf32>, i32 -> vector<16x512xf32>
    %c25 = arith.constant 25 : index
    %c0_58 = arith.constant 0 : index
    %126 = vector.load %arg2[%c25, %c0_58] : memref<27x512xf32, #tpu.memory_space<vmem>>, vector<1x512xf32>
    %127 = vector.broadcast %126 : vector<1x512xf32> to vector<16x512xf32>
    %128 = arith.mulf %125, %127 : vector<16x512xf32>
    %c400 = arith.constant 400 : index
    %c0_59 = arith.constant 0 : index
    %129 = vector.load %arg14[%c400, %c0_59] : memref<432x512xf32, #tpu.memory_space<vmem>>, vector<16x512xf32>
    tpu.vector_store %arg14[%c400, %c0_59], %128 {strides = array<i32>} : memref<432x512xf32, #tpu.memory_space<vmem>>, vector<16x512xf32>,
    %c439_i32 = arith.constant 439 : i32
    %130 = tpu.dynamic_rotate %1 by %c439_i32 dim 1 : vector<16x512xf32>, i32 -> vector<16x512xf32>
    %c26 = arith.constant 26 : index
    %c0_60 = arith.constant 0 : index
    %131 = vector.load %arg2[%c26, %c0_60] : memref<27x512xf32, #tpu.memory_space<vmem>>, vector<1x512xf32>
    %132 = vector.broadcast %131 : vector<1x512xf32> to vector<16x512xf32>
    %133 = arith.mulf %130, %132 : vector<16x512xf32>
    %c416 = arith.constant 416 : index
    %c0_61 = arith.constant 0 : index
    %134 = vector.load %arg14[%c416, %c0_61] : memref<432x512xf32, #tpu.memory_space<vmem>>, vector<16x512xf32>
    tpu.vector_store %arg14[%c416, %c0_61], %133 {strides = array<i32>} : memref<432x512xf32, #tpu.memory_space<vmem>>, vector<16x512xf32>,
    %c0_62 = arith.constant 0 : index
    %c0_63 = arith.constant 0 : index
    %135 = vector.load %arg3[%c0_62, %c0_63] : memref<16x432xf32, #tpu.memory_space<vmem>>, vector<16x432xf32>
    %c0_64 = arith.constant 0 : index
    %c0_65 = arith.constant 0 : index
    %136 = vector.load %arg14[%c0_64, %c0_65] : memref<432x512xf32, #tpu.memory_space<vmem>>, vector<432x512xf32>
    %cst = arith.constant dense<0.000000e+00> : vector<16x512xf32>
    %137 = tpu.matmul %135, %136, %cst {dimension_numbers = #tpu.dot_dimension_numbers<[1], [0], [0], [1], [0, 0, 1, 1], [], []>} : vector<16x432xf32>, vector<432x512xf32>, vector<16x512xf32> -> vector<16x512xf32>
    %138 = vector.shape_cast %137 : vector<16x512xf32> to vector<1x16x512xf32>
    %cst_66 = arith.constant dense<0.000000e+00> : vector<1xf32>
    %139 = vector.multi_reduction <add>, %138, %cst_66 [1, 2] : vector<1x16x512xf32> to vector<1xf32>
    %140 = vector.shape_cast %139 : vector<1xf32> to vector<1x1x1xf32>
    %141 = vector.extract %140[0, 0, 0] : f32 from vector<1x1x1xf32>
    %cst_67 = arith.constant 1.22070313E-4 : f32
    %142 = arith.mulf %141, %cst_67 : f32
    %143 = arith.mulf %137, %137 : vector<16x512xf32>
    %144 = vector.shape_cast %143 : vector<16x512xf32> to vector<1x16x512xf32>
    %cst_68 = arith.constant dense<0.000000e+00> : vector<1xf32>
    %145 = vector.multi_reduction <add>, %144, %cst_68 [1, 2] : vector<1x16x512xf32> to vector<1xf32>
    %146 = vector.shape_cast %145 : vector<1xf32> to vector<1x1x1xf32>
    %147 = vector.extract %146[0, 0, 0] : f32 from vector<1x1x1xf32>
    %cst_69 = arith.constant 1.22070313E-4 : f32
    %148 = arith.mulf %147, %cst_69 : f32
    %149 = arith.mulf %142, %142 : f32
    %150 = arith.subf %148, %149 : f32
    %151 = vector.broadcast %142 : f32 to vector<16x512xf32>
    %152 = arith.subf %137, %151 : vector<16x512xf32>
    %cst_70 = arith.constant 9.99999974E-6 : f32
    %153 = arith.addf %150, %cst_70 : f32
    %154 = math.rsqrt %153 : f32
    %155 = vector.broadcast %154 : f32 to vector<16x512xf32>
    %156 = arith.mulf %152, %155 : vector<16x512xf32>
    %157 = vector.broadcast %2 : vector<16x1xf32> to vector<16x512xf32>
    %158 = arith.mulf %156, %157 : vector<16x512xf32>
    %159 = vector.broadcast %3 : vector<16x1xf32> to vector<16x512xf32>
    %160 = arith.addf %158, %159 : vector<16x512xf32>
    %cst_71 = arith.constant 5.000000e-01 : f32
    %161 = vector.broadcast %cst_71 : f32 to vector<16x512xf32>
    %162 = arith.mulf %161, %160 : vector<16x512xf32>
    %cst_72 = arith.constant 0.707106769 : f32
    %163 = vector.broadcast %cst_72 : f32 to vector<16x512xf32>
    %164 = arith.mulf %160, %163 : vector<16x512xf32>
    %cst_73 = arith.constant -4.000000e+00 : f32
    %cst_74 = arith.constant 4.000000e+00 : f32
    %165 = vector.broadcast %cst_73 : f32 to vector<16x512xf32>
    %166 = arith.maximumf %165, %164 : vector<16x512xf32>
    %167 = vector.broadcast %cst_74 : f32 to vector<16x512xf32>
    %168 = arith.minimumf %167, %166 : vector<16x512xf32>
    %169 = arith.mulf %168, %168 : vector<16x512xf32>
    %cst_75 = arith.constant -2.72614237E-10 : f32
    %170 = vector.broadcast %cst_75 : f32 to vector<16x512xf32>
    %171 = arith.mulf %169, %170 : vector<16x512xf32>
    %cst_76 = arith.constant 2.77068146E-8 : f32
    %172 = vector.broadcast %cst_76 : f32 to vector<16x512xf32>
    %173 = arith.addf %171, %172 : vector<16x512xf32>
    %174 = arith.mulf %169, %173 : vector<16x512xf32>
    %cst_77 = arith.constant -2.10102394E-6 : f32
    %175 = vector.broadcast %cst_77 : f32 to vector<16x512xf32>
    %176 = arith.addf %174, %175 : vector<16x512xf32>
    %177 = arith.mulf %169, %176 : vector<16x512xf32>
    %cst_78 = arith.constant -5.69250624E-5 : f32
    %178 = vector.broadcast %cst_78 : f32 to vector<16x512xf32>
    %179 = arith.addf %177, %178 : vector<16x512xf32>
    %180 = arith.mulf %169, %179 : vector<16x512xf32>
    %cst_79 = arith.constant -7.34990637E-4 : f32
    %181 = vector.broadcast %cst_79 : f32 to vector<16x512xf32>
    %182 = arith.addf %180, %181 : vector<16x512xf32>
    %183 = arith.mulf %169, %182 : vector<16x512xf32>
    %cst_80 = arith.constant -2.954600e-03 : f32
    %184 = vector.broadcast %cst_80 : f32 to vector<16x512xf32>
    %185 = arith.addf %183, %184 : vector<16x512xf32>
    %186 = arith.mulf %169, %185 : vector<16x512xf32>
    %cst_81 = arith.constant -0.0160960332 : f32
    %187 = vector.broadcast %cst_81 : f32 to vector<16x512xf32>
    %188 = arith.addf %186, %187 : vector<16x512xf32>
    %189 = arith.mulf %168, %188 : vector<16x512xf32>
    %cst_82 = arith.constant -1.45660715E-5 : f32
    %190 = vector.broadcast %cst_82 : f32 to vector<16x512xf32>
    %191 = arith.mulf %169, %190 : vector<16x512xf32>
    %cst_83 = arith.constant -2.13374049E-4 : f32
    %192 = vector.broadcast %cst_83 : f32 to vector<16x512xf32>
    %193 = arith.addf %191, %192 : vector<16x512xf32>
    %194 = arith.mulf %169, %193 : vector<16x512xf32>
    %cst_84 = arith.constant -0.00168282702 : f32
    %195 = vector.broadcast %cst_84 : f32 to vector<16x512xf32>
    %196 = arith.addf %194, %195 : vector<16x512xf32>
    %197 = arith.mulf %169, %196 : vector<16x512xf32>
    %cst_85 = arith.constant -0.00737332925 : f32
    %198 = vector.broadcast %cst_85 : f32 to vector<16x512xf32>
    %199 = arith.addf %197, %198 : vector<16x512xf32>
    %200 = arith.mulf %169, %199 : vector<16x512xf32>
    %cst_86 = arith.constant -0.0142647391 : f32
    %201 = vector.broadcast %cst_86 : f32 to vector<16x512xf32>
    %202 = arith.addf %200, %201 : vector<16x512xf32>
    %203 = arith.divf %189, %202 : vector<16x512xf32>
    %cst_87 = arith.constant 1.000000e+00 : f32
    %204 = vector.broadcast %cst_87 : f32 to vector<16x512xf32>
    %205 = arith.addf %204, %203 : vector<16x512xf32>
    %206 = arith.mulf %162, %205 : vector<16x512xf32>
    %c0_88 = arith.constant 0 : index
    %c0_89 = arith.constant 0 : index
    %207 = vector.load %arg7[%c0_88, %c0_89] : memref<16x1xf32, #tpu.memory_space<vmem>>, vector<16x1xf32>
    %c0_90 = arith.constant 0 : index
    %c0_91 = arith.constant 0 : index
    %208 = vector.load %arg8[%c0_90, %c0_91] : memref<16x1xf32, #tpu.memory_space<vmem>>, vector<16x1xf32>
    %c73_i32_92 = arith.constant 73 : i32
    %209 = tpu.dynamic_rotate %206 by %c73_i32_92 dim 1 : vector<16x512xf32>, i32 -> vector<16x512xf32>
    %c0_93 = arith.constant 0 : index
    %c0_94 = arith.constant 0 : index
    %210 = vector.load %arg2[%c0_93, %c0_94] : memref<27x512xf32, #tpu.memory_space<vmem>>, vector<1x512xf32>
    %211 = vector.broadcast %210 : vector<1x512xf32> to vector<16x512xf32>
    %212 = arith.mulf %209, %211 : vector<16x512xf32>
    %c0_95 = arith.constant 0 : index
    %c0_96 = arith.constant 0 : index
    %213 = vector.load %arg14[%c0_95, %c0_96] : memref<432x512xf32, #tpu.memory_space<vmem>>, vector<16x512xf32>
    tpu.vector_store %arg14[%c0_95, %c0_96], %212 {strides = array<i32>} : memref<432x512xf32, #tpu.memory_space<vmem>>, vector<16x512xf32>,
    %c72_i32_97 = arith.constant 72 : i32
    %214 = tpu.dynamic_rotate %206 by %c72_i32_97 dim 1 : vector<16x512xf32>, i32 -> vector<16x512xf32>
    %c1_98 = arith.constant 1 : index
    %c0_99 = arith.constant 0 : index
    %215 = vector.load %arg2[%c1_98, %c0_99] : memref<27x512xf32, #tpu.memory_space<vmem>>, vector<1x512xf32>
    %216 = vector.broadcast %215 : vector<1x512xf32> to vector<16x512xf32>
    %217 = arith.mulf %214, %216 : vector<16x512xf32>
    %c16_100 = arith.constant 16 : index
    %c0_101 = arith.constant 0 : index
    %218 = vector.load %arg14[%c16_100, %c0_101] : memref<432x512xf32, #tpu.memory_space<vmem>>, vector<16x512xf32>
    tpu.vector_store %arg14[%c16_100, %c0_101], %217 {strides = array<i32>} : memref<432x512xf32, #tpu.memory_space<vmem>>, vector<16x512xf32>,
    %c71_i32_102 = arith.constant 71 : i32
    %219 = tpu.dynamic_rotate %206 by %c71_i32_102 dim 1 : vector<16x512xf32>, i32 -> vector<16x512xf32>
    %c2_103 = arith.constant 2 : index
    %c0_104 = arith.constant 0 : index
    %220 = vector.load %arg2[%c2_103, %c0_104] : memref<27x512xf32, #tpu.memory_space<vmem>>, vector<1x512xf32>
    %221 = vector.broadcast %220 : vector<1x512xf32> to vector<16x512xf32>
    %222 = arith.mulf %219, %221 : vector<16x512xf32>
    %c32_105 = arith.constant 32 : index
    %c0_106 = arith.constant 0 : index
    %223 = vector.load %arg14[%c32_105, %c0_106] : memref<432x512xf32, #tpu.memory_space<vmem>>, vector<16x512xf32>
    tpu.vector_store %arg14[%c32_105, %c0_106], %222 {strides = array<i32>} : memref<432x512xf32, #tpu.memory_space<vmem>>, vector<16x512xf32>,
    %c65_i32_107 = arith.constant 65 : i32
    %224 = tpu.dynamic_rotate %206 by %c65_i32_107 dim 1 : vector<16x512xf32>, i32 -> vector<16x512xf32>
    %c3_108 = arith.constant 3 : index
    %c0_109 = arith.constant 0 : index
    %225 = vector.load %arg2[%c3_108, %c0_109] : memref<27x512xf32, #tpu.memory_space<vmem>>, vector<1x512xf32>
    %226 = vector.broadcast %225 : vector<1x512xf32> to vector<16x512xf32>
    %227 = arith.mulf %224, %226 : vector<16x512xf32>
    %c48_110 = arith.constant 48 : index
    %c0_111 = arith.constant 0 : index
    %228 = vector.load %arg14[%c48_110, %c0_111] : memref<432x512xf32, #tpu.memory_space<vmem>>, vector<16x512xf32>
    tpu.vector_store %arg14[%c48_110, %c0_111], %227 {strides = array<i32>} : memref<432x512xf32, #tpu.memory_space<vmem>>, vector<16x512xf32>,
    %c64_i32_112 = arith.constant 64 : i32
    %229 = tpu.dynamic_rotate %206 by %c64_i32_112 dim 1 : vector<16x512xf32>, i32 -> vector<16x512xf32>
    %c4_113 = arith.constant 4 : index
    %c0_114 = arith.constant 0 : index
    %230 = vector.load %arg2[%c4_113, %c0_114] : memref<27x512xf32, #tpu.memory_space<vmem>>, vector<1x512xf32>
    %231 = vector.broadcast %230 : vector<1x512xf32> to vector<16x512xf32>
    %232 = arith.mulf %229, %231 : vector<16x512xf32>
    %c64_115 = arith.constant 64 : index
    %c0_116 = arith.constant 0 : index
    %233 = vector.load %arg14[%c64_115, %c0_116] : memref<432x512xf32, #tpu.memory_space<vmem>>, vector<16x512xf32>
    tpu.vector_store %arg14[%c64_115, %c0_116], %232 {strides = array<i32>} : memref<432x512xf32, #tpu.memory_space<vmem>>, vector<16x512xf32>,
    %c63_i32_117 = arith.constant 63 : i32
    %234 = tpu.dynamic_rotate %206 by %c63_i32_117 dim 1 : vector<16x512xf32>, i32 -> vector<16x512xf32>
    %c5_118 = arith.constant 5 : index
    %c0_119 = arith.constant 0 : index
    %235 = vector.load %arg2[%c5_118, %c0_119] : memref<27x512xf32, #tpu.memory_space<vmem>>, vector<1x512xf32>
    %236 = vector.broadcast %235 : vector<1x512xf32> to vector<16x512xf32>
    %237 = arith.mulf %234, %236 : vector<16x512xf32>
    %c80_120 = arith.constant 80 : index
    %c0_121 = arith.constant 0 : index
    %238 = vector.load %arg14[%c80_120, %c0_121] : memref<432x512xf32, #tpu.memory_space<vmem>>, vector<16x512xf32>
    tpu.vector_store %arg14[%c80_120, %c0_121], %237 {strides = array<i32>} : memref<432x512xf32, #tpu.memory_space<vmem>>, vector<16x512xf32>,
    %c57_i32_122 = arith.constant 57 : i32
    %239 = tpu.dynamic_rotate %206 by %c57_i32_122 dim 1 : vector<16x512xf32>, i32 -> vector<16x512xf32>
    %c6_123 = arith.constant 6 : index
    %c0_124 = arith.constant 0 : index
    %240 = vector.load %arg2[%c6_123, %c0_124] : memref<27x512xf32, #tpu.memory_space<vmem>>, vector<1x512xf32>
    %241 = vector.broadcast %240 : vector<1x512xf32> to vector<16x512xf32>
    %242 = arith.mulf %239, %241 : vector<16x512xf32>
    %c96_125 = arith.constant 96 : index
    %c0_126 = arith.constant 0 : index
    %243 = vector.load %arg14[%c96_125, %c0_126] : memref<432x512xf32, #tpu.memory_space<vmem>>, vector<16x512xf32>
    tpu.vector_store %arg14[%c96_125, %c0_126], %242 {strides = array<i32>} : memref<432x512xf32, #tpu.memory_space<vmem>>, vector<16x512xf32>,
    %c56_i32_127 = arith.constant 56 : i32
    %244 = tpu.dynamic_rotate %206 by %c56_i32_127 dim 1 : vector<16x512xf32>, i32 -> vector<16x512xf32>
    %c7_128 = arith.constant 7 : index
    %c0_129 = arith.constant 0 : index
    %245 = vector.load %arg2[%c7_128, %c0_129] : memref<27x512xf32, #tpu.memory_space<vmem>>, vector<1x512xf32>
    %246 = vector.broadcast %245 : vector<1x512xf32> to vector<16x512xf32>
    %247 = arith.mulf %244, %246 : vector<16x512xf32>
    %c112_130 = arith.constant 112 : index
    %c0_131 = arith.constant 0 : index
    %248 = vector.load %arg14[%c112_130, %c0_131] : memref<432x512xf32, #tpu.memory_space<vmem>>, vector<16x512xf32>
    tpu.vector_store %arg14[%c112_130, %c0_131], %247 {strides = array<i32>} : memref<432x512xf32, #tpu.memory_space<vmem>>, vector<16x512xf32>,
    %c55_i32_132 = arith.constant 55 : i32
    %249 = tpu.dynamic_rotate %206 by %c55_i32_132 dim 1 : vector<16x512xf32>, i32 -> vector<16x512xf32>
    %c8_133 = arith.constant 8 : index
    %c0_134 = arith.constant 0 : index
    %250 = vector.load %arg2[%c8_133, %c0_134] : memref<27x512xf32, #tpu.memory_space<vmem>>, vector<1x512xf32>
    %251 = vector.broadcast %250 : vector<1x512xf32> to vector<16x512xf32>
    %252 = arith.mulf %249, %251 : vector<16x512xf32>
    %c128_135 = arith.constant 128 : index
    %c0_136 = arith.constant 0 : index
    %253 = vector.load %arg14[%c128_135, %c0_136] : memref<432x512xf32, #tpu.memory_space<vmem>>, vector<16x512xf32>
    tpu.vector_store %arg14[%c128_135, %c0_136], %252 {strides = array<i32>} : memref<432x512xf32, #tpu.memory_space<vmem>>, vector<16x512xf32>,
    %c9_i32_137 = arith.constant 9 : i32
    %254 = tpu.dynamic_rotate %206 by %c9_i32_137 dim 1 : vector<16x512xf32>, i32 -> vector<16x512xf32>
    %c9_138 = arith.constant 9 : index
    %c0_139 = arith.constant 0 : index
    %255 = vector.load %arg2[%c9_138, %c0_139] : memref<27x512xf32, #tpu.memory_space<vmem>>, vector<1x512xf32>
    %256 = vector.broadcast %255 : vector<1x512xf32> to vector<16x512xf32>
    %257 = arith.mulf %254, %256 : vector<16x512xf32>
    %c144_140 = arith.constant 144 : index
    %c0_141 = arith.constant 0 : index
    %258 = vector.load %arg14[%c144_140, %c0_141] : memref<432x512xf32, #tpu.memory_space<vmem>>, vector<16x512xf32>
    tpu.vector_store %arg14[%c144_140, %c0_141], %257 {strides = array<i32>} : memref<432x512xf32, #tpu.memory_space<vmem>>, vector<16x512xf32>,
    %c8_i32_142 = arith.constant 8 : i32
    %259 = tpu.dynamic_rotate %206 by %c8_i32_142 dim 1 : vector<16x512xf32>, i32 -> vector<16x512xf32>
    %c10_143 = arith.constant 10 : index
    %c0_144 = arith.constant 0 : index
    %260 = vector.load %arg2[%c10_143, %c0_144] : memref<27x512xf32, #tpu.memory_space<vmem>>, vector<1x512xf32>
    %261 = vector.broadcast %260 : vector<1x512xf32> to vector<16x512xf32>
    %262 = arith.mulf %259, %261 : vector<16x512xf32>
    %c160_145 = arith.constant 160 : index
    %c0_146 = arith.constant 0 : index
    %263 = vector.load %arg14[%c160_145, %c0_146] : memref<432x512xf32, #tpu.memory_space<vmem>>, vector<16x512xf32>
    tpu.vector_store %arg14[%c160_145, %c0_146], %262 {strides = array<i32>} : memref<432x512xf32, #tpu.memory_space<vmem>>, vector<16x512xf32>,
    %c7_i32_147 = arith.constant 7 : i32
    %264 = tpu.dynamic_rotate %206 by %c7_i32_147 dim 1 : vector<16x512xf32>, i32 -> vector<16x512xf32>
    %c11_148 = arith.constant 11 : index
    %c0_149 = arith.constant 0 : index
    %265 = vector.load %arg2[%c11_148, %c0_149] : memref<27x512xf32, #tpu.memory_space<vmem>>, vector<1x512xf32>
    %266 = vector.broadcast %265 : vector<1x512xf32> to vector<16x512xf32>
    %267 = arith.mulf %264, %266 : vector<16x512xf32>
    %c176_150 = arith.constant 176 : index
    %c0_151 = arith.constant 0 : index
    %268 = vector.load %arg14[%c176_150, %c0_151] : memref<432x512xf32, #tpu.memory_space<vmem>>, vector<16x512xf32>
    tpu.vector_store %arg14[%c176_150, %c0_151], %267 {strides = array<i32>} : memref<432x512xf32, #tpu.memory_space<vmem>>, vector<16x512xf32>,
    %c1_i32_152 = arith.constant 1 : i32
    %269 = tpu.dynamic_rotate %206 by %c1_i32_152 dim 1 : vector<16x512xf32>, i32 -> vector<16x512xf32>
    %c12_153 = arith.constant 12 : index
    %c0_154 = arith.constant 0 : index
    %270 = vector.load %arg2[%c12_153, %c0_154] : memref<27x512xf32, #tpu.memory_space<vmem>>, vector<1x512xf32>
    %271 = vector.broadcast %270 : vector<1x512xf32> to vector<16x512xf32>
    %272 = arith.mulf %269, %271 : vector<16x512xf32>
    %c192_155 = arith.constant 192 : index
    %c0_156 = arith.constant 0 : index
    %273 = vector.load %arg14[%c192_155, %c0_156] : memref<432x512xf32, #tpu.memory_space<vmem>>, vector<16x512xf32>
    tpu.vector_store %arg14[%c192_155, %c0_156], %272 {strides = array<i32>} : memref<432x512xf32, #tpu.memory_space<vmem>>, vector<16x512xf32>,
    %c208_157 = arith.constant 208 : index
    %c0_158 = arith.constant 0 : index
    %274 = vector.load %arg14[%c208_157, %c0_158] : memref<432x512xf32, #tpu.memory_space<vmem>>, vector<16x512xf32>
    tpu.vector_store %arg14[%c208_157, %c0_158], %206 {strides = array<i32>} : memref<432x512xf32, #tpu.memory_space<vmem>>, vector<16x512xf32>,
    %c511_i32_159 = arith.constant 511 : i32
    %275 = tpu.dynamic_rotate %206 by %c511_i32_159 dim 1 : vector<16x512xf32>, i32 -> vector<16x512xf32>
    %c14_160 = arith.constant 14 : index
    %c0_161 = arith.constant 0 : index
    %276 = vector.load %arg2[%c14_160, %c0_161] : memref<27x512xf32, #tpu.memory_space<vmem>>, vector<1x512xf32>
    %277 = vector.broadcast %276 : vector<1x512xf32> to vector<16x512xf32>
    %278 = arith.mulf %275, %277 : vector<16x512xf32>
    %c224_162 = arith.constant 224 : index
    %c0_163 = arith.constant 0 : index
    %279 = vector.load %arg14[%c224_162, %c0_163] : memref<432x512xf32, #tpu.memory_space<vmem>>, vector<16x512xf32>
    tpu.vector_store %arg14[%c224_162, %c0_163], %278 {strides = array<i32>} : memref<432x512xf32, #tpu.memory_space<vmem>>, vector<16x512xf32>,
    %c505_i32_164 = arith.constant 505 : i32
    %280 = tpu.dynamic_rotate %206 by %c505_i32_164 dim 1 : vector<16x512xf32>, i32 -> vector<16x512xf32>
    %c15_165 = arith.constant 15 : index
    %c0_166 = arith.constant 0 : index
    %281 = vector.load %arg2[%c15_165, %c0_166] : memref<27x512xf32, #tpu.memory_space<vmem>>, vector<1x512xf32>
    %282 = vector.broadcast %281 : vector<1x512xf32> to vector<16x512xf32>
    %283 = arith.mulf %280, %282 : vector<16x512xf32>
    %c240_167 = arith.constant 240 : index
    %c0_168 = arith.constant 0 : index
    %284 = vector.load %arg14[%c240_167, %c0_168] : memref<432x512xf32, #tpu.memory_space<vmem>>, vector<16x512xf32>
    tpu.vector_store %arg14[%c240_167, %c0_168], %283 {strides = array<i32>} : memref<432x512xf32, #tpu.memory_space<vmem>>, vector<16x512xf32>,
    %c504_i32_169 = arith.constant 504 : i32
    %285 = tpu.dynamic_rotate %206 by %c504_i32_169 dim 1 : vector<16x512xf32>, i32 -> vector<16x512xf32>
    %c16_170 = arith.constant 16 : index
    %c0_171 = arith.constant 0 : index
    %286 = vector.load %arg2[%c16_170, %c0_171] : memref<27x512xf32, #tpu.memory_space<vmem>>, vector<1x512xf32>
    %287 = vector.broadcast %286 : vector<1x512xf32> to vector<16x512xf32>
    %288 = arith.mulf %285, %287 : vector<16x512xf32>
    %c256_172 = arith.constant 256 : index
    %c0_173 = arith.constant 0 : index
    %289 = vector.load %arg14[%c256_172, %c0_173] : memref<432x512xf32, #tpu.memory_space<vmem>>, vector<16x512xf32>
    tpu.vector_store %arg14[%c256_172, %c0_173], %288 {strides = array<i32>} : memref<432x512xf32, #tpu.memory_space<vmem>>, vector<16x512xf32>,
    %c503_i32_174 = arith.constant 503 : i32
    %290 = tpu.dynamic_rotate %206 by %c503_i32_174 dim 1 : vector<16x512xf32>, i32 -> vector<16x512xf32>
    %c17_175 = arith.constant 17 : index
    %c0_176 = arith.constant 0 : index
    %291 = vector.load %arg2[%c17_175, %c0_176] : memref<27x512xf32, #tpu.memory_space<vmem>>, vector<1x512xf32>
    %292 = vector.broadcast %291 : vector<1x512xf32> to vector<16x512xf32>
    %293 = arith.mulf %290, %292 : vector<16x512xf32>
    %c272_177 = arith.constant 272 : index
    %c0_178 = arith.constant 0 : index
    %294 = vector.load %arg14[%c272_177, %c0_178] : memref<432x512xf32, #tpu.memory_space<vmem>>, vector<16x512xf32>
    tpu.vector_store %arg14[%c272_177, %c0_178], %293 {strides = array<i32>} : memref<432x512xf32, #tpu.memory_space<vmem>>, vector<16x512xf32>,
    %c457_i32_179 = arith.constant 457 : i32
    %295 = tpu.dynamic_rotate %206 by %c457_i32_179 dim 1 : vector<16x512xf32>, i32 -> vector<16x512xf32>
    %c18_180 = arith.constant 18 : index
    %c0_181 = arith.constant 0 : index
    %296 = vector.load %arg2[%c18_180, %c0_181] : memref<27x512xf32, #tpu.memory_space<vmem>>, vector<1x512xf32>
    %297 = vector.broadcast %296 : vector<1x512xf32> to vector<16x512xf32>
    %298 = arith.mulf %295, %297 : vector<16x512xf32>
    %c288_182 = arith.constant 288 : index
    %c0_183 = arith.constant 0 : index
    %299 = vector.load %arg14[%c288_182, %c0_183] : memref<432x512xf32, #tpu.memory_space<vmem>>, vector<16x512xf32>
    tpu.vector_store %arg14[%c288_182, %c0_183], %298 {strides = array<i32>} : memref<432x512xf32, #tpu.memory_space<vmem>>, vector<16x512xf32>,
    %c456_i32_184 = arith.constant 456 : i32
    %300 = tpu.dynamic_rotate %206 by %c456_i32_184 dim 1 : vector<16x512xf32>, i32 -> vector<16x512xf32>
    %c19_185 = arith.constant 19 : index
    %c0_186 = arith.constant 0 : index
    %301 = vector.load %arg2[%c19_185, %c0_186] : memref<27x512xf32, #tpu.memory_space<vmem>>, vector<1x512xf32>
    %302 = vector.broadcast %301 : vector<1x512xf32> to vector<16x512xf32>
    %303 = arith.mulf %300, %302 : vector<16x512xf32>
    %c304_187 = arith.constant 304 : index
    %c0_188 = arith.constant 0 : index
    %304 = vector.load %arg14[%c304_187, %c0_188] : memref<432x512xf32, #tpu.memory_space<vmem>>, vector<16x512xf32>
    tpu.vector_store %arg14[%c304_187, %c0_188], %303 {strides = array<i32>} : memref<432x512xf32, #tpu.memory_space<vmem>>, vector<16x512xf32>,
    %c455_i32_189 = arith.constant 455 : i32
    %305 = tpu.dynamic_rotate %206 by %c455_i32_189 dim 1 : vector<16x512xf32>, i32 -> vector<16x512xf32>
    %c20_190 = arith.constant 20 : index
    %c0_191 = arith.constant 0 : index
    %306 = vector.load %arg2[%c20_190, %c0_191] : memref<27x512xf32, #tpu.memory_space<vmem>>, vector<1x512xf32>
    %307 = vector.broadcast %306 : vector<1x512xf32> to vector<16x512xf32>
    %308 = arith.mulf %305, %307 : vector<16x512xf32>
    %c320_192 = arith.constant 320 : index
    %c0_193 = arith.constant 0 : index
    %309 = vector.load %arg14[%c320_192, %c0_193] : memref<432x512xf32, #tpu.memory_space<vmem>>, vector<16x512xf32>
    tpu.vector_store %arg14[%c320_192, %c0_193], %308 {strides = array<i32>} : memref<432x512xf32, #tpu.memory_space<vmem>>, vector<16x512xf32>,
    %c449_i32_194 = arith.constant 449 : i32
    %310 = tpu.dynamic_rotate %206 by %c449_i32_194 dim 1 : vector<16x512xf32>, i32 -> vector<16x512xf32>
    %c21_195 = arith.constant 21 : index
    %c0_196 = arith.constant 0 : index
    %311 = vector.load %arg2[%c21_195, %c0_196] : memref<27x512xf32, #tpu.memory_space<vmem>>, vector<1x512xf32>
    %312 = vector.broadcast %311 : vector<1x512xf32> to vector<16x512xf32>
    %313 = arith.mulf %310, %312 : vector<16x512xf32>
    %c336_197 = arith.constant 336 : index
    %c0_198 = arith.constant 0 : index
    %314 = vector.load %arg14[%c336_197, %c0_198] : memref<432x512xf32, #tpu.memory_space<vmem>>, vector<16x512xf32>
    tpu.vector_store %arg14[%c336_197, %c0_198], %313 {strides = array<i32>} : memref<432x512xf32, #tpu.memory_space<vmem>>, vector<16x512xf32>,
    %c448_i32_199 = arith.constant 448 : i32
    %315 = tpu.dynamic_rotate %206 by %c448_i32_199 dim 1 : vector<16x512xf32>, i32 -> vector<16x512xf32>
    %c22_200 = arith.constant 22 : index
    %c0_201 = arith.constant 0 : index
    %316 = vector.load %arg2[%c22_200, %c0_201] : memref<27x512xf32, #tpu.memory_space<vmem>>, vector<1x512xf32>
    %317 = vector.broadcast %316 : vector<1x512xf32> to vector<16x512xf32>
    %318 = arith.mulf %315, %317 : vector<16x512xf32>
    %c352_202 = arith.constant 352 : index
    %c0_203 = arith.constant 0 : index
    %319 = vector.load %arg14[%c352_202, %c0_203] : memref<432x512xf32, #tpu.memory_space<vmem>>, vector<16x512xf32>
    tpu.vector_store %arg14[%c352_202, %c0_203], %318 {strides = array<i32>} : memref<432x512xf32, #tpu.memory_space<vmem>>, vector<16x512xf32>,
    %c447_i32_204 = arith.constant 447 : i32
    %320 = tpu.dynamic_rotate %206 by %c447_i32_204 dim 1 : vector<16x512xf32>, i32 -> vector<16x512xf32>
    %c23_205 = arith.constant 23 : index
    %c0_206 = arith.constant 0 : index
    %321 = vector.load %arg2[%c23_205, %c0_206] : memref<27x512xf32, #tpu.memory_space<vmem>>, vector<1x512xf32>
    %322 = vector.broadcast %321 : vector<1x512xf32> to vector<16x512xf32>
    %323 = arith.mulf %320, %322 : vector<16x512xf32>
    %c368_207 = arith.constant 368 : index
    %c0_208 = arith.constant 0 : index
    %324 = vector.load %arg14[%c368_207, %c0_208] : memref<432x512xf32, #tpu.memory_space<vmem>>, vector<16x512xf32>
    tpu.vector_store %arg14[%c368_207, %c0_208], %323 {strides = array<i32>} : memref<432x512xf32, #tpu.memory_space<vmem>>, vector<16x512xf32>,
    %c441_i32_209 = arith.constant 441 : i32
    %325 = tpu.dynamic_rotate %206 by %c441_i32_209 dim 1 : vector<16x512xf32>, i32 -> vector<16x512xf32>
    %c24_210 = arith.constant 24 : index
    %c0_211 = arith.constant 0 : index
    %326 = vector.load %arg2[%c24_210, %c0_211] : memref<27x512xf32, #tpu.memory_space<vmem>>, vector<1x512xf32>
    %327 = vector.broadcast %326 : vector<1x512xf32> to vector<16x512xf32>
    %328 = arith.mulf %325, %327 : vector<16x512xf32>
    %c384_212 = arith.constant 384 : index
    %c0_213 = arith.constant 0 : index
    %329 = vector.load %arg14[%c384_212, %c0_213] : memref<432x512xf32, #tpu.memory_space<vmem>>, vector<16x512xf32>
    tpu.vector_store %arg14[%c384_212, %c0_213], %328 {strides = array<i32>} : memref<432x512xf32, #tpu.memory_space<vmem>>, vector<16x512xf32>,
    %c440_i32_214 = arith.constant 440 : i32
    %330 = tpu.dynamic_rotate %206 by %c440_i32_214 dim 1 : vector<16x512xf32>, i32 -> vector<16x512xf32>
    %c25_215 = arith.constant 25 : index
    %c0_216 = arith.constant 0 : index
    %331 = vector.load %arg2[%c25_215, %c0_216] : memref<27x512xf32, #tpu.memory_space<vmem>>, vector<1x512xf32>
    %332 = vector.broadcast %331 : vector<1x512xf32> to vector<16x512xf32>
    %333 = arith.mulf %330, %332 : vector<16x512xf32>
    %c400_217 = arith.constant 400 : index
    %c0_218 = arith.constant 0 : index
    %334 = vector.load %arg14[%c400_217, %c0_218] : memref<432x512xf32, #tpu.memory_space<vmem>>, vector<16x512xf32>
    tpu.vector_store %arg14[%c400_217, %c0_218], %333 {strides = array<i32>} : memref<432x512xf32, #tpu.memory_space<vmem>>, vector<16x512xf32>,
    %c439_i32_219 = arith.constant 439 : i32
    %335 = tpu.dynamic_rotate %206 by %c439_i32_219 dim 1 : vector<16x512xf32>, i32 -> vector<16x512xf32>
    %c26_220 = arith.constant 26 : index
    %c0_221 = arith.constant 0 : index
    %336 = vector.load %arg2[%c26_220, %c0_221] : memref<27x512xf32, #tpu.memory_space<vmem>>, vector<1x512xf32>
    %337 = vector.broadcast %336 : vector<1x512xf32> to vector<16x512xf32>
    %338 = arith.mulf %335, %337 : vector<16x512xf32>
    %c416_222 = arith.constant 416 : index
    %c0_223 = arith.constant 0 : index
    %339 = vector.load %arg14[%c416_222, %c0_223] : memref<432x512xf32, #tpu.memory_space<vmem>>, vector<16x512xf32>
    tpu.vector_store %arg14[%c416_222, %c0_223], %338 {strides = array<i32>} : memref<432x512xf32, #tpu.memory_space<vmem>>, vector<16x512xf32>,
    %c0_224 = arith.constant 0 : index
    %c0_225 = arith.constant 0 : index
    %340 = vector.load %arg6[%c0_224, %c0_225] : memref<16x432xf32, #tpu.memory_space<vmem>>, vector<16x432xf32>
    %c0_226 = arith.constant 0 : index
    %c0_227 = arith.constant 0 : index
    %341 = vector.load %arg14[%c0_226, %c0_227] : memref<432x512xf32, #tpu.memory_space<vmem>>, vector<432x512xf32>
    %cst_228 = arith.constant dense<0.000000e+00> : vector<16x512xf32>
    %342 = tpu.matmul %340, %341, %cst_228 {dimension_numbers = #tpu.dot_dimension_numbers<[1], [0], [0], [1], [0, 0, 1, 1], [], []>} : vector<16x432xf32>, vector<432x512xf32>, vector<16x512xf32> -> vector<16x512xf32>
    %343 = vector.shape_cast %342 : vector<16x512xf32> to vector<1x16x512xf32>
    %cst_229 = arith.constant dense<0.000000e+00> : vector<1xf32>
    %344 = vector.multi_reduction <add>, %343, %cst_229 [1, 2] : vector<1x16x512xf32> to vector<1xf32>
    %345 = vector.shape_cast %344 : vector<1xf32> to vector<1x1x1xf32>
    %346 = vector.extract %345[0, 0, 0] : f32 from vector<1x1x1xf32>
    %cst_230 = arith.constant 1.22070313E-4 : f32
    %347 = arith.mulf %346, %cst_230 : f32
    %348 = arith.mulf %342, %342 : vector<16x512xf32>
    %349 = vector.shape_cast %348 : vector<16x512xf32> to vector<1x16x512xf32>
    %cst_231 = arith.constant dense<0.000000e+00> : vector<1xf32>
    %350 = vector.multi_reduction <add>, %349, %cst_231 [1, 2] : vector<1x16x512xf32> to vector<1xf32>
    %351 = vector.shape_cast %350 : vector<1xf32> to vector<1x1x1xf32>
    %352 = vector.extract %351[0, 0, 0] : f32 from vector<1x1x1xf32>
    %cst_232 = arith.constant 1.22070313E-4 : f32
    %353 = arith.mulf %352, %cst_232 : f32
    %354 = arith.mulf %347, %347 : f32
    %355 = arith.subf %353, %354 : f32
    %356 = vector.broadcast %347 : f32 to vector<16x512xf32>
    %357 = arith.subf %342, %356 : vector<16x512xf32>
    %cst_233 = arith.constant 9.99999974E-6 : f32
    %358 = arith.addf %355, %cst_233 : f32
    %359 = math.rsqrt %358 : f32
    %360 = vector.broadcast %359 : f32 to vector<16x512xf32>
    %361 = arith.mulf %357, %360 : vector<16x512xf32>
    %362 = vector.broadcast %207 : vector<16x1xf32> to vector<16x512xf32>
    %363 = arith.mulf %361, %362 : vector<16x512xf32>
    %364 = vector.broadcast %208 : vector<16x1xf32> to vector<16x512xf32>
    %365 = arith.addf %363, %364 : vector<16x512xf32>
    %cst_234 = arith.constant dense<0.000000e+00> : vector<16xf32>
    %366 = vector.multi_reduction <add>, %365, %cst_234 [1] : vector<16x512xf32> to vector<16xf32>
    %367 = vector.shape_cast %366 : vector<16xf32> to vector<16x1xf32>
    %cst_235 = arith.constant 5.120000e+02 : f32
    %368 = vector.broadcast %cst_235 : f32 to vector<16x1xf32>
    %369 = arith.divf %367, %368 : vector<16x1xf32>
    %c0_236 = arith.constant 0 : index
    %c0_237 = arith.constant 0 : index
    %370 = vector.load %arg9[%c0_236, %c0_237] : memref<16x8xf32, #tpu.memory_space<vmem>>, vector<16x8xf32>
    %371 = vector.broadcast %369 : vector<16x1xf32> to vector<16x8xf32>
    %372 = arith.mulf %370, %371 : vector<16x8xf32>
    %cst_238 = arith.constant dense<0.000000e+00> : vector<8xf32>
    %373 = vector.multi_reduction <add>, %372, %cst_238 [0] : vector<16x8xf32> to vector<8xf32>
    %374 = vector.shape_cast %373 : vector<8xf32> to vector<1x8xf32>
    %c0_239 = arith.constant 0 : index
    %c0_240 = arith.constant 0 : index
    %375 = vector.load %arg10[%c0_239, %c0_240] : memref<1x8xf32, #tpu.memory_space<vmem>>, vector<1x8xf32>
    %376 = arith.addf %374, %375 : vector<1x8xf32>
    %cst_241 = arith.constant 5.000000e-01 : f32
    %377 = vector.broadcast %cst_241 : f32 to vector<1x8xf32>
    %378 = arith.mulf %377, %376 : vector<1x8xf32>
    %cst_242 = arith.constant 0.707106769 : f32
    %379 = vector.broadcast %cst_242 : f32 to vector<1x8xf32>
    %380 = arith.mulf %376, %379 : vector<1x8xf32>
    %cst_243 = arith.constant -4.000000e+00 : f32
    %cst_244 = arith.constant 4.000000e+00 : f32
    %381 = vector.broadcast %cst_243 : f32 to vector<1x8xf32>
    %382 = arith.maximumf %381, %380 : vector<1x8xf32>
    %383 = vector.broadcast %cst_244 : f32 to vector<1x8xf32>
    %384 = arith.minimumf %383, %382 : vector<1x8xf32>
    %385 = arith.mulf %384, %384 : vector<1x8xf32>
    %cst_245 = arith.constant -2.72614237E-10 : f32
    %386 = vector.broadcast %cst_245 : f32 to vector<1x8xf32>
    %387 = arith.mulf %385, %386 : vector<1x8xf32>
    %cst_246 = arith.constant 2.77068146E-8 : f32
    %388 = vector.broadcast %cst_246 : f32 to vector<1x8xf32>
    %389 = arith.addf %387, %388 : vector<1x8xf32>
    %390 = arith.mulf %385, %389 : vector<1x8xf32>
    %cst_247 = arith.constant -2.10102394E-6 : f32
    %391 = vector.broadcast %cst_247 : f32 to vector<1x8xf32>
    %392 = arith.addf %390, %391 : vector<1x8xf32>
    %393 = arith.mulf %385, %392 : vector<1x8xf32>
    %cst_248 = arith.constant -5.69250624E-5 : f32
    %394 = vector.broadcast %cst_248 : f32 to vector<1x8xf32>
    %395 = arith.addf %393, %394 : vector<1x8xf32>
    %396 = arith.mulf %385, %395 : vector<1x8xf32>
    %cst_249 = arith.constant -7.34990637E-4 : f32
    %397 = vector.broadcast %cst_249 : f32 to vector<1x8xf32>
    %398 = arith.addf %396, %397 : vector<1x8xf32>
    %399 = arith.mulf %385, %398 : vector<1x8xf32>
    %cst_250 = arith.constant -2.954600e-03 : f32
    %400 = vector.broadcast %cst_250 : f32 to vector<1x8xf32>
    %401 = arith.addf %399, %400 : vector<1x8xf32>
    %402 = arith.mulf %385, %401 : vector<1x8xf32>
    %cst_251 = arith.constant -0.0160960332 : f32
    %403 = vector.broadcast %cst_251 : f32 to vector<1x8xf32>
    %404 = arith.addf %402, %403 : vector<1x8xf32>
    %405 = arith.mulf %384, %404 : vector<1x8xf32>
    %cst_252 = arith.constant -1.45660715E-5 : f32
    %406 = vector.broadcast %cst_252 : f32 to vector<1x8xf32>
    %407 = arith.mulf %385, %406 : vector<1x8xf32>
    %cst_253 = arith.constant -2.13374049E-4 : f32
    %408 = vector.broadcast %cst_253 : f32 to vector<1x8xf32>
    %409 = arith.addf %407, %408 : vector<1x8xf32>
    %410 = arith.mulf %385, %409 : vector<1x8xf32>
    %cst_254 = arith.constant -0.00168282702 : f32
    %411 = vector.broadcast %cst_254 : f32 to vector<1x8xf32>
    %412 = arith.addf %410, %411 : vector<1x8xf32>
    %413 = arith.mulf %385, %412 : vector<1x8xf32>
    %cst_255 = arith.constant -0.00737332925 : f32
    %414 = vector.broadcast %cst_255 : f32 to vector<1x8xf32>
    %415 = arith.addf %413, %414 : vector<1x8xf32>
    %416 = arith.mulf %385, %415 : vector<1x8xf32>
    %cst_256 = arith.constant -0.0142647391 : f32
    %417 = vector.broadcast %cst_256 : f32 to vector<1x8xf32>
    %418 = arith.addf %416, %417 : vector<1x8xf32>
    %419 = arith.divf %405, %418 : vector<1x8xf32>
    %cst_257 = arith.constant 1.000000e+00 : f32
    %420 = vector.broadcast %cst_257 : f32 to vector<1x8xf32>
    %421 = arith.addf %420, %419 : vector<1x8xf32>
    %422 = arith.mulf %378, %421 : vector<1x8xf32>
    %c0_258 = arith.constant 0 : index
    %c0_259 = arith.constant 0 : index
    %423 = vector.load %arg11[%c0_258, %c0_259] : memref<16x8xf32, #tpu.memory_space<vmem>>, vector<16x8xf32>
    %424 = vector.broadcast %422 : vector<1x8xf32> to vector<16x8xf32>
    %425 = arith.mulf %423, %424 : vector<16x8xf32>
    %cst_260 = arith.constant dense<0.000000e+00> : vector<16xf32>
    %426 = vector.multi_reduction <add>, %425, %cst_260 [1] : vector<16x8xf32> to vector<16xf32>
    %427 = vector.shape_cast %426 : vector<16xf32> to vector<16x1xf32>
    %c0_261 = arith.constant 0 : index
    %c0_262 = arith.constant 0 : index
    %428 = vector.load %arg12[%c0_261, %c0_262] : memref<16x1xf32, #tpu.memory_space<vmem>>, vector<16x1xf32>
    %429 = arith.addf %427, %428 : vector<16x1xf32>
    %cst_263 = arith.constant 0.000000e+00 : f32
    %430 = vector.broadcast %cst_263 : f32 to vector<16x1xf32>
    %431 = arith.subf %430, %429 : vector<16x1xf32>
    %432 = math.exp %431 : vector<16x1xf32>
    %cst_264 = arith.constant 1.000000e+00 : f32
    %433 = vector.broadcast %cst_264 : f32 to vector<16x1xf32>
    %434 = arith.addf %433, %432 : vector<16x1xf32>
    %cst_265 = arith.constant 1.000000e+00 : f32
    %435 = vector.broadcast %cst_265 : f32 to vector<16x1xf32>
    %436 = arith.divf %435, %434 : vector<16x1xf32>
    %437 = vector.broadcast %436 : vector<16x1xf32> to vector<16x512xf32>
    %438 = arith.addf %1, %437 : vector<16x512xf32>
    %c0_266 = arith.constant 0 : index
    %c0_267 = arith.constant 0 : index
    %c0_268 = arith.constant 0 : index
    %439 = vector.load %arg13[%c0_266, %c0_267, %c0_268] : memref<1x16x512xf32, #tpu.memory_space<vmem>>, vector<1x16x512xf32>
    %440 = vector.shape_cast %439 : vector<1x16x512xf32> to vector<16x512xf32>
    %441 = vector.shape_cast %438 : vector<16x512xf32> to vector<1x16x512xf32>
    tpu.vector_store %arg13[%c0_266, %c0_267, %c0_268], %441 {strides = array<i32>} : memref<1x16x512xf32, #tpu.memory_space<vmem>>, vector<1x16x512xf32>,
    return
  }
  func.func @transform_0(%arg0: i32) -> (i32, i32, i32) {
    %c0_i32 = arith.constant 0 : i32
    %c0_i32_0 = arith.constant 0 : i32
    %c0_i32_1 = arith.constant 0 : i32
    return %arg0, %c0_i32, %c0_i32_0 : i32, i32, i32
  }
  func.func @transform_1(%arg0: i32) -> (i32, i32) {
    %c0_i32 = arith.constant 0 : i32
    %c0_i32_0 = arith.constant 0 : i32
    %c0_i32_1 = arith.constant 0 : i32
    return %c0_i32, %c0_i32_0 : i32, i32
  }
  func.func @transform_2(%arg0: i32) -> (i32, i32) {
    %c0_i32 = arith.constant 0 : i32
    %c0_i32_0 = arith.constant 0 : i32
    %c0_i32_1 = arith.constant 0 : i32
    return %c0_i32, %c0_i32_0 : i32, i32
  }
  func.func @transform_3(%arg0: i32) -> (i32, i32) {
    %c0_i32 = arith.constant 0 : i32
    %c0_i32_0 = arith.constant 0 : i32
    %c0_i32_1 = arith.constant 0 : i32
    return %c0_i32, %c0_i32_0 : i32, i32
  }
  func.func @transform_4(%arg0: i32) -> (i32, i32) {
    %c0_i32 = arith.constant 0 : i32
    %c0_i32_0 = arith.constant 0 : i32
    %c0_i32_1 = arith.constant 0 : i32
    return %c0_i32, %c0_i32_0 : i32, i32
  }
  func.func @transform_5(%arg0: i32) -> (i32, i32) {
    %c0_i32 = arith.constant 0 : i32
    %c0_i32_0 = arith.constant 0 : i32
    %c0_i32_1 = arith.constant 0 : i32
    return %c0_i32, %c0_i32_0 : i32, i32
  }
  func.func @transform_6(%arg0: i32) -> (i32, i32) {
    %c0_i32 = arith.constant 0 : i32
    %c0_i32_0 = arith.constant 0 : i32
    %c0_i32_1 = arith.constant 0 : i32
    return %c0_i32, %c0_i32_0 : i32, i32
  }
  func.func @transform_7(%arg0: i32) -> (i32, i32) {
    %c0_i32 = arith.constant 0 : i32
    %c0_i32_0 = arith.constant 0 : i32
    %c0_i32_1 = arith.constant 0 : i32
    return %c0_i32, %c0_i32_0 : i32, i32
  }
  func.func @transform_8(%arg0: i32) -> (i32, i32) {
    %c0_i32 = arith.constant 0 : i32
    %c0_i32_0 = arith.constant 0 : i32
    %c0_i32_1 = arith.constant 0 : i32
    return %c0_i32, %c0_i32_0 : i32, i32
  }
  func.func @transform_9(%arg0: i32) -> (i32, i32) {
    %c0_i32 = arith.constant 0 : i32
    %c0_i32_0 = arith.constant 0 : i32
    %c0_i32_1 = arith.constant 0 : i32
    return %c0_i32, %c0_i32_0 : i32, i32
  }
  func.func @transform_10(%arg0: i32) -> (i32, i32) {
    %c0_i32 = arith.constant 0 : i32
    %c0_i32_0 = arith.constant 0 : i32
    %c0_i32_1 = arith.constant 0 : i32
    return %c0_i32, %c0_i32_0 : i32, i32
  }
  func.func @transform_11(%arg0: i32) -> (i32, i32) {
    %c0_i32 = arith.constant 0 : i32
    %c0_i32_0 = arith.constant 0 : i32
    %c0_i32_1 = arith.constant 0 : i32
    return %c0_i32, %c0_i32_0 : i32, i32
  }
  func.func @transform_12(%arg0: i32) -> (i32, i32, i32) {
    %c0_i32 = arith.constant 0 : i32
    %c0_i32_0 = arith.constant 0 : i32
    %c0_i32_1 = arith.constant 0 : i32
    return %arg0, %c0_i32, %c0_i32_0 : i32, i32, i32
  }
}

</mosaic_0001>

<bundles_post_ra>
// kernel: tpu_custom_call.1
= control target key start
LH: loop header
LB: loop body
LE: loop exit
PB: predicated region body
PF: predicated region fallthrough
CT: control target
= control target key end

     0   :  { %17 = vsyncpa [#allocation4], 0  ;;  %s8995_s0 = inlined_call_operand.vmem [shape: f32[2,16,512], index: 0, kind: input, shape index: {}]   ;;  %s8996_s1 = inlined_call_operand.hbm [shape: f32[27,512], index: 1, kind: input, shape index: {}]   ;;  %s8997_s2 = inlined_call_operand.hbm [shape: f32[16,432], index: 2, kind: input, shape index: {}]   ;;  %s8998_s3 = inlined_call_operand.vmem [shape: f32[16,1], index: 3, kind: input, shape index: {}]   ;;  %s8999_s4 = inlined_call_operand.vmem [shape: f32[16,1], index: 4, kind: input, shape index: {}]   ;;  %s9000_s5 = inlined_call_operand.hbm [shape: f32[16,432], index: 5, kind: input, shape index: {}]   ;;  %s9001_s6 = inlined_call_operand.vmem [shape: f32[16,1], index: 6, kind: input, shape index: {}]   ;;  %s9002_s7 = inlined_call_operand.vmem [shape: f32[16,1], index: 7, kind: input, shape index: {}]   ;;  %s9003_s8 = inlined_call_operand.vmem [shape: f32[16,8], index: 8, kind: input, shape index: {}]   ;;  %s9004_s9 = inlined_call_operand.vmem [shape: f32[1,8], index: 9, kind: input, shape index: {}]   ;;  %s9005_s10 = inlined_call_operand.vmem [shape: f32[16,8], index: 10, kind: input, shape index: {}]   ;;  %s9006_s11 = inlined_call_operand.vmem [shape: f32[16,1], index: 11, kind: input, shape index: {}]   ;;  %s9007_s12 = inlined_call_operand.hbm [shape: f32[2,16,512], index: 12, kind: output, shape index: {}]  }
   0x1   :  { %18 = vsyncpa [#allocation7], 0 }
   0x2   :  { %19 = vsyncpa [#allocation5], 0 }
   0x3   :  { %21 = vsyncpa [#allocation5 + $0x1], 0  ;;  %s5511_s21 = smov 0   ;;  %s5513_s22 = smov 0  }
   0x4   :  { %s5515_s23 = smov 0   ;;  %s5517_s24 = smov 0  }
   0x5 LB: > { %9152 = sst [smem:[#allocation13_spill]] %s5414_s23  ;;  %s5532_s25 = sadd.s32 4294967295, %s5418_s24   ;;  %s5418_s24 = sphi %s5517_s24, %s9493_s24   ;;  %s5414_s23 = sphi %s5515_s23, %s9495_s23   ;;  %s5410_s22 = sphi %s5513_s22, %s9497_s22   ;;  %s5406_s21 = sphi %s5511_s21, %s9496_s21  }
   0x6   : > { %s5067_s26 = sadd.s32 4294967294, %s5418_s24   ;;  %s5536_s27 = sadd.s32 1, %s5418_s24  }
   0x7   : > { %9153 = sst [smem:[#allocation14_spill]] %s5536_s27  ;;  %s291_s28 = sadd.s32 1, %s5414_s23 }
   0x8   : > { %s288_s29 = ssub.s32 %s5418_s24, %s5536_s27  ;;  %p301_p0 = scmp.ne.s32.totalorder %s5414_s23, %s5410_s22 }
   0x9   : > { %p289_p1 = scmp.eq.s32.totalorder %s288_s29, 0  ;;  %p302_p2 = scmp.eq.s32.totalorder %s5532_s25, 1 }
   0xa   : > { %p307_p3 = scmp.ne.s32.totalorder %s5410_s22, %s5406_s21  ;;  %p308_p4 = scmp.eq.s32.totalorder %s5067_s26, 1 }
   0xb   : > { %s5547_s30 = scalar_select %p289_p1, %s5414_s23, %s291_s28  }
   0xc   : > { %p5549_p5 = por %p302_p2, %p301_p0  ;;  %p5553_p6 = por %p308_p4, %p307_p3 }
   0xd   : > { %9154 = sst [smem:[#allocation15_spill]] %s5547_s30  ;;  %p5068_p7 = scmp.ge.s32.totalorder %s5418_s24, 1 }
   0xe   : > { %s9155_s13 = scalar_select %p5549_p5, 1, 0 }
   0xf   : > { %s9156_s14 = scalar_select %p5553_p6, 1, 0 }
  0x10   : > { %p315_p8 = scmp.lt.s32.totalorder %s5418_s24, 3  ;;  %p9009_p9 = scmp.eq.s32.totalorder %s5532_s25, 0 }
  0x11   : > { %s5420_s16 = smov [#allocation6]   ;;  %s5421_s19 = smov [#allocation3]  }
  0x12   : > { %p5560_p10 = pnand %p5068_p7, %p315_p8  ;;  %s340_s17 = sshll.u32 %s5420_s16, 4  ;;  %s341_s17 = int_to_ptr.vmem [resolvable:$true] %s340_s17 }
  0x13   : > { %s327_s20 = sshll.u32 %s5421_s19, 4  ;;  %s5422_s26 = smov [#allocation8]   ;;  %s328_s20 = int_to_ptr.vmem [resolvable:$true] %s327_s20 }
  0x14   : > { %p5130_p11 = pneg %p5560_p10  ;;  %s359_s28 = sshll.u32 %s5422_s26, 4  ;;  %s360_s28 = int_to_ptr.vmem [resolvable:$true] %s359_s28 }
  0x15   : > { %s5283_s29 = scalar_lea.vmem %s341_s17, 1024  ;;  %p5291_p3 = scmp.lt.s32.totalorder %s341_s17, %s341_s17 }
  0x16   : > { %p5568_p12 = pnand %p9009_p9, %p5130_p11  ;;  %p5284_p0 = scmp.ne.s32.totalorder %s341_s17, %s5283_s29 }
  0x17   : > { %p5292_p4 = scmp.lt.s32.totalorder %s5283_s29, %s5283_s29 }
  0x18   : > { %p5274_p13 = pneg %p5568_p12 }
  0x19   : > { %p5293_p7 = por %p5292_p4, %p5291_p3 }
  0x1a   : > { %p5286_p1 = pnand %p5284_p0, %p5274_p13 }
  0x1c   : > { %p5287_p2 = pneg %p5286_p1 }
  0x1e   : > { %p5294_p8 = pnand %p5293_p7, %p5287_p2 }
  0x20   : > { %5297 = shalt.err (!%p5294_p8)
}
  0x21   : > { %s5423_s16 = smov 512   ;;  %s5424_s19 = smov 32  }
  0x22   : > { %5136 = dma.hbm_to_vmem [thread:$0]  (!%p5568_p12), %s8997_s2, 1024, %s341_s17, [#allocation7], %s5423_s16, %s5423_s16, %s5424_s19  }
  0x23   : > { %s5309_s23 = scalar_lea.vmem %s328_s20, 2048  ;;  %p5317_p9 = scmp.lt.s32.totalorder %s328_s20, %s328_s20 }
  0x24   : > { %p5310_p11 = scmp.ne.s32.totalorder %s328_s20, %s5309_s23  ;;  %p5318_p6 = scmp.lt.s32.totalorder %s5309_s23, %s5309_s23 }
  0x26   : > { %p5312_p0 = pnand %p5310_p11, %p5274_p13  ;;  %p5319_p3 = por %p5318_p6, %p5317_p9 }
  0x28   : > { %p5313_p1 = pneg %p5312_p0 }
  0x2a   : > { %p5320_p2 = pnand %p5319_p3, %p5313_p1 }
  0x2c   : > { %5323 = shalt.err (!%p5320_p2)
}
  0x2d   : > { %5133 = dma.hbm_to_vmem [thread:$0]  (!%p5568_p12), %s8996_s1, 2048, %s328_s20, [#allocation4], %s5423_s16, %s5423_s16, %s5424_s19  }
  0x2e   : > { %s5335_s30 = scalar_lea.vmem %s360_s28, 1024  ;;  %p5343_p11 = scmp.lt.s32.totalorder %s360_s28, %s360_s28 }
  0x2f   : > { %p5336_p4 = scmp.ne.s32.totalorder %s360_s28, %s5335_s30  ;;  %p5344_p0 = scmp.lt.s32.totalorder %s5335_s30, %s5335_s30 }
  0x31   : > { %p5338_p7 = pnand %p5336_p4, %p5274_p13  ;;  %p5345_p5 = por %p5344_p0, %p5343_p11 }
  0x33   : > { %p5339_p8 = pneg %p5338_p7 }
  0x35   : > { %p5346_p6 = pnand %p5345_p5, %p5339_p8 }
  0x37   : > { %5349 = shalt.err (!%p5346_p6)
}
  0x38   : > { %5139 = dma.hbm_to_vmem [thread:$0]  (!%p5568_p12), %s9000_s5, 1024, %s360_s28, [#allocation7], %s5423_s16, %s5423_s16, %s5424_s19  }
  0x39   : > { %401 = sbr.rel (%p5560_p10) target bundleno = 2450 (0x992), region = 68 }
  0x3e   : > { %p9159_p9 = scmp.eq.s32.totalorder %s5532_s25, 0 }
  0x40   : > { %5393 = dma.done.wait (%p9159_p9), [#allocation4], 2048   ;;  %p9160_p13 = pmov %p9159_p9 }
  0x41   : > { %p9161_p1 = pmov %p9159_p9 }
  0x42   : > { %5395 = vsyncadd (%p9160_p13), [#allocation4], 4294965248 }
  0x43   : > { %5397 = dma.done.wait (%p9161_p1), [#allocation7], 2048   ;;  %p9162_p5 = pmov %p9161_p1 }
  0x44   : > { %p451_p3 = scmp.lt.s32.totalorder %s5532_s25, 1  ;;  %s5425_s16 = smov 63   ;;  %v484_v8 = vlaneseq  ;;  %v5765_v13 = vld [vmem:[#allocation3 + $0x5] ss:$8 sm:$0xf]  ;;  %vm2140_vm6 = vcmask 392192  }
  0x45   : > { %5399 = vsyncadd (%p9162_p5), [#allocation7], 4294965248  ;;  %s5426_s19 = smov 56   ;;  %s9037_s26 = smov 64  }
  0x46   : > { %s452_s27 = scalar_select %p451_p3, %s5532_s25, 1  ;;  %v5751_v9 = vshrl.u32 %v484_v8, 7  ;;  %v5753_v10 = vand.u32 127, %v484_v8  ;;  %v5767_v14 = vld [vmem:[#allocation3 + $0x47] ss:$8 sm:$0xf] }
  0x47   : > { %s9033_s29 = smov 57   ;;  %s9026_s30 = smov 65   ;;  %v943_v15 = vld [vmem:[#allocation3 + $0x7] ss:$8 sm:$0xf] }
  0x48   : > { %s5102_s18 = sshll.u32 %s452_s27, 6  ;;  %s9022_s23 = smov 71   ;;  %v5760_v11 = vsub.s32 1, %v5751_v9  ;;  %v5763_v12 = vsub.s32 2, %v5751_v9  ;;  %vm805_vm0 = vcmp.lt.s32.totalorder %v5753_v10, 63  ;;  %vm933_vm1 = vcmp.lt.s32.totalorder %v5753_v10, 56 }
  0x49   : > { %s5613_s28 = scalar_lea.vmem %s8995_s0, %s5102_s18  ;;  %s9015_s17 = smov 72   ;;  %v5781_v21 = vsub.s32 0, %v5751_v9  ;;  %v5848_v46 = vld [vmem:[#allocation3 + $0x4] ss:$8 sm:$0xf]  ;;  %vm741_vm2 = vcmp.lt.s32.totalorder %v5753_v10, 64 }
  0x4a   : > { %v5616_v0 = vld [vmem:[%s5613_s28 + $0x28] sm:$0xff]  ;;  %v5619_v1 = vld [vmem:[%s5613_s28 + $0x20] sm:$0xff]  ;;  %v5626_v2 = vld [vmem:[%s5613_s28 + $0x30] sm:$0xff]  ;;  %s9013_s27 = smov 73   ;;  %s5433_s18 = smov 119   ;;  %9163 = vst [vmem:[#allocation16_spill] sm:$0xff] %v5760_v11  ;;  %v828_v18 = vrot.slane %v5765_v13, %v5763_v12  ;;  %v1770_v19 = vrot.slane %v5767_v14, %v5760_v11  ;;  %v952_v20 = vrot.slane %v943_v15, %v5760_v11  ;;  %v764_v52 = vrot.slane %v5848_v46, %v5763_v12 }
  0x4b   : > { %795 = vrot.lane.b32.xlu0 %v5616_v0, %s5425_s16  ;;  %919 = vrot.lane.b32.xlu1 %v5619_v1, %s5426_s19  ;;  %v5633_v3 = vld [vmem:[%s5613_s28 + $0x38] sm:$0xff]  ;;  %v5640_v4 = vld [vmem:[%s5613_s28 + $0x10] sm:$0xff]  ;;  %9164 = vst [vmem:[#allocation17_spill] sm:$0xff] %v5781_v21  ;;  %v948_v26 = vrot.slane %v943_v15, %v5781_v21  ;;  %v1766_v30 = vrot.slane %v5767_v14, %v5781_v21  ;;  %s9097_s20 = smov 120   ;;  %vm869_vm3 = vcmp.lt.s32.totalorder %v5753_v10, 57  ;;  %s9095_s15 = smov 55  }
  0x4c   : > { %v5643_v5 = vld [vmem:[%s5613_s28 + $0x8] sm:$0xff]  ;;  %v5650_v6 = vld [vmem:[%s5613_s28] sm:$0xff]  ;;  %v5657_v7 = vld [vmem:[%s5613_s28 + $0x18] sm:$0xff]  ;;  %vm9072_vm4 = vcmp.lt.s32.totalorder %v5753_v10, 65  ;;  %vm613_vm5 = vcmp.lt.s32.totalorder %v5753_v10, 71  ;;  %vm549_vm7 = vcmp.lt.s32.totalorder %v5753_v10, 72 }
  0x4d   : > { %v5850_v47 = vld [vmem:[#allocation3 + $0x46] ss:$8 sm:$0xf]  ;;  %vm9073_vm8 = vcmp.lt.s32.totalorder %v5753_v10, 73  ;;  %vm1517_vm9 = vcmp.lt.s32.totalorder %v5753_v10, 119  ;;  %vm1453_vm10 = vcmp.lt.s32.totalorder %v5753_v10, 120 }
  0x4e   : > { %v1731_v55 = vrot.slane %v5850_v47, %v5760_v11  ;;  %v5877_v56 = vld [vmem:[#allocation3 + $0x6] ss:$8 sm:$0xf]  ;;  %vm997_vm11 = vcmp.lt.s32.totalorder %v5753_v10, 55  ;;  %vm1389_vm12 = vcmp.lt.s32.totalorder %v5753_v10, 121  ;;  %vm1325_vm13 = vcmp.lt.s32.totalorder %v5753_v10, 127 }
  0x4f   : > { %799 = vrot.lane.b32.xlu0 %v5626_v2, %s5425_s16  ;;  %923 = vrot.lane.b32.xlu1 %v5616_v0, %s5426_s19  ;;  %v888_v62 = vrot.slane %v5877_v56, %v5760_v11  ;;  %vm1253_vm14 = vcmp.lt.s32.totalorder %v5753_v10, 1  ;;  %vm1189_vm15 = vcmp.lt.s32.totalorder %v5753_v10, 7  ;;  %p9491_p12 = scmp.ne.s32.totalorder %s9155_s13, 0 }
  0x53   : > { %791 = vrot.lane.b32.xlu0 %v5619_v1, %s5425_s16  ;;  %931 = vrot.lane.b32.xlu1 %v5633_v3, %s5426_s19 }
  0x57   : > { %797 = vrot.lane.b32.xlu1 %v5640_v4, %s5425_s16  ;;  %793 = vrot.lane.b32.xlu0 %v5643_v5, %s5425_s16 }
  0x5b   : > { %921 = vrot.lane.b32.xlu1 %v5643_v5, %s5426_s19  ;;  %917 = vrot.lane.b32.xlu0 %v5650_v6, %s5426_s19 }
  0x5f   : > { %929 = vrot.lane.b32.xlu1 %v5657_v7, %s5426_s19  ;;  %789 = vrot.lane.b32.xlu0 %v5650_v6, %s5425_s16 }
  0x63   : > { %735 = vrot.lane.b32.xlu1 %v5626_v2, %s9037_s26  ;;  %731 = vrot.lane.b32.xlu0 %v5616_v0, %s9037_s26 }
  0x67   : > { %859 = vrot.lane.b32.xlu1 %v5616_v0, %s9033_s29  ;;  %855 = vrot.lane.b32.xlu0 %v5619_v1, %s9033_s29 }
  0x6b   : > { %867 = vrot.lane.b32.xlu1 %v5633_v3, %s9033_s29  ;;  %727 = vrot.lane.b32.xlu0 %v5619_v1, %s9037_s26 }
  0x6f   : > { %733 = vrot.lane.b32.xlu1 %v5640_v4, %s9037_s26  ;;  %729 = vrot.lane.b32.xlu0 %v5643_v5, %s9037_s26 }
  0x73   : > { %857 = vrot.lane.b32.xlu1 %v5643_v5, %s9033_s29  ;;  %853 = vrot.lane.b32.xlu0 %v5650_v6, %s9033_s29 }
  0x77   : > { %865 = vrot.lane.b32.xlu1 %v5657_v7, %s9033_s29  ;;  %725 = vrot.lane.b32.xlu0 %v5650_v6, %s9037_s26 }
  0x7b   : > { %671 = vrot.lane.b32.xlu1 %v5626_v2, %s9026_s30  ;;  %667 = vrot.lane.b32.xlu0 %v5616_v0, %s9026_s30 }
  0x7f   : > { %803 = vrot.lane.b32.xlu1 %v5633_v3, %s5425_s16  ;;  %663 = vrot.lane.b32.xlu0 %v5619_v1, %s9026_s30 }
  0x83   : > { %669 = vrot.lane.b32.xlu1 %v5640_v4, %s9026_s30  ;;  %665 = vrot.lane.b32.xlu0 %v5643_v5, %s9026_s30 }
  0x87   : > { %801 = vrot.lane.b32.xlu1 %v5657_v7, %s5425_s16  ;;  %661 = vrot.lane.b32.xlu0 %v5650_v6, %s9026_s30 }
  0x8b   : > { %607 = vrot.lane.b32.xlu1 %v5626_v2, %s9022_s23  ;;  %603 = vrot.lane.b32.xlu0 %v5616_v0, %s9022_s23 }
  0x8f   : > { %739 = vrot.lane.b32.xlu1 %v5633_v3, %s9037_s26  ;;  %599 = vrot.lane.b32.xlu0 %v5619_v1, %s9022_s23 }
  0x93   : > { %605 = vrot.lane.b32.xlu1 %v5640_v4, %s9022_s23  ;;  %601 = vrot.lane.b32.xlu0 %v5643_v5, %s9022_s23 }
  0x97   : > { %737 = vrot.lane.b32.xlu1 %v5657_v7, %s9037_s26  ;;  %597 = vrot.lane.b32.xlu0 %v5650_v6, %s9022_s23  ;;  %s9083_s26 = smov 9  }
  0x9b   : > { %543 = vrot.lane.b32.xlu1 %v5626_v2, %s9015_s17  ;;  %539 = vrot.lane.b32.xlu0 %v5616_v0, %s9015_s17 }
  0x9f   : > { %675 = vrot.lane.b32.xlu1 %v5633_v3, %s9026_s30  ;;  %535 = vrot.lane.b32.xlu0 %v5619_v1, %s9015_s17 }
  0xa3   : > { %541 = vrot.lane.b32.xlu1 %v5640_v4, %s9015_s17  ;;  %537 = vrot.lane.b32.xlu0 %v5643_v5, %s9015_s17 }
  0xa7   : > { %673 = vrot.lane.b32.xlu1 %v5657_v7, %s9026_s30  ;;  %533 = vrot.lane.b32.xlu0 %v5650_v6, %s9015_s17  ;;  %s9087_s30 = smov 7  }
  0xab   : > { %478 = vrot.lane.b32.xlu1 %v5626_v2, %s9013_s27  ;;  %474 = vrot.lane.b32.xlu0 %v5616_v0, %s9013_s27 }
  0xaf   : > { %611 = vrot.lane.b32.xlu1 %v5633_v3, %s9022_s23  ;;  %470 = vrot.lane.b32.xlu0 %v5619_v1, %s9013_s27 }
  0xb3   : > { %476 = vrot.lane.b32.xlu1 %v5640_v4, %s9013_s27  ;;  %472 = vrot.lane.b32.xlu0 %v5643_v5, %s9013_s27 }
  0xb7   : > { %609 = vrot.lane.b32.xlu1 %v5657_v7, %s9022_s23  ;;  %468 = vrot.lane.b32.xlu0 %v5650_v6, %s9013_s27  ;;  %s9089_s23 = smov 1  }
  0xbb   : > { %1511 = vrot.lane.b32.xlu1 %v5626_v2, %s5433_s18  ;;  %1507 = vrot.lane.b32.xlu0 %v5616_v0, %s5433_s18 }
  0xbd   : > { %v796_v16 = vpop.permute.xlu0 %795  ;;  %v920_v17 = vpop.permute.xlu1 %919 }
  0xbf   : > { %1503 = vrot.lane.b32.xlu1 %v5619_v1, %s5433_s18  ;;  %547 = vrot.lane.b32.xlu0 %v5633_v3, %s9015_s17 }
  0xc1   : > { %v5783_v22 = vpop.permute.xlu0 %799  ;;  %v5785_v23 = vpop.permute.xlu1 %923 }
  0xc2   : > { %v809_v24 = vsel %vm805_vm0, %v796_v16, %v5783_v22  ;;  %v5793_v25 = vsel %vm933_vm1, %v920_v17, %v5785_v23 }
  0xc3   : > { %1509 = vrot.lane.b32.xlu1 %v5640_v4, %s5433_s18  ;;  %1505 = vrot.lane.b32.xlu0 %v5643_v5, %s5433_s18  ;;  %v5800_v27 = vmul.f32 %v828_v18, %v809_v24  ;;  %v1788_v28 = vmul.f32 %v1770_v19, %v809_v24  ;;  %v970_v29 = vmul.f32 %v952_v20, %v5793_v25 }
  0xc5   : > { %2224 = vmatprep.subr.mxu1 %v1788_v28  ;;  %v5805_v31 = vpop.permute.xlu0 %791  ;;  %2147 = vmatprep.subr.mxu0 %v970_v29  ;;  %v5807_v32 = vpop.permute.xlu1 %931 }
  0xc6   : > { %v5812_v33 = vsel %vm933_vm1, %v5807_v32, %v920_v17  ;;  %v5817_v34 = vsel %vm805_vm0, %v5805_v31, %v796_v16  ;;  %v884_v17 = vrot.slane %v5877_v56, %v5781_v21 }
  0xc7   : > { %9165 = vst [vmem:[#allocation18_spill] sm:$0xff] %v5812_v33  ;;  %1501 = vrot.lane.b32.xlu1 %v5650_v6, %s5433_s18  ;;  %545 = vrot.lane.b32.xlu0 %v5657_v7, %s9015_s17  ;;  %v969_v35 = vmul.f32 %v948_v26, %v5812_v33  ;;  %v1787_v36 = vmul.f32 %v1766_v30, %v5817_v34  ;;  %s9091_s17 = smov 127  }
  0xc9   : > { %2148 = vmatpush1.msra.mxu0 %v969_v35  ;;  %v5825_v37 = vpop.permute.xlu1 %797  ;;  %v794_v38 = vpop.permute.xlu0 %793  ;;  %2225 = vmatpush1.msra.mxu1 %v1787_v36 }
  0xca   : > { %v808_v39 = vsel %vm805_vm0, %v794_v38, %v5825_v37 }
  0xcb   : > { %v5830_v40 = vmul.f32 %v828_v18, %v808_v39  ;;  %1447 = vrot.lane.b32.xlu1 %v5626_v2, %s9097_s20  ;;  %1443 = vrot.lane.b32.xlu0 %v5616_v0, %s9097_s20  ;;  %v1784_v41 = vmul.f32 %v1770_v19, %v808_v39  ;;  %v1727_v18 = vrot.slane %v5850_v47, %v5781_v21 }
  0xcd   : > { %9166 = vst [vmem:[#allocation19_spill] sm:$0xff] %v5830_v40  ;;  %v5836_v42 = vpop.permute.xlu1 %921  ;;  %2226 = vmatprep.subr.mxu1 %v1784_v41  ;;  %v918_v43 = vpop.permute.xlu0 %917 }
  0xce   : > { %v5841_v44 = vsel %vm933_vm1, %v918_v43, %v5836_v42 }
  0xcf   : > { %1439 = vrot.lane.b32.xlu1 %v5619_v1, %s9097_s20  ;;  %482 = vrot.lane.b32.xlu0 %v5633_v3, %s9013_s27  ;;  %v966_v45 = vmul.f32 %v952_v20, %v5841_v44 }
  0xd1   : > { %v5852_v48 = vpop.permute.xlu1 %929  ;;  %2149 = vmatprep.subr.mxu0 %v966_v45  ;;  %v5854_v49 = vpop.permute.xlu0 %789 }
  0xd2   : > { %v5859_v50 = vsel %vm933_vm1, %v5852_v48, %v918_v43  ;;  %v5864_v51 = vsel %vm805_vm0, %v5854_v49, %v794_v38 }
  0xd3   : > { %9167 = vst [vmem:[#allocation20_spill] sm:$0xff] %v5859_v50  ;;  %1445 = vrot.lane.b32.xlu1 %v5640_v4, %s9097_s20  ;;  %1441 = vrot.lane.b32.xlu0 %v5643_v5, %s9097_s20  ;;  %v965_v53 = vmul.f32 %v948_v26, %v5859_v50  ;;  %v1783_v54 = vmul.f32 %v1766_v30, %v5864_v51 }
  0xd5   : > { %v5879_v57 = vpop.permute.xlu1 %735  ;;  %2150 = vmatpush1.msra.mxu0 %v965_v53  ;;  %2227 = vmatpush1.msra.mxu1 %v1783_v54  ;;  %v732_v58 = vpop.permute.xlu0 %731  ;;  %v5952_v53 = vld [vmem:[#allocation3 + $0x3] ss:$8 sm:$0xf]  ;;  %v824_v54 = vrot.slane %v5765_v13, %v5760_v11 }
  0xd6   : > { %v745_v59 = vsel %vm741_vm2, %v732_v58, %v5879_v57 }
  0xd7   : > { %v5884_v60 = vmul.f32 %v764_v52, %v745_v59  ;;  %1437 = vrot.lane.b32.xlu1 %v5650_v6, %s9097_s20  ;;  %480 = vrot.lane.b32.xlu0 %v5657_v7, %s9013_s27  ;;  %v1749_v61 = vmul.f32 %v1731_v55, %v745_v59  ;;  %s9093_s27 = smov 121  }
  0xd9   : > { %9168 = vst [vmem:[#allocation21_spill] sm:$0xff] %v5884_v60  ;;  %v5893_v63 = vpop.permute.xlu1 %859  ;;  %2228 = vmatprep.subr.mxu1 %v1749_v61  ;;  %v856_v8 = vpop.permute.xlu0 %855  ;;  %v1919_v60 = vld [vmem:[#allocation6 + $0x18] sm:$0xff] }
  0xda   : > { %v5898_v15 = vsel %vm869_vm3, %v856_v8, %v5893_v63  ;;  %5080 = vmatprep.mubr.msk.f32.mxu1 %vm2140_vm6, %v1919_v60 }
  0xdb   : > { %991 = vrot.lane.b32.xlu1 %v5626_v2, %s9095_s15  ;;  %987 = vrot.lane.b32.xlu0 %v5616_v0, %s9095_s15  ;;  %v906_v16 = vmul.f32 %v888_v62, %v5898_v15 }
  0xdd   : > { %v5909_v19 = vpop.permute.xlu1 %867  ;;  %2151 = vmatprep.subr.mxu0 %v906_v16  ;;  %v5911_v20 = vpop.permute.xlu0 %727 }
  0xde   : > { %v5916_v24 = vsel %vm869_vm3, %v5909_v19, %v856_v8  ;;  %v5921_v26 = vsel %vm741_vm2, %v5911_v20, %v732_v58  ;;  %v700_v8 = vrot.slane %v5952_v53, %v5763_v12 }
  0xdf   : > { %9169 = vst [vmem:[#allocation22_spill] sm:$0xff] %v5916_v24  ;;  %1383 = vrot.lane.b32.xlu1 %v5626_v2, %s9093_s27  ;;  %1379 = vrot.lane.b32.xlu0 %v5616_v0, %s9093_s27  ;;  %v905_v28 = vmul.f32 %v884_v17, %v5916_v24  ;;  %v1748_v29 = vmul.f32 %v1727_v18, %v5921_v26 }
  0xe1   : > { %v5929_v30 = vpop.permute.xlu1 %733  ;;  %2152 = vmatpush1.msra.mxu0 %v905_v28  ;;  %2229 = vmatpush1.msra.mxu1 %v1748_v29  ;;  %v730_v35 = vpop.permute.xlu0 %729 }
  0xe2   : > { %v744_v36 = vsel %vm741_vm2, %v730_v35, %v5929_v30 }
  0xe3   : > { %v5934_v38 = vmul.f32 %v764_v52, %v744_v36  ;;  %1375 = vrot.lane.b32.xlu1 %v5619_v1, %s9093_s27  ;;  %983 = vrot.lane.b32.xlu0 %v5619_v1, %s9095_s15  ;;  %v1745_v39 = vmul.f32 %v1731_v55, %v744_v36  ;;  %v5956_v55 = vld [vmem:[#allocation3 + $0x45] ss:$8 sm:$0xf] }
  0xe4   : > { %v1692_v29 = vrot.slane %v5956_v55, %v5760_v11 }
  0xe5   : > { %9170 = vst [vmem:[#allocation23_spill] sm:$0xff] %v5934_v38  ;;  %v5940_v41 = vpop.permute.xlu1 %857  ;;  %2230 = vmatprep.subr.mxu1 %v1745_v39  ;;  %v854_v43 = vpop.permute.xlu0 %853 }
  0xe6   : > { %v5945_v45 = vsel %vm869_vm3, %v854_v43, %v5940_v41 }
  0xe7   : > { %989 = vrot.lane.b32.xlu1 %v5640_v4, %s9095_s15  ;;  %985 = vrot.lane.b32.xlu0 %v5643_v5, %s9095_s15  ;;  %v902_v52 = vmul.f32 %v888_v62, %v5945_v45 }
  0xe9   : > { %v5958_v58 = vpop.permute.xlu1 %865  ;;  %2153 = vmatprep.subr.mxu0 %v902_v52  ;;  %v5960_v59 = vpop.permute.xlu0 %725 }
  0xea   : > { %v5965_v61 = vsel %vm869_vm3, %v5958_v58, %v854_v43  ;;  %v5970_v62 = vsel %vm741_vm2, %v5960_v59, %v730_v35  ;;  %v842_v35 = vmul.f32 %v824_v54, %v5817_v34  ;;  %v5987_v43 = vsub.s32 3, %v5751_v9 }
  0xeb   : > { %9171 = vst [vmem:[#allocation24_spill] sm:$0xff] %v5965_v61  ;;  %1381 = vrot.lane.b32.xlu1 %v5640_v4, %s9093_s27  ;;  %1377 = vrot.lane.b32.xlu0 %v5643_v5, %s9093_s27  ;;  %v901_v16 = vmul.f32 %v884_v17, %v5965_v61  ;;  %v1744_v28 = vmul.f32 %v1727_v18, %v5970_v62 }
  0xec   : > { %v820_v18 = vrot.slane %v5765_v13, %v5781_v21  ;;  %v1688_v9 = vrot.slane %v5956_v55, %v5781_v21  ;;  %v838_v61 = vmul.f32 %v824_v54, %v5864_v51  ;;  %v6036_v54 = vld [vmem:[#allocation3 + $0x2] ss:$8 sm:$0xf] }
  0xed   : > { %v5984_v36 = vpop.permute.xlu1 %671  ;;  %2154 = vmatpush1.msra.mxu0 %v901_v16  ;;  %2231 = vmatpush1.msra.mxu1 %v1744_v28  ;;  %v668_v39 = vpop.permute.xlu0 %667  ;;  %v1778_v16 = vrot.slane %v5767_v14, %v5987_v43 }
  0xee   : > { %9172 = vst [vmem:[#allocation25_spill] sm:$0xff] %v5984_v36  ;;  %v681_v17 = vsel %vm9072_vm4, %v668_v39, %v5984_v36  ;;  %2155 = vmatprep.subr.mxu0 %v842_v35 }
  0xef   : > { %v5994_v52 = vmul.f32 %v700_v8, %v681_v17  ;;  %1373 = vrot.lane.b32.xlu1 %v5650_v6, %s9093_s27  ;;  %981 = vrot.lane.b32.xlu0 %v5650_v6, %s9095_s15  ;;  %v1710_v34 = vmul.f32 %v1692_v29, %v681_v17 }
  0xf1   : > { %9173 = vst [vmem:[#allocation26_spill] sm:$0xff] %v5994_v52  ;;  %v6004_v28 = vpop.permute.xlu1 %803  ;;  %2232 = vmatprep.subr.mxu1 %v1710_v34  ;;  %v6006_v35 = vpop.permute.xlu0 %663 }
  0xf2   : > { %v813_v13 = vsel %vm805_vm0, %v6004_v28, %v5805_v31  ;;  %v6015_v17 = vsel %vm9072_vm4, %v6006_v35, %v668_v39 }
  0xf3   : > { %1315 = vrot.lane.b32.xlu1 %v5616_v0, %s9091_s17  ;;  %927 = vrot.lane.b32.xlu0 %v5626_v2, %s5426_s19  ;;  %v841_v14 = vmul.f32 %v820_v18, %v813_v13  ;;  %v1709_v34 = vmul.f32 %v1688_v9, %v6015_v17  ;;  %v6023_v24 = vmul.f32 %v1778_v16, %v813_v13 }
  0xf4   : > { %v760_v13 = vrot.slane %v5848_v46, %v5760_v11 }
  0xf5   : > { %9174 = vst [vmem:[#allocation27_spill] sm:$0xff] %v6023_v24  ;;  %v6025_v31 = vpop.permute.xlu1 %669  ;;  %2156 = vmatpush1.msra.mxu0 %v841_v14  ;;  %2233 = vmatpush1.msra.mxu1 %v1709_v34  ;;  %v666_v39 = vpop.permute.xlu0 %665  ;;  %v6040_v14 = vld [vmem:[#allocation3 + $0x44] ss:$8 sm:$0xf] }
  0xf6   : > { %9175 = vst [vmem:[#allocation28_spill] sm:$0xff] %v6025_v31  ;;  %v680_v50 = vsel %vm9072_vm4, %v666_v39, %v6025_v31  ;;  %2157 = vmatprep.subr.mxu0 %v838_v61 }
  0xf7   : > { %v6030_v33 = vmul.f32 %v700_v8, %v680_v50  ;;  %1311 = vrot.lane.b32.xlu1 %v5619_v1, %s9091_s17  ;;  %1319 = vrot.lane.b32.xlu0 %v5626_v2, %s9091_s17  ;;  %v1706_v51 = vmul.f32 %v1692_v29, %v680_v50  ;;  %v636_v29 = vrot.slane %v6036_v54, %v5763_v12 }
  0xf9   : > { %9176 = vst [vmem:[#allocation29_spill] sm:$0xff] %v6030_v33  ;;  %v6042_v34 = vpop.permute.xlu1 %801  ;;  %2234 = vmatprep.subr.mxu1 %v1706_v51  ;;  %v6044_v61 = vpop.permute.xlu0 %661 }
  0xfa   : > { %v812_v8 = vsel %vm805_vm0, %v6042_v34, %v5854_v49  ;;  %v6053_v50 = vsel %vm9072_vm4, %v6044_v61, %v666_v39  ;;  %v1653_v49 = vrot.slane %v6040_v14, %v5760_v11  ;;  %v778_v39 = vmul.f32 %v760_v13, %v5921_v26 }
  0xfb   : > { %1313 = vrot.lane.b32.xlu1 %v5643_v5, %s9091_s17  ;;  %925 = vrot.lane.b32.xlu0 %v5640_v4, %s5426_s19  ;;  %v837_v51 = vmul.f32 %v820_v18, %v812_v8  ;;  %v1705_v24 = vmul.f32 %v1688_v9, %v6053_v50  ;;  %v6066_v33 = vmul.f32 %v1778_v16, %v812_v8 }
  0xfc   : > { %v756_v9 = vrot.slane %v5848_v46, %v5781_v21  ;;  %v1649_v16 = vrot.slane %v6040_v14, %v5781_v21  ;;  %v1739_v8 = vrot.slane %v5850_v47, %v5987_v43 }
  0xfd   : > { %9177 = vst [vmem:[#allocation30_spill] sm:$0xff] %v6066_v33  ;;  %v6068_v52 = vpop.permute.xlu1 %607  ;;  %2158 = vmatpush1.msra.mxu0 %v837_v51  ;;  %2235 = vmatpush1.msra.mxu1 %v1705_v24  ;;  %v604_v38 = vpop.permute.xlu0 %603 }
  0xfe   : > { %9178 = vst [vmem:[#allocation31_spill] sm:$0xff] %v6068_v52  ;;  %v617_v18 = vsel %vm613_vm5, %v604_v38, %v6068_v52  ;;  %2159 = vmatprep.subr.mxu0 %v778_v39 }
  0xff   : > { %v6076_v26 = vmul.f32 %v636_v29, %v617_v18  ;;  %1309 = vrot.lane.b32.xlu1 %v5650_v6, %s9091_s17  ;;  %1317 = vrot.lane.b32.xlu0 %v5640_v4, %s9091_s17  ;;  %v1671_v24 = vmul.f32 %v1653_v49, %v617_v18 }
 0x101   : > { %9179 = vst [vmem:[#allocation32_spill] sm:$0xff] %v6076_v26  ;;  %v6086_v51 = vpop.permute.xlu1 %739  ;;  %2236 = vmatprep.subr.mxu1 %v1671_v24  ;;  %v6088_v46 = vpop.permute.xlu0 %599  ;;  %v774_v24 = vmul.f32 %v760_v13, %v5970_v62  ;;  %v6118_v13 = vld [vmem:[#allocation3 + $0x1] ss:$8 sm:$0xf] }
 0x102   : > { %v749_v60 = vsel %vm741_vm2, %v6086_v51, %v5911_v20  ;;  %v6097_v39 = vsel %vm613_vm5, %v6088_v46, %v604_v38 }
 0x103   : > { %861 = vrot.lane.b32.xlu1 %v5640_v4, %s9033_s29  ;;  %863 = vrot.lane.b32.xlu0 %v5626_v2, %s9033_s29  ;;  %v777_v47 = vmul.f32 %v756_v9, %v749_v60  ;;  %v1670_v18 = vmul.f32 %v1649_v16, %v6097_v39  ;;  %v6105_v33 = vmul.f32 %v1739_v8, %v749_v60  ;;  %s9085_s29 = smov 8  }
 0x104   : > { %v696_v60 = vrot.slane %v5952_v53, %v5760_v11 }
 0x105   : > { %9180 = vst [vmem:[#allocation33_spill] sm:$0xff] %v6105_v33  ;;  %v6107_v26 = vpop.permute.xlu1 %605  ;;  %2160 = vmatpush1.msra.mxu0 %v777_v47  ;;  %2237 = vmatpush1.msra.mxu1 %v1670_v18  ;;  %v602_v20 = vpop.permute.xlu0 %601  ;;  %v6122_v47 = vld [vmem:[#allocation3 + $0x43] ss:$8 sm:$0xf] }
 0x106   : > { %9181 = vst [vmem:[#allocation34_spill] sm:$0xff] %v6107_v26  ;;  %v616_v38 = vsel %vm613_vm5, %v602_v20, %v6107_v26  ;;  %2161 = vmatprep.subr.mxu0 %v774_v24 }
 0x107   : > { %v6112_v52 = vmul.f32 %v636_v29, %v616_v38  ;;  %1243 = vrot.lane.b32.xlu1 %v5616_v0, %s9089_s23  ;;  %1239 = vrot.lane.b32.xlu0 %v5619_v1, %s9089_s23  ;;  %v1667_v62 = vmul.f32 %v1653_v49, %v616_v38  ;;  %v572_v38 = vrot.slane %v6118_v13, %v5763_v12 }
 0x109   : > { %9182 = vst [vmem:[#allocation35_spill] sm:$0xff] %v6112_v52  ;;  %v6124_v18 = vpop.permute.xlu1 %737  ;;  %2238 = vmatprep.subr.mxu1 %v1667_v62  ;;  %v6126_v29 = vpop.permute.xlu0 %597 }
 0x10a   : > { %v748_v24 = vsel %vm741_vm2, %v6124_v18, %v5960_v59  ;;  %v6135_v49 = vsel %vm613_vm5, %v6126_v29, %v602_v20  ;;  %v1614_v59 = vrot.slane %v6122_v47, %v5760_v11  ;;  %v714_v20 = vmul.f32 %v696_v60, %v6015_v17 }
 0x10b   : > { %1237 = vrot.lane.b32.xlu1 %v5650_v6, %s9089_s23  ;;  %1251 = vrot.lane.b32.xlu0 %v5633_v3, %s9089_s23  ;;  %v773_v62 = vmul.f32 %v756_v9, %v748_v24  ;;  %v1666_v33 = vmul.f32 %v1649_v16, %v6135_v49  ;;  %v6148_v52 = vmul.f32 %v1739_v8, %v748_v24 }
 0x10c   : > { %v692_v16 = vrot.slane %v5952_v53, %v5781_v21  ;;  %v1700_v8 = vrot.slane %v5956_v55, %v5987_v43 }
 0x10d   : > { %9183 = vst [vmem:[#allocation36_spill] sm:$0xff] %v6148_v52  ;;  %v6150_v26 = vpop.permute.xlu1 %543  ;;  %2162 = vmatpush1.msra.mxu0 %v773_v62  ;;  %2239 = vmatpush1.msra.mxu1 %v1666_v33  ;;  %v540_v31 = vpop.permute.xlu0 %539  ;;  %v1610_v33 = vrot.slane %v6122_v47, %v5781_v21  ;;  %v710_v52 = vmul.f32 %v696_v60, %v6053_v50  ;;  %v6199_v60 = vld [vmem:[#allocation3] ss:$8 sm:$0xf] }
 0x10e   : > { %9184 = vst [vmem:[#allocation37_spill] sm:$0xff] %v6150_v26  ;;  %v553_v9 = vsel %vm549_vm7, %v540_v31, %v6150_v26  ;;  %2163 = vmatprep.subr.mxu0 %v714_v20 }
 0x10f   : > { %v6157_v40 = vmul.f32 %v572_v38, %v553_v9  ;;  %1249 = vrot.lane.b32.xlu1 %v5657_v7, %s9089_s23  ;;  %1241 = vrot.lane.b32.xlu0 %v5643_v5, %s9089_s23  ;;  %v1632_v17 = vmul.f32 %v1614_v59, %v553_v9 }
 0x111   : > { %9185 = vst [vmem:[#allocation38_spill] sm:$0xff] %v6157_v40  ;;  %v6167_v24 = vpop.permute.xlu1 %675  ;;  %2240 = vmatprep.subr.mxu1 %v1632_v17  ;;  %v6169_v62 = vpop.permute.xlu0 %535 }
 0x112   : > { %9186 = vst [vmem:[#allocation39_spill] sm:$0xff] %v6167_v24  ;;  %v685_v20 = vsel %vm9072_vm4, %v6167_v24, %v6006_v35  ;;  %v6178_v9 = vsel %vm549_vm7, %v6169_v62, %v540_v31 }
 0x113   : > { %1179 = vrot.lane.b32.xlu1 %v5616_v0, %s9087_s30  ;;  %1175 = vrot.lane.b32.xlu0 %v5619_v1, %s9087_s30  ;;  %v713_v55 = vmul.f32 %v692_v16, %v685_v20  ;;  %v1631_v17 = vmul.f32 %v1610_v33, %v6178_v9  ;;  %v6186_v40 = vmul.f32 %v1700_v8, %v685_v20 }
 0x114   : > { %v632_v20 = vrot.slane %v6036_v54, %v5760_v11 }
 0x115   : > { %9187 = vst [vmem:[#allocation40_spill] sm:$0xff] %v6186_v40  ;;  %v6188_v35 = vpop.permute.xlu1 %541  ;;  %2164 = vmatpush1.msra.mxu0 %v713_v55  ;;  %2241 = vmatpush1.msra.mxu1 %v1631_v17  ;;  %v538_v31 = vpop.permute.xlu0 %537  ;;  %v6203_v55 = vld [vmem:[#allocation3 + $0x42] ss:$8 sm:$0xf] }
 0x116   : > { %9188 = vst [vmem:[#allocation41_spill] sm:$0xff] %v6188_v35  ;;  %v552_v26 = vsel %vm549_vm7, %v538_v31, %v6188_v35  ;;  %2165 = vmatprep.subr.mxu0 %v710_v52  ;;  %9190 = vst [vmem:[#allocation43_spill] sm:$0xff] %v6203_v55 }
 0x117   : > { %v6193_v36 = vmul.f32 %v572_v38, %v552_v26  ;;  %1173 = vrot.lane.b32.xlu1 %v5650_v6, %s9087_s30  ;;  %1187 = vrot.lane.b32.xlu0 %v5633_v3, %s9087_s30  ;;  %v1628_v50 = vmul.f32 %v1614_v59, %v552_v26  ;;  %v508_v59 = vrot.slane %v6199_v60, %v5763_v12 }
 0x119   : > { %9189 = vst [vmem:[#allocation42_spill] sm:$0xff] %v6193_v36  ;;  %v6205_v17 = vpop.permute.xlu1 %673  ;;  %2242 = vmatprep.subr.mxu1 %v1628_v50  ;;  %v6207_v52 = vpop.permute.xlu0 %533 }
 0x11a   : > { %9191 = vst [vmem:[#allocation44_spill] sm:$0xff] %v6205_v17  ;;  %v684_v38 = vsel %vm9072_vm4, %v6205_v17, %v6044_v61  ;;  %v6216_v26 = vsel %vm549_vm7, %v6207_v52, %v538_v31  ;;  %v1575_v61 = vrot.slane %v6203_v55, %v5760_v11  ;;  %v650_v31 = vmul.f32 %v632_v20, %v6097_v39 }
 0x11b   : > { %1185 = vrot.lane.b32.xlu1 %v5657_v7, %s9087_s30  ;;  %1177 = vrot.lane.b32.xlu0 %v5643_v5, %s9087_s30  ;;  %v709_v50 = vmul.f32 %v692_v16, %v684_v38  ;;  %v1627_v40 = vmul.f32 %v1610_v33, %v6216_v26  ;;  %v6229_v36 = vmul.f32 %v1700_v8, %v684_v38 }
 0x11c   : > { %v628_v33 = vrot.slane %v6036_v54, %v5781_v21  ;;  %v1661_v8 = vrot.slane %v6040_v14, %v5987_v43 }
 0x11d   : > { %9192 = vst [vmem:[#allocation45_spill] sm:$0xff] %v6229_v36  ;;  %v6231_v35 = vpop.permute.xlu1 %478  ;;  %2166 = vmatpush1.msra.mxu0 %v709_v50  ;;  %2243 = vmatpush1.msra.mxu1 %v1627_v40  ;;  %v475_v17 = vpop.permute.xlu0 %474  ;;  %v1571_v40 = vrot.slane %v6203_v55, %v5781_v21  ;;  %v646_v36 = vmul.f32 %v632_v20, %v6135_v49 }
 0x11e   : > { %9193 = vst [vmem:[#allocation46_spill] sm:$0xff] %v6231_v35  ;;  %v490_v16 = vsel %vm9073_vm8, %v475_v17, %v6231_v35  ;;  %2167 = vmatprep.subr.mxu0 %v650_v31  ;;  %v568_v20 = vrot.slane %v6118_v13, %v5760_v11 }
 0x11f   : > { %v6238_v24 = vmul.f32 %v508_v59, %v490_v16  ;;  %1115 = vrot.lane.b32.xlu1 %v5616_v0, %s9085_s29  ;;  %1111 = vrot.lane.b32.xlu0 %v5619_v1, %s9085_s29  ;;  %v1593_v39 = vmul.f32 %v1575_v61, %v490_v16 }
 0x121   : > { %9194 = vst [vmem:[#allocation47_spill] sm:$0xff] %v6238_v24  ;;  %v6248_v38 = vpop.permute.xlu1 %611  ;;  %2244 = vmatprep.subr.mxu1 %v1593_v39  ;;  %v6250_v50 = vpop.permute.xlu0 %470 }
 0x122   : > { %9195 = vst [vmem:[#allocation48_spill] sm:$0xff] %v6248_v38  ;;  %v621_v31 = vsel %vm613_vm5, %v6248_v38, %v6088_v46  ;;  %v6259_v16 = vsel %vm9073_vm8, %v6250_v50, %v475_v17 }
 0x123   : > { %1109 = vrot.lane.b32.xlu1 %v5650_v6, %s9085_s29  ;;  %1123 = vrot.lane.b32.xlu0 %v5633_v3, %s9085_s29  ;;  %v649_v14 = vmul.f32 %v628_v33, %v621_v31  ;;  %v1592_v39 = vmul.f32 %v1571_v40, %v6259_v16  ;;  %v6267_v24 = vmul.f32 %v1661_v8, %v621_v31  ;;  %v6282_v31 = vld [vmem:[#allocation3 + $0x41] ss:$8 sm:$0xf] }
 0x124   : > { %9197 = vst [vmem:[#allocation50_spill] sm:$0xff] %v6282_v31 }
 0x125   : > { %9196 = vst [vmem:[#allocation49_spill] sm:$0xff] %v6267_v24  ;;  %v6269_v35 = vpop.permute.xlu1 %476  ;;  %2168 = vmatpush1.msra.mxu0 %v649_v14  ;;  %2245 = vmatpush1.msra.mxu1 %v1592_v39  ;;  %v473_v46 = vpop.permute.xlu0 %472 }
 0x126   : > { %v489_v17 = vsel %vm9073_vm8, %v473_v46, %v6269_v35  ;;  %2169 = vmatprep.subr.mxu0 %v646_v36 }
 0x127   : > { %v6274_v38 = vmul.f32 %v508_v59, %v489_v17  ;;  %1121 = vrot.lane.b32.xlu1 %v5657_v7, %s9085_s29  ;;  %1113 = vrot.lane.b32.xlu0 %v5643_v5, %s9085_s29  ;;  %v1589_v49 = vmul.f32 %v1575_v61, %v489_v17 }
 0x129   : > { %v6284_v14 = vpop.permute.xlu1 %609  ;;  %2246 = vmatprep.subr.mxu1 %v1589_v49  ;;  %v6286_v39 = vpop.permute.xlu0 %468  ;;  %v586_v49 = vmul.f32 %v568_v20, %v6178_v9  ;;  %v564_v9 = vrot.slane %v6118_v13, %v5781_v21 }
 0x12a   : > { %v620_v36 = vsel %vm613_vm5, %v6284_v14, %v6126_v29  ;;  %v6295_v59 = vsel %vm9073_vm8, %v6286_v39, %v473_v46  ;;  %v1536_v29 = vrot.slane %v6282_v31, %v5760_v11 }
 0x12b   : > { %1051 = vrot.lane.b32.xlu1 %v5616_v0, %s9083_s26  ;;  %1047 = vrot.lane.b32.xlu0 %v5619_v1, %s9083_s26  ;;  %v645_v61 = vmul.f32 %v628_v33, %v620_v36  ;;  %v1588_v17 = vmul.f32 %v1571_v40, %v6295_v59  ;;  %v6306_v24 = vmul.f32 %v1661_v8, %v620_v36  ;;  %v6321_v8 = vld [vmem:[#allocation6 + $0x8] sm:$0xff] }
 0x12c   : > { %v1532_v40 = vrot.slane %v6282_v31, %v5781_v21  ;;  %2211 = vmatprep.mubr.f32.mxu0 %v6321_v8  ;;  %v1622_v36 = vrot.slane %v6122_v47, %v5987_v43 }
 0x12d   : > { %9198 = vst [vmem:[#allocation51_spill] sm:$0xff] %v6306_v24  ;;  %v6308_v46 = vpop.permute.xlu1 %1511  ;;  %2170 = vmatpush1.msra.mxu0 %v645_v61  ;;  %2247 = vmatpush1.msra.mxu1 %v1588_v17  ;;  %v1508_v0 = vpop.permute.xlu0 %1507 }
 0x12e   : > { %9199 = vst [vmem:[#allocation52_spill] sm:$0xff] %v6308_v46  ;;  %v1521_v1 = vsel %vm1517_vm9, %v1508_v0, %v6308_v46  ;;  %2171 = vmatprep.subr.mxu0 %v586_v49 }
 0x12f   : > { %1045 = vrot.lane.b32.xlu1 %v5650_v6, %s9083_s26  ;;  %1059 = vrot.lane.b32.xlu0 %v5633_v3, %s9083_s26  ;;  %v1554_v33 = vmul.f32 %v1536_v29, %v1521_v1 }
 0x131   : > { %v6326_v61 = vpop.permute.xlu1 %1503  ;;  %2248 = vmatprep.subr.mxu1 %v1554_v33  ;;  %v6328_v6 = vpop.permute.xlu0 %547  ;;  %v582_v33 = vmul.f32 %v568_v20, %v6216_v26  ;;  %v504_v26 = vrot.slane %v6199_v60, %v5760_v11  ;;  %v6355_v20 = vld [vmem:[#allocation3 + $0x40] ss:$8 sm:$0xf] }
 0x132   : > { %9200 = vst [vmem:[#allocation53_spill] sm:$0xff] %v6326_v61  ;;  %v1523_v17 = vsel %vm1517_vm9, %v6326_v61, %v1508_v0  ;;  %v557_v49 = vsel %vm549_vm7, %v6328_v6, %v6169_v62  ;;  %9203 = vst [vmem:[#allocation56_spill] sm:$0xff] %v6355_v20 }
 0x133   : > { %1057 = vrot.lane.b32.xlu1 %v5657_v7, %s9083_s26  ;;  %1049 = vrot.lane.b32.xlu0 %v5643_v5, %s9083_s26  ;;  %v585_v47 = vmul.f32 %v564_v9, %v557_v49  ;;  %v1553_v1 = vmul.f32 %v1532_v40, %v1523_v17  ;;  %v6342_v46 = vmul.f32 %v1622_v36, %v557_v49 }
 0x135   : > { %9201 = vst [vmem:[#allocation54_spill] sm:$0xff] %v6342_v46  ;;  %v6344_v24 = vpop.permute.xlu1 %1509  ;;  %2172 = vmatpush1.msra.mxu0 %v585_v47  ;;  %2249 = vmatpush1.msra.mxu1 %v1553_v1  ;;  %v1506_v0 = vpop.permute.xlu0 %1505 }
 0x136   : > { %9202 = vst [vmem:[#allocation55_spill] sm:$0xff] %v6344_v24  ;;  %v1520_v62 = vsel %vm1517_vm9, %v1506_v0, %v6344_v24  ;;  %2173 = vmatprep.subr.mxu0 %v582_v33 }
 0x137   : > { %993 = vrot.lane.b32.xlu1 %v5657_v7, %s9095_s15  ;;  %995 = vrot.lane.b32.xlu0 %v5633_v3, %s9095_s15  ;;  %v1550_v5 = vmul.f32 %v1536_v29, %v1520_v62  ;;  %v1472_v62 = vrot.slane %v6355_v20, %v5760_v11 }
 0x139   : > { %v6357_v17 = vpop.permute.xlu1 %1501  ;;  %2250 = vmatprep.subr.mxu1 %v1550_v5  ;;  %v6359_v49 = vpop.permute.xlu0 %545 }
 0x13a   : > { %9204 = vst [vmem:[#allocation57_spill] sm:$0xff] %v6357_v17  ;;  %v1522_v47 = vsel %vm1517_vm9, %v6357_v17, %v1506_v0  ;;  %v556_v1 = vsel %vm549_vm7, %v6359_v49, %v6207_v52  ;;  %v522_v0 = vmul.f32 %v504_v26, %v6259_v16  ;;  %v500_v16 = vrot.slane %v6199_v60, %v5781_v21 }
 0x13b   : > { %1385 = vrot.lane.b32.xlu1 %v5657_v7, %s9093_s27  ;;  %1387 = vrot.lane.b32.xlu0 %v5633_v3, %s9093_s27  ;;  %v581_v29 = vmul.f32 %v564_v9, %v556_v1  ;;  %v1549_v33 = vmul.f32 %v1532_v40, %v1522_v47  ;;  %v6376_v5 = vmul.f32 %v1622_v36, %v556_v1 }
 0x13c   : > { %v1468_v40 = vrot.slane %v6355_v20, %v5781_v21  ;;  %v1583_v36 = vrot.slane %v6203_v55, %v5987_v43  ;;  %v6508_v20 = vld [vmem:[#allocation3 + $0x61] ss:$8 sm:$0xf] }
 0x13d   : > { %9205 = vst [vmem:[#allocation58_spill] sm:$0xff] %v6376_v5  ;;  %v6378_v17 = vpop.permute.xlu1 %1447  ;;  %2174 = vmatpush1.msra.mxu0 %v581_v29  ;;  %2251 = vmatpush1.msra.mxu1 %v1549_v33  ;;  %v1444_v52 = vpop.permute.xlu0 %1443  ;;  %9220 = vst [vmem:[#allocation73_spill] sm:$0xff] %v6508_v20 }
 0x13e   : > { %9206 = vst [vmem:[#allocation59_spill] sm:$0xff] %v6378_v17  ;;  %v1457_v24 = vsel %vm1453_vm10, %v1444_v52, %v6378_v17  ;;  %2175 = vmatprep.subr.mxu0 %v522_v0 }
 0x13f   : > { %1321 = vrot.lane.b32.xlu1 %v5657_v7, %s9091_s17  ;;  %1323 = vrot.lane.b32.xlu0 %v5633_v3, %s9091_s17  ;;  %v1490_v9 = vmul.f32 %v1472_v62, %v1457_v24 }
 0x141   : > { %v6393_v47 = vpop.permute.xlu1 %1439  ;;  %2252 = vmatprep.subr.mxu1 %v1490_v9  ;;  %v6395_v1 = vpop.permute.xlu0 %482  ;;  %v518_v9 = vmul.f32 %v504_v26, %v6295_v59  ;;  %v6420_v59 = vld [vmem:[#allocation3 + $0x62] ss:$8 sm:$0xf] }
 0x142   : > { %9207 = vst [vmem:[#allocation60_spill] sm:$0xff] %v6393_v47  ;;  %v1459_v29 = vsel %vm1453_vm10, %v6393_v47, %v1444_v52  ;;  %v494_v24 = vsel %vm9073_vm8, %v6395_v1, %v6250_v50  ;;  %9210 = vst [vmem:[#allocation63_spill] sm:$0xff] %v6420_v59 }
 0x143   : > { %1515 = vrot.lane.b32.xlu1 %v5633_v3, %s5433_s18  ;;  %1247 = vrot.lane.b32.xlu0 %v5626_v2, %s9089_s23  ;;  %v521_v33 = vmul.f32 %v500_v16, %v494_v24  ;;  %v1489_v0 = vmul.f32 %v1468_v40, %v1459_v29  ;;  %v6409_v17 = vmul.f32 %v1583_v36, %v494_v24 }
 0x145   : > { %9208 = vst [vmem:[#allocation61_spill] sm:$0xff] %v6409_v17  ;;  %v6411_v5 = vpop.permute.xlu1 %1445  ;;  %2176 = vmatpush1.msra.mxu0 %v521_v33  ;;  %2253 = vmatpush1.msra.mxu1 %v1489_v0  ;;  %v1442_v52 = vpop.permute.xlu0 %1441 }
 0x146   : > { %9209 = vst [vmem:[#allocation62_spill] sm:$0xff] %v6411_v5  ;;  %v1456_v50 = vsel %vm1453_vm10, %v1442_v52, %v6411_v5  ;;  %2177 = vmatprep.subr.mxu0 %v518_v9 }
 0x147   : > { %1513 = vrot.lane.b32.xlu1 %v5657_v7, %s5433_s18  ;;  %1245 = vrot.lane.b32.xlu0 %v5640_v4, %s9089_s23  ;;  %v1486_v29 = vmul.f32 %v1472_v62, %v1456_v50  ;;  %v1887_v50 = vrot.slane %v6420_v59, %v5760_v11 }
 0x149   : > { %v6422_v26 = vpop.permute.xlu1 %1437  ;;  %2254 = vmatprep.subr.mxu1 %v1486_v29  ;;  %v6424_v24 = vpop.permute.xlu0 %480  ;;  %v6440_v29 = vld [vmem:[#allocation3 + $0x27] ss:$8 sm:$0xf] }
 0x14a   : > { %9211 = vst [vmem:[#allocation64_spill] sm:$0xff] %v6422_v26  ;;  %v1458_v33 = vsel %vm1453_vm10, %v6422_v26, %v1442_v52  ;;  %v493_v0 = vsel %vm9073_vm8, %v6424_v24, %v6286_v39 }
 0x14b   : > { %1451 = vrot.lane.b32.xlu1 %v5633_v3, %s9097_s20  ;;  %1183 = vrot.lane.b32.xlu0 %v5626_v2, %s9087_s30  ;;  %v517_v62 = vmul.f32 %v500_v16, %v493_v0  ;;  %v1485_v9 = vmul.f32 %v1468_v40, %v1458_v33  ;;  %v6442_v52 = vmul.f32 %v1583_v36, %v493_v0  ;;  %v6465_v0 = vld [vmem:[%s5613_s28 + $0x10] sm:$0xff] }
 0x14c   : > { %v1408_v16 = vrot.slane %v6440_v29, %v5760_v11  ;;  %9215 = vst [vmem:[#allocation68_spill] sm:$0xff] %v6465_v0 }
 0x14d   : > { %9212 = vst [vmem:[#allocation65_spill] sm:$0xff] %v6442_v52  ;;  %v6444_v26 = vpop.permute.xlu1 %991  ;;  %2178 = vmatpush1.msra.mxu0 %v517_v62  ;;  %2255 = vmatpush1.msra.mxu1 %v1485_v9  ;;  %v988_v3 = vpop.permute.xlu0 %987  ;;  %v1404_v62 = vrot.slane %v6440_v29, %v5781_v21  ;;  %v1883_v9 = vrot.slane %v6420_v59, %v5781_v21 }
 0x14e   : > { %9213 = vst [vmem:[#allocation66_spill] sm:$0xff] %v6444_v26  ;;  %v6449_v2 = vsel %vm997_vm11, %v988_v3, %v6444_v26 }
 0x14f   : > { %9214 = vst [vmem:[#allocation67_spill] sm:$0xff] %v6449_v2  ;;  %1449 = vrot.lane.b32.xlu1 %v5657_v7, %s9097_s20  ;;  %1181 = vrot.lane.b32.xlu0 %v5640_v4, %s9087_s30  ;;  %v1905_v39 = vmul.f32 %v1887_v50, %v6449_v2  ;;  %v6470_v4 = vld [vmem:[%s5613_s28 + $0x30] sm:$0xff] }
 0x150   : > { %9216 = vst [vmem:[#allocation69_spill] sm:$0xff] %v6470_v4 }
 0x151   : > { %v6459_v40 = vpop.permute.xlu1 %1383  ;;  %2276 = vmatprep.subr.mxu1 %v1905_v39  ;;  %v1380_v36 = vpop.permute.xlu0 %1379 }
 0x152   : > { %v1393_v33 = vsel %vm1389_vm12, %v1380_v36, %v6459_v40 }
 0x153   : > { %1117 = vrot.lane.b32.xlu1 %v6465_v0, %s9085_s29  ;;  %1119 = vrot.lane.b32.xlu0 %v6470_v4, %s9085_s29  ;;  %v1426_v7 = vmul.f32 %v1408_v16, %v1393_v33 }
 0x155   : > { %v6478_v39 = vpop.permute.xlu1 %1375  ;;  %2179 = vmatprep.subr.mxu0 %v1426_v7  ;;  %v6480_v2 = vpop.permute.xlu0 %983 }
 0x156   : > { %v1395_v26 = vsel %vm1389_vm12, %v6478_v39, %v1380_v36  ;;  %v6488_v5 = vsel %vm997_vm11, %v6480_v2, %v988_v3 }
 0x157   : > { %1053 = vrot.lane.b32.xlu1 %v6465_v0, %s9083_s26  ;;  %1055 = vrot.lane.b32.xlu0 %v6470_v4, %s9083_s26  ;;  %v1425_v33 = vmul.f32 %v1404_v62, %v1395_v26  ;;  %v1904_v7 = vmul.f32 %v1883_v9, %v6488_v5 }
 0x159   : > { %v6495_v52 = vpop.permute.xlu1 %989  ;;  %2180 = vmatpush2.msra.mxu0 %v1425_v33  ;;  %2277 = vmatpush2.msra.mxu1 %v1904_v7  ;;  %v986_v47 = vpop.permute.xlu0 %985 }
 0x15a   : > { %9217 = vst [vmem:[#allocation70_spill] sm:$0xff] %v6495_v52  ;;  %v6500_v36 = vsel %vm997_vm11, %v986_v47, %v6495_v52 }
 0x15b   : > { %9218 = vst [vmem:[#allocation71_spill] sm:$0xff] %v6500_v36  ;;  %v1901_v3 = vmul.f32 %v1887_v50, %v6500_v36 }
 0x15d   : > { %v6503_v17 = vpop.permute.xlu1 %1381  ;;  %2278 = vmatprep.subr.mxu1 %v1901_v3  ;;  %v1378_v61 = vpop.permute.xlu0 %1377 }
 0x15e   : > { %9219 = vst [vmem:[#allocation72_spill] sm:$0xff] %v6503_v17  ;;  %v1392_v26 = vsel %vm1389_vm12, %v1378_v61, %v6503_v17 }
 0x15f   : > { %v1422_v46 = vmul.f32 %v1408_v16, %v1392_v26  ;;  %v1848_v16 = vrot.slane %v6508_v20, %v5760_v11  ;;  %v6527_v26 = vld [vmem:[#allocation3 + $0x26] ss:$8 sm:$0xf] }
 0x160   : > { %9221 = vst [vmem:[#allocation74_spill] sm:$0xff] %v6527_v26 }
 0x161   : > { %v6510_v33 = vpop.permute.xlu1 %1373  ;;  %2181 = vmatprep.subr.mxu0 %v1422_v46  ;;  %v6512_v7 = vpop.permute.xlu0 %981  ;;  %v1844_v46 = vrot.slane %v6508_v20, %v5781_v21 }
 0x162   : > { %v1394_v50 = vsel %vm1389_vm12, %v6510_v33, %v1378_v61  ;;  %v6520_v3 = vsel %vm997_vm11, %v6512_v7, %v986_v47 }
 0x163   : > { %v1421_v36 = vmul.f32 %v1404_v62, %v1394_v50  ;;  %v1900_v52 = vmul.f32 %v1883_v9, %v6520_v3  ;;  %v1344_v9 = vrot.slane %v6527_v26, %v5760_v11  ;;  %v1340_v50 = vrot.slane %v6527_v26, %v5781_v21 }
 0x164   : > { %v1865_v20 = vmul.f32 %v1844_v46, %v5793_v25 }
 0x165   : > { %v1316_v0 = vpop.permute.xlu1 %1315  ;;  %2182 = vmatpush2.msra.mxu0 %v1421_v36  ;;  %2279 = vmatpush2.msra.mxu1 %v1900_v52  ;;  %v928_v61 = vpop.permute.xlu0 %927 }
 0x166   : > { %v6532_v47 = vsel %vm933_vm1, %v5785_v23, %v928_v61 }
 0x167   : > { %v1866_v62 = vmul.f32 %v1848_v16, %v6532_v47 }
 0x169   : > { %v6541_v36 = vpop.permute.xlu1 %1311  ;;  %2280 = vmatprep.subr.mxu1 %v1866_v62  ;;  %v6543_v52 = vpop.permute.xlu0 %1319 }
 0x16a   : > { %9222 = vst [vmem:[#allocation75_spill] sm:$0xff] %v6541_v36  ;;  %9223 = vst [vmem:[#allocation76_spill] sm:$0xff] %v6543_v52  ;;  %v1331_v23 = vsel %vm1325_vm13, %v6541_v36, %v1316_v0  ;;  %v1329_v31 = vsel %vm1325_vm13, %v1316_v0, %v6543_v52  ;;  %2281 = vmatpush2.msra.mxu1 %v1865_v20  ;;  %v1861_v36 = vmul.f32 %v1844_v46, %v5841_v44  ;;  %v6568_v20 = vld [vmem:[#allocation3 + $0x60] ss:$8 sm:$0xf] }
 0x16b   : > { %v1362_v4 = vmul.f32 %v1344_v9, %v1329_v31  ;;  %v1361_v59 = vmul.f32 %v1340_v50, %v1331_v23  ;;  %9226 = vst [vmem:[#allocation79_spill] sm:$0xff] %v6568_v20 }
 0x16d   : > { %v1314_v55 = vpop.permute.xlu1 %1313  ;;  %2183 = vmatprep.subr.mxu0 %v1362_v4  ;;  %v926_v17 = vpop.permute.xlu0 %925  ;;  %v1809_v4 = vrot.slane %v6568_v20, %v5760_v11 }
 0x16e   : > { %v6554_v25 = vsel %vm933_vm1, %v5836_v42, %v926_v17  ;;  %2184 = vmatpush2.msra.mxu0 %v1361_v59 }
 0x16f   : > { %v1862_v62 = vmul.f32 %v1848_v16, %v6554_v25  ;;  %v6572_v16 = vld [vmem:[#allocation3 + $0x24] ss:$8 sm:$0xf] }
 0x171   : > { %v6558_v26 = vpop.permute.xlu1 %1309  ;;  %2282 = vmatprep.subr.mxu1 %v1862_v62  ;;  %v6560_v0 = vpop.permute.xlu0 %1317  ;;  %v1805_v62 = vrot.slane %v6568_v20, %v5781_v21 }
 0x172   : > { %9224 = vst [vmem:[#allocation77_spill] sm:$0xff] %v6558_v26  ;;  %9225 = vst [vmem:[#allocation78_spill] sm:$0xff] %v6560_v0  ;;  %v1330_v31 = vsel %vm1325_vm13, %v6558_v26, %v1314_v55  ;;  %v1328_v42 = vsel %vm1325_vm13, %v1314_v55, %v6560_v0  ;;  %2283 = vmatpush2.msra.mxu1 %v1861_v36  ;;  %v6588_v36 = vrot.slane %v6572_v16, %v5760_v11  ;;  %v5245_v26 = vld [vmem:[%s5613_s28 + $0x8] sm:$0xff] }
 0x173   : > { %v1358_v59 = vmul.f32 %v1344_v9, %v1328_v42  ;;  %v1357_v44 = vmul.f32 %v1340_v50, %v1330_v31  ;;  %v5242_v50 = vld [vmem:[%s5613_s28 + $0x28] sm:$0xff]  ;;  %v5243_v42 = vld [vmem:[%s5613_s28 + $0x20] sm:$0xff]  ;;  %v1826_v0 = vmul.f32 %v1805_v62, %v5898_v15 }
 0x175   : > { %v862_v46 = vpop.permute.xlu1 %861  ;;  %2185 = vmatprep.subr.mxu0 %v1358_v59  ;;  %v864_v23 = vpop.permute.xlu0 %863 }
 0x176   : > { %v873_v55 = vsel %vm869_vm3, %v5893_v63, %v864_v23  ;;  %2186 = vmatpush2.msra.mxu0 %v1357_v44  ;;  %v6582_v9 = vsel %vm869_vm3, %v5940_v41, %v862_v46  ;;  %v5244_v63 = vld [vmem:[#allocation3 + $0x7] ss:$8 sm:$0xf]  ;;  %v6596_v41 = vsel %vm933_vm1, %v928_v61, %v5807_v32  ;;  %v6610_v32 = vsel %vm933_vm1, %v926_v17, %v5852_v48 }
 0x177   : > { %2187 = vmatprep.subr.mxu0 %v5242_v50  ;;  %v1827_v31 = vmul.f32 %v1809_v4, %v873_v55  ;;  %v960_v59 = vrot.slane %v5244_v63, %v5987_v43  ;;  %v956_v44 = vrot.slane %v5244_v63, %v5763_v12  ;;  %v1823_v52 = vmul.f32 %v1809_v4, %v6582_v9  ;;  %v5246_v63 = vld [vmem:[%s5613_s28] sm:$0xff] }
 0x178   : > { %2188 = vmatpush2.msra.mxu0 %v5243_v42  ;;  %v1822_v61 = vmul.f32 %v1805_v62, %v5945_v45  ;;  %v892_v45 = vrot.slane %v5877_v56, %v5763_v12  ;;  %v6629_v17 = vsel %vm869_vm3, %v864_v23, %v5909_v19  ;;  %v6644_v19 = vsel %vm869_vm3, %v862_v46, %v5958_v58 }
 0x179   : > { %v6598_v50 = vpop.permute.xlu1 %1243  ;;  %v1240_v20 = vpop.permute.xlu0 %1239  ;;  %2189 = vmatprep.subr.mxu0 %v5245_v26  ;;  %2284 = vmatprep.subr.mxu1 %v1827_v31  ;;  %v6614_v26 = vld [vmem:[#allocation6 + $0x10] sm:$0xff]  ;;  %v1268_v31 = vrot.slane %v6572_v16, %v5781_v21  ;;  %v972_v4 = vmul.f32 %v960_v59, %v6596_v41  ;;  %v971_v48 = vmul.f32 %v956_v44, %v6532_v47 }
 0x17a   : > { %9227 = vst [vmem:[#allocation80_spill] sm:$0xff] %v6598_v50  ;;  %v1259_v42 = vsel %vm1253_vm14, %v1240_v20, %v6598_v50  ;;  %2190 = vmatpush2.msra.mxu0 %v5246_v63  ;;  %2285 = vmatpush2.msra.mxu1 %v1826_v0  ;;  %9228 = vst [vmem:[#allocation81_spill] sm:$0xff] %v6614_v26  ;;  %v896_v63 = vrot.slane %v5877_v56, %v5987_v43  ;;  %v6621_v50 = vld [vmem:[#allocation6 + $0x38] sm:$0xff] }
 0x17b   : > { %v1290_v15 = vmul.f32 %v6588_v36, %v1259_v42  ;;  %2286 = vmatprep.subr.mxu1 %v1823_v52  ;;  %9229 = vst [vmem:[#allocation82_spill] sm:$0xff] %v6621_v50  ;;  %9230 = vst [vmem:[#allocation83_spill] sm:$0xff] %v6629_v17  ;;  %v968_v47 = vmul.f32 %v960_v59, %v6610_v32  ;;  %v6638_v56 = vld [vmem:[#allocation3 + $0x23] ss:$8 sm:$0xf]  ;;  %v967_v42 = vmul.f32 %v956_v44, %v6554_v25 }
 0x17c   : > { %2287 = vmatpush2.msra.mxu1 %v1822_v61  ;;  %9231 = vst [vmem:[#allocation84_spill] sm:$0xff] %v6644_v19  ;;  %v6648_v61 = vld [vmem:[#allocation6 + $0x30] sm:$0xff]  ;;  %v908_v25 = vmul.f32 %v896_v63, %v6629_v17  ;;  %v6662_v46 = vsel %vm805_vm0, %v5825_v37, %v6042_v34  ;;  %v907_v44 = vmul.f32 %v892_v45, %v873_v55 }
 0x17d   : > { %v1238_v0 = vpop.permute.xlu1 %1237  ;;  %2191 = vmatprep.subr.mxu0 %v1290_v15  ;;  %v6631_v52 = vpop.permute.xlu0 %1251  ;;  %2301 = vmatprep.subr.mxu1 %v972_v4  ;;  %9232 = vst [vmem:[#allocation85_spill] sm:$0xff] %v6648_v61  ;;  %v5247_v59 = vld [vmem:[#allocation3 + $0x5] ss:$8 sm:$0xf]  ;;  %v904_v34 = vmul.f32 %v896_v63, %v6644_v19  ;;  %v903_v55 = vmul.f32 %v892_v45, %v6582_v9 }
 0x17e   : > { %v1261_v62 = vsel %vm1253_vm14, %v6631_v52, %v1240_v20  ;;  %2289 = vmatmul.mubr.f32.vlgmr.msra.gmra.mxu1 %v6614_v26  ;;  %v6654_v20 = vsel %vm805_vm0, %v5783_v22, %v6004_v28  ;;  %v832_v58 = vrot.slane %v5247_v59, %v5987_v43  ;;  %v1208_v22 = vrot.slane %v6638_v56, %v5760_v11  ;;  %v9233_v59 = vld [vmem:[#allocation39_spill] sm:$0xff] }
 0x17f   : > { %2302 = vmatpush1.msra.mxu1 %v971_v48  ;;  %v1289_v23 = vmul.f32 %v1268_v31, %v1261_v62  ;;  %5081 = vmatprep.mubr.msk.f32.mxu1 %vm2140_vm6, %v6621_v50  ;;  %v6688_v63 = vsel %vm741_vm2, %v5879_v57, %v6086_v51  ;;  %v6700_v45 = vsel %vm741_vm2, %v5929_v30, %v6124_v18  ;;  %v9235_v30 = vld [vmem:[#allocation19_spill] sm:$0xff] }
 0x180   : > { %2303 = vmatprep.subr.mxu1 %v968_v47  ;;  %v844_v47 = vmul.f32 %v832_v58, %v6654_v20  ;;  %v1204_v51 = vrot.slane %v6638_v56, %v5781_v21  ;;  %v5250_v26 = vld [vmem:[#allocation3 + $0x46] ss:$8 sm:$0xf] }
 0x181   : > { %2304 = vmatpush1.msra.mxu1 %v967_v42  ;;  %v6664_v15 = vpop.permute.xlu1 %1249  ;;  %2192 = vmatpush2.msra.mxu0 %v1289_v23  ;;  %v6666_v4 = vpop.permute.xlu0 %1241  ;;  %v5248_v42 = vld [vmem:[#allocation3 + $0x4] ss:$8 sm:$0xf] }
 0x182   : > { %v1260_v28 = vsel %vm1253_vm14, %v6664_v15, %v1238_v0  ;;  %2305 = vmatprep.subr.mxu1 %v908_v25  ;;  %v1258_v37 = vsel %vm1253_vm14, %v1238_v0, %v6666_v4  ;;  %2295 = vmatmul.mubr.f32.gmra.mxu1 %v6648_v61  ;;  %v768_v0 = vrot.slane %v5248_v42, %v5987_v43 }
 0x183   : > { %2306 = vmatpush1.msra.mxu1 %v907_v44  ;;  %v1286_v48 = vmul.f32 %v6588_v36, %v1258_v37  ;;  %v1285_v62 = vmul.f32 %v1268_v31, %v1260_v28  ;;  %2365 = vmatprep.mubr.f32.mxu1 %v6321_v8  ;;  %v840_v31 = vmul.f32 %v832_v58, %v6662_v46  ;;  %v9234_v58 = vld [vmem:[#allocation25_spill] sm:$0xff] }
 0x184   : > { %2307 = vmatprep.subr.mxu1 %v904_v34  ;;  %v780_v23 = vmul.f32 %v768_v0, %v6688_v63  ;;  %v704_v25 = vrot.slane %v5952_v53, %v5987_v43  ;;  %v6712_v44 = vsel %vm9072_vm4, %v9234_v58, %v9233_v59  ;;  %v776_v37 = vmul.f32 %v768_v0, %v6700_v45  ;;  %v9236_v53 = vld [vmem:[#allocation44_spill] sm:$0xff] }
 0x185   : > { %2308 = vmatpush1.msra.mxu1 %v903_v55  ;;  %v6690_v9 = vpop.permute.xlu1 %1179  ;;  %2193 = vmatprep.subr.mxu0 %v1286_v48  ;;  %v1176_v36 = vpop.permute.xlu0 %1175  ;;  %v9237_v34 = vld [vmem:[#allocation28_spill] sm:$0xff]  ;;  %v9238_v48 = vld [vmem:[#allocation21_spill] sm:$0xff]  ;;  %v640_v42 = vrot.slane %v6036_v54, %v5987_v43 }
 0x186   : > { %2309 = vmatprep.subr.mxu1 %v844_v47  ;;  %v1195_v8 = vsel %vm1189_vm15, %v1176_v36, %v6690_v9  ;;  %2194 = vmatpush2.msra.mxu0 %v1285_v62  ;;  %v6725_v55 = vsel %vm9072_vm4, %v9237_v34, %v9236_v53  ;;  %v716_v47 = vmul.f32 %v704_v25, %v6712_v44  ;;  %vm9101_vm4 = vcmp.lt.s32.totalorder %v5753_v10, 8  ;;  %v9243_v53 = vld [vmem:[#allocation26_spill] sm:$0xff] }
 0x187   : > { %2310 = vmatpush1.msra.mxu1 %v5800_v27  ;;  %v1226_v57 = vmul.f32 %v1208_v22, %v1195_v8  ;;  %v6731_v8 = vld [vmem:[#allocation3 + $0x22] ss:$8 sm:$0xf] }
 0x188   : > { %2311 = vmatprep.subr.mxu1 %v840_v31  ;;  %v9240_v31 = vld [vmem:[#allocation31_spill] sm:$0xff] }
 0x189   : > { %2312 = vmatpush1.msra.mxu1 %v9235_v30  ;;  %v1174_v18 = vpop.permute.xlu1 %1173  ;;  %2195 = vmatprep.subr.mxu0 %v1226_v57  ;;  %v6715_v27 = vpop.permute.xlu0 %1187  ;;  %v9241_v57 = vld [vmem:[#allocation23_spill] sm:$0xff]  ;;  %v712_v30 = vmul.f32 %v704_v25, %v6725_v55  ;;  %v576_v25 = vrot.slane %v6118_v13, %v5987_v43 }
 0x18a   : > { %2313 = vmatprep.subr.mxu1 %v780_v23  ;;  %v1197_v28 = vsel %vm1189_vm15, %v6715_v27, %v1176_v36  ;;  %v9239_v36 = vld [vmem:[#allocation48_spill] sm:$0xff] }
 0x18b   : > { %2314 = vmatpush1.msra.mxu1 %v9238_v48  ;;  %v1225_v62 = vmul.f32 %v1204_v51, %v1197_v28  ;;  %v6737_v0 = vsel %vm613_vm5, %v9240_v31, %v9239_v36  ;;  %v9242_v28 = vld [vmem:[#allocation34_spill] sm:$0xff] }
 0x18c   : > { %2315 = vmatprep.subr.mxu1 %v776_v37  ;;  %v6756_v37 = vsel %vm613_vm5, %v9242_v28, %v6284_v14  ;;  %v9245_v14 = vld [vmem:[#allocation29_spill] sm:$0xff] }
 0x18d   : > { %2316 = vmatpush1.msra.mxu1 %v9241_v57  ;;  %v6740_v23 = vpop.permute.xlu1 %1185  ;;  %2196 = vmatpush2.msra.mxu0 %v1225_v62  ;;  %v6742_v59 = vpop.permute.xlu0 %1177  ;;  %v1144_v62 = vrot.slane %v6731_v8, %v5760_v11  ;;  %v648_v13 = vmul.f32 %v640_v42, %v6756_v37  ;;  %v9246_v57 = vld [vmem:[#allocation41_spill] sm:$0xff] }
 0x18e   : > { %v1196_v58 = vsel %vm1189_vm15, %v6740_v23, %v1174_v18  ;;  %2317 = vmatprep.subr.mxu1 %v716_v47  ;;  %v1194_v54 = vsel %vm1189_vm15, %v1174_v18, %v6742_v59  ;;  %v652_v18 = vmul.f32 %v640_v42, %v6737_v0  ;;  %v9244_v47 = vld [vmem:[#allocation37_spill] sm:$0xff]  ;;  %v9248_v42 = vld [vmem:[#allocation46_spill] sm:$0xff] }
 0x18f   : > { %2318 = vmatpush1.msra.mxu1 %v9243_v53  ;;  %v1222_v34 = vmul.f32 %v1208_v22, %v1194_v54  ;;  %v1221_v48 = vmul.f32 %v1204_v51, %v1196_v58  ;;  %v6768_v36 = vsel %vm549_vm7, %v9244_v47, %v6328_v6  ;;  %v6781_v6 = vsel %vm549_vm7, %v9246_v57, %v6359_v49  ;;  %v9247_v58 = vld [vmem:[#allocation32_spill] sm:$0xff]  ;;  %v9249_v49 = vld [vmem:[#allocation35_spill] sm:$0xff] }
 0x190   : > { %2319 = vmatprep.subr.mxu1 %v712_v30  ;;  %v1140_v30 = vrot.slane %v6731_v8, %v5781_v21  ;;  %v588_v28 = vmul.f32 %v576_v25, %v6768_v36  ;;  %v512_v53 = vrot.slane %v6199_v60, %v5987_v43  ;;  %v6806_v60 = vsel %vm9073_vm8, %v6269_v35, %v6424_v24  ;;  %v6810_v57 = vld [vmem:[#allocation3 + $0x21] ss:$8 sm:$0xf] }
 0x191   : > { %2320 = vmatpush1.msra.mxu1 %v9245_v14  ;;  %v6771_v31 = vpop.permute.xlu1 %1115  ;;  %2197 = vmatprep.subr.mxu0 %v1222_v34  ;;  %v1112_v22 = vpop.permute.xlu0 %1111  ;;  %v6793_v34 = vsel %vm9073_vm8, %v9248_v42, %v6395_v1  ;;  %v584_v14 = vmul.f32 %v576_v25, %v6781_v6  ;;  %v9250_v1 = vld [vmem:[#allocation38_spill] sm:$0xff]  ;;  %vm9099_vm8 = vcmp.lt.s32.totalorder %v5753_v10, 9 }
 0x192   : > { %2321 = vmatprep.subr.mxu1 %v652_v18  ;;  %v1131_v51 = vsel %vm9101_vm4, %v1112_v22, %v6771_v31  ;;  %2198 = vmatpush2.msra.mxu0 %v1221_v48 }
 0x193   : > { %2322 = vmatpush1.msra.mxu1 %v9247_v58  ;;  %v1162_v54 = vmul.f32 %v1144_v62, %v1131_v51  ;;  %v9251_v58 = vld [vmem:[#allocation42_spill] sm:$0xff] }
 0x194   : > { %2323 = vmatprep.subr.mxu1 %v648_v13  ;;  %v524_v13 = vmul.f32 %v512_v53, %v6793_v34 }
 0x195   : > { %2324 = vmatpush1.msra.mxu1 %v9249_v49  ;;  %v1110_v48 = vpop.permute.xlu1 %1109  ;;  %2199 = vmatprep.subr.mxu0 %v1162_v54  ;;  %v6796_v18 = vpop.permute.xlu0 %1123 }
 0x196   : > { %2325 = vmatprep.subr.mxu1 %v588_v28  ;;  %v1133_v47 = vsel %vm9101_vm4, %v6796_v18, %v1112_v22  ;;  %v520_v22 = vmul.f32 %v512_v53, %v6806_v60  ;;  %v9252_v28 = vld [vmem:[#allocation47_spill] sm:$0xff] }
 0x197   : > { %2326 = vmatpush1.msra.mxu1 %v9250_v1  ;;  %v1161_v51 = vmul.f32 %v1140_v30, %v1133_v47  ;;  %v1080_v47 = vrot.slane %v6810_v57, %v5760_v11 }
 0x198   : > { %2327 = vmatprep.subr.mxu1 %v584_v14 }
 0x199   : > { %2328 = vmatpush1.msra.mxu1 %v9251_v58  ;;  %v6813_v54 = vpop.permute.xlu1 %1121  ;;  %2200 = vmatpush2.msra.mxu0 %v1161_v51  ;;  %v6815_v25 = vpop.permute.xlu0 %1113  ;;  %v6841_v58 = vld [vmem:[#allocation3 + $0x20] ss:$8 sm:$0xf] }
 0x19a   : > { %v1132_v35 = vsel %vm9101_vm4, %v6813_v54, %v1110_v48  ;;  %2329 = vmatprep.subr.mxu1 %v524_v13  ;;  %v1130_v24 = vsel %vm9101_vm4, %v1110_v48, %v6815_v25 }
 0x19b   : > { %2330 = vmatpush1.msra.mxu1 %v9252_v28  ;;  %v1158_v42 = vmul.f32 %v1144_v62, %v1130_v24  ;;  %v1157_v49 = vmul.f32 %v1140_v30, %v1132_v35  ;;  %v1076_v62 = vrot.slane %v6810_v57, %v5781_v21 }
 0x19c   : > { %2331 = vmatprep.subr.mxu1 %v520_v22  ;;  %v1016_v22 = vrot.slane %v6841_v58, %v5760_v11 }
 0x19d   : > { %2332 = vmatpush1.msra.mxu1 %v6274_v38  ;;  %v6829_v14 = vpop.permute.xlu1 %1051  ;;  %2201 = vmatprep.subr.mxu0 %v1158_v42  ;;  %v1048_v1 = vpop.permute.xlu0 %1047 }
 0x19e   : > { %v1067_v53 = vsel %vm9099_vm8, %v1048_v1, %v6829_v14  ;;  %2202 = vmatpush2.msra.mxu0 %v1157_v49  ;;  %v1034_v61 = vmul.f32 %v1016_v22, %v6488_v5  ;;  %v1416_v5 = vrot.slane %v6440_v29, %v5987_v43 }
 0x19f   : > { %v1098_v48 = vmul.f32 %v1080_v47, %v1067_v53  ;;  %v1012_v53 = vrot.slane %v6841_v58, %v5781_v21  ;;  %v6883_v21 = vld [vmem:[#allocation6] sm:$0xff] }
 0x1a1   : > { %v1046_v30 = vpop.permute.xlu1 %1045  ;;  %2203 = vmatprep.subr.mxu0 %v1098_v48  ;;  %v6836_v51 = vpop.permute.xlu0 %1059  ;;  %v5249_v48 = vld [vmem:[#allocation3 + $0x47] ss:$8 sm:$0xf] }
 0x1a2   : > { %v1069_v38 = vsel %vm9099_vm8, %v6836_v51, %v1048_v1 }
 0x1a3   : > { %v1097_v13 = vmul.f32 %v1076_v62, %v1069_v38  ;;  %v1774_v38 = vrot.slane %v5249_v48, %v5763_v12 }
 0x1a5   : > { %v6843_v35 = vpop.permute.xlu1 %1057  ;;  %2204 = vmatpush2.msra.mxu0 %v1097_v13  ;;  %v6845_v24 = vpop.permute.xlu0 %1049 }
 0x1a6   : > { %v1068_v28 = vsel %vm9099_vm8, %v6843_v35, %v1046_v30  ;;  %v1066_v42 = vsel %vm9099_vm8, %v1046_v30, %v6845_v24 }
 0x1a7   : > { %v1094_v49 = vmul.f32 %v1080_v47, %v1066_v42  ;;  %v1093_v1 = vmul.f32 %v1076_v62, %v1068_v28  ;;  %v1412_v62 = vrot.slane %v6440_v29, %v5763_v12  ;;  %v1030_v42 = vmul.f32 %v1016_v22, %v6520_v3  ;;  %v9253_v3 = vld [vmem:[#allocation74_spill] sm:$0xff]  ;;  %v9254_v22 = vld [vmem:[#allocation72_spill] sm:$0xff] }
 0x1a9   : > { %v6858_v13 = vpop.permute.xlu1 %993  ;;  %2205 = vmatprep.subr.mxu0 %v1094_v49  ;;  %v6860_v11 = vpop.permute.xlu0 %995 }
 0x1aa   : > { %v6867_v30 = vsel %vm997_vm11, %v6858_v13, %v6512_v7  ;;  %v6873_v47 = vsel %vm997_vm11, %v6860_v11, %v6480_v2  ;;  %2206 = vmatpush2.msra.mxu0 %v1093_v1  ;;  %v1789_v7 = vmul.f32 %v1774_v38, %v6654_v20  ;;  %v1348_v20 = vrot.slane %v9253_v3, %v5763_v12 }
 0x1ab   : > { %2207 = vmatprep.subr.mxu0 %v1034_v61  ;;  %v1033_v28 = vmul.f32 %v1012_v53, %v6873_v47  ;;  %v1029_v2 = vmul.f32 %v1012_v53, %v6867_v30 }
 0x1ad   : > { %v1386_v49 = vpop.permute.xlu1 %1385  ;;  %2208 = vmatpush2.msra.mxu0 %v1033_v28  ;;  %v1388_v48 = vpop.permute.xlu0 %1387 }
 0x1ae   : > { %v1396_v61 = vsel %vm1389_vm12, %v1386_v49, %v6510_v33  ;;  %v1391_v1 = vsel %vm1389_vm12, %v6459_v40, %v1388_v48  ;;  %v1397_v29 = vsel %vm1389_vm12, %v1388_v48, %v6478_v39  ;;  %2209 = vmatprep.subr.mxu0 %v1030_v42  ;;  %v1390_v53 = vsel %vm1389_vm12, %v9254_v22, %v1386_v49  ;;  %v9255_v39 = vld [vmem:[#allocation27_spill] sm:$0xff]  ;;  %v9256_v22 = vld [vmem:[#allocation76_spill] sm:$0xff] }
 0x1af   : > { %v1427_v28 = vmul.f32 %v1412_v62, %v1391_v1  ;;  %2210 = vmatpush2.msra.mxu0 %v1029_v2  ;;  %v1428_v50 = vmul.f32 %v1416_v5, %v1397_v29  ;;  %v1352_v33 = vrot.slane %v9253_v3, %v5987_v43  ;;  %v1735_v40 = vrot.slane %v5250_v26, %v5763_v12  ;;  %v5251_v42 = vld [vmem:[#allocation3 + $0x45] ss:$8 sm:$0xf] }
 0x1b0   : > { %2212 = vmatmul.mubr.f32.vlgmr.msra.gmra.mxu0 %v6883_v21  ;;  %2378 = vmatprep.subr.mxu0 %v9255_v39  ;;  %v1696_v48 = vrot.slane %v5251_v42, %v5763_v12  ;;  %v1424_v1 = vmul.f32 %v1416_v5, %v1396_v61  ;;  %v1785_v2 = vmul.f32 %v1774_v38, %v6662_v46  ;;  %v9257_v26 = vld [vmem:[#allocation75_spill] sm:$0xff]  ;;  %v9258_v39 = vld [vmem:[#allocation77_spill] sm:$0xff]  ;;  %v9260_v61 = vld [vmem:[#allocation78_spill] sm:$0xff] }
 0x1b1   : > { %v1322_v19 = vpop.permute.xlu1 %1321  ;;  %2333 = vmatprep.subr.mxu1 %v1428_v50  ;;  %2379 = vmatpush1.msra.mxu0 %v1789_v7  ;;  %v1324_v49 = vpop.permute.xlu0 %1323  ;;  %v1423_v29 = vmul.f32 %v1412_v62, %v1390_v53  ;;  %v9259_v7 = vld [vmem:[#allocation30_spill] sm:$0xff]  ;;  %v1750_v46 = vmul.f32 %v1735_v40, %v6688_v63 }
 0x1b2   : > { %v1327_v3 = vsel %vm1325_vm13, %v9256_v22, %v1324_v49  ;;  %v1333_v17 = vsel %vm1325_vm13, %v1324_v49, %v9257_v26  ;;  %2334 = vmatpush2.msra.mxu1 %v1427_v28  ;;  %v1332_v42 = vsel %vm1325_vm13, %v1322_v19, %v9258_v39  ;;  %2380 = vmatprep.subr.mxu0 %v9259_v7  ;;  %v5252_v38 = vld [vmem:[#allocation3 + $0x44] ss:$8 sm:$0xf] }
 0x1b3   : > { %v1363_v50 = vmul.f32 %v1348_v20, %v1327_v3  ;;  %2335 = vmatprep.subr.mxu1 %v1424_v1  ;;  %v1364_v5 = vmul.f32 %v1352_v33, %v1333_v17  ;;  %v1657_v62 = vrot.slane %v5252_v38, %v5763_v12  ;;  %v1326_v53 = vsel %vm1325_vm13, %v9260_v61, %v1322_v19  ;;  %v9261_v28 = vld [vmem:[#allocation33_spill] sm:$0xff]  ;;  %v9262_v39 = vld [vmem:[#allocation43_spill] sm:$0xff] }
 0x1b4   : > { %2381 = vmatpush1.msra.mxu0 %v1785_v2  ;;  %2336 = vmatpush2.msra.mxu1 %v1423_v29  ;;  %v1746_v1 = vmul.f32 %v1735_v40, %v6700_v45  ;;  %v5253_v17 = vld [vmem:[#allocation3 + $0x43] ss:$8 sm:$0xf]  ;;  %v1360_v3 = vmul.f32 %v1352_v33, %v1332_v42  ;;  %v1711_v26 = vmul.f32 %v1696_v48, %v6712_v44 }
 0x1b5   : > { %2382 = vmatprep.subr.mxu0 %v9261_v28  ;;  %v6922_v49 = vpop.permute.xlu1 %1515  ;;  %2337 = vmatprep.subr.mxu1 %v1364_v5  ;;  %v1248_v22 = vpop.permute.xlu0 %1247  ;;  %v1618_v63 = vrot.slane %v5253_v17, %v5763_v12  ;;  %v6929_v19 = vrot.slane %v9262_v39, %v5763_v12  ;;  %v1359_v2 = vmul.f32 %v1348_v20, %v1326_v53  ;;  %v9263_v29 = vld [vmem:[#allocation36_spill] sm:$0xff]  ;;  %v9264_v44 = vld [vmem:[#allocation63_spill] sm:$0xff]  ;;  %v9267_v53 = vld [vmem:[#allocation69_spill] sm:$0xff] }
 0x1b6   : > { %2383 = vmatpush1.msra.mxu0 %v1750_v46  ;;  %2338 = vmatpush2.msra.mxu1 %v1363_v50  ;;  %v1707_v7 = vmul.f32 %v1696_v48, %v6725_v55  ;;  %v1672_v45 = vmul.f32 %v1657_v62, %v6737_v0  ;;  %v1280_v33 = vrot.slane %v6572_v16, %v5987_v43  ;;  %v9265_v55 = vld [vmem:[#allocation40_spill] sm:$0xff]  ;;  %v5254_v38 = vld [vmem:[%s5613_s28 + $0x38] sm:$0xff]  ;;  %v9271_v39 = vld [vmem:[#allocation49_spill] sm:$0xff] }
 0x1b7   : > { %2384 = vmatprep.subr.mxu0 %v9263_v29  ;;  %2339 = vmatprep.subr.mxu1 %v1360_v3  ;;  %v6938_v40 = vrot.slane %v9264_v44, %v5763_v12  ;;  %v1276_v20 = vrot.slane %v6572_v16, %v5763_v12  ;;  %v1255_v42 = vsel %vm1253_vm14, %v1248_v22, %v6631_v52  ;;  %v9266_v5 = vld [vmem:[#allocation80_spill] sm:$0xff] }
 0x1b8   : > { %2385 = vmatpush1.msra.mxu0 %v1746_v1  ;;  %2340 = vmatpush2.msra.mxu1 %v1359_v2  ;;  %v1668_v50 = vmul.f32 %v1657_v62, %v6756_v37  ;;  %v1257_v46 = vsel %vm1253_vm14, %v9266_v5, %v1248_v22  ;;  %v6955_v16 = vrot.slane %v9264_v44, %v5987_v43  ;;  %v9268_v37 = vld [vmem:[#allocation45_spill] sm:$0xff]  ;;  %v5255_v22 = vld [vmem:[%s5613_s28 + $0x18] sm:$0xff] }
 0x1b9   : > { %2386 = vmatprep.subr.mxu0 %v9265_v55  ;;  %v6946_v0 = vpop.permute.xlu1 %1513  ;;  %v1246_v48 = vpop.permute.xlu0 %1245  ;;  %2341 = vmatprep.subr.mxu1 %v5254_v38  ;;  %v1633_v52 = vmul.f32 %v1618_v63, %v6768_v36  ;;  %v1216_v62 = vrot.slane %v6638_v56, %v5987_v43  ;;  %v1292_v1 = vmul.f32 %v1280_v33, %v1255_v42 }
 0x1ba   : > { %2387 = vmatpush1.msra.mxu0 %v1711_v26  ;;  %v1254_v61 = vsel %vm1253_vm14, %v1246_v48, %v6664_v15  ;;  %2342 = vmatpush2.msra.mxu1 %v9267_v53  ;;  %v1256_v28 = vsel %vm1253_vm14, %v6666_v4, %v1246_v48  ;;  %v1212_v36 = vrot.slane %v6638_v56, %v5763_v12  ;;  %v9269_v15 = vld [vmem:[#allocation50_spill] sm:$0xff]  ;;  %v9270_v26 = vld [vmem:[#allocation68_spill] sm:$0xff]  ;;  %v9272_v48 = vld [vmem:[#allocation51_spill] sm:$0xff] }
 0x1bb   : > { %2388 = vmatprep.subr.mxu0 %v9268_v37  ;;  %2343 = vmatprep.subr.mxu1 %v5255_v22  ;;  %v6973_v17 = vrot.slane %v9269_v15, %v5763_v12  ;;  %v1291_v3 = vmul.f32 %v1276_v20, %v1257_v46  ;;  %v1544_v4 = vrot.slane %v9269_v15, %v5987_v43  ;;  %v9273_v46 = vld [vmem:[#allocation56_spill] sm:$0xff]  ;;  %v7002_v53 = vld [vmem:[#allocation6 + $0x28] sm:$0xff]  ;;  %v9276_v22 = vld [vmem:[#allocation58_spill] sm:$0xff] }
 0x1bc   : > { %2389 = vmatpush1.msra.mxu0 %v1707_v7  ;;  %2344 = vmatpush2.msra.mxu1 %v9270_v26  ;;  %v1629_v7 = vmul.f32 %v1618_v63, %v6781_v6  ;;  %v1288_v44 = vmul.f32 %v1280_v33, %v1254_v61  ;;  %v1287_v42 = vmul.f32 %v1276_v20, %v1256_v28 }
 0x1bd   : > { %2390 = vmatprep.subr.mxu0 %v9271_v39  ;;  %v1452_v2 = vpop.permute.xlu1 %1451  ;;  %v1184_v29 = vpop.permute.xlu0 %1183  ;;  %2345 = vmatprep.subr.mxu1 %v1292_v1  ;;  %v6989_v38 = vrot.slane %v9273_v46, %v5763_v12  ;;  %v1594_v63 = vmul.f32 %v6929_v19, %v6793_v34  ;;  %v1148_v20 = vrot.slane %v6731_v8, %v5763_v12  ;;  %v9279_v39 = vld [vmem:[#allocation57_spill] sm:$0xff] }
 0x1be   : > { %2391 = vmatpush1.msra.mxu0 %v1672_v45  ;;  %v1191_v56 = vsel %vm1189_vm15, %v1184_v29, %v6715_v27  ;;  %v1193_v55 = vsel %vm1189_vm15, %v6690_v9, %v1184_v29  ;;  %2346 = vmatpush2.msra.mxu1 %v1291_v3  ;;  %v6993_v27 = vrot.slane %v9273_v46, %v5987_v43  ;;  %v9274_v9 = vld [vmem:[#allocation54_spill] sm:$0xff] }
 0x1bf   : > { %2392 = vmatprep.subr.mxu0 %v9272_v48  ;;  %v1228_v5 = vmul.f32 %v1216_v62, %v1191_v56  ;;  %v1227_v6 = vmul.f32 %v1212_v36, %v1193_v55  ;;  %2347 = vmatprep.subr.mxu1 %v1288_v44  ;;  %v1152_v61 = vrot.slane %v6731_v8, %v5987_v43  ;;  %v9282_v48 = vld [vmem:[#allocation65_spill] sm:$0xff] }
 0x1c0   : > { %2393 = vmatpush1.msra.mxu0 %v1668_v50  ;;  %2348 = vmatpush2.msra.mxu1 %v1287_v42  ;;  %v9275_v50 = vld [vmem:[#allocation53_spill] sm:$0xff]  ;;  %v7013_v28 = vrot.slane %v6810_v57, %v5763_v12  ;;  %v1088_v15 = vrot.slane %v6810_v57, %v5987_v43  ;;  %v1524_v57 = vsel %vm1517_vm9, %v6946_v0, %v9279_v39 }
 0x1c1   : > { %2394 = vmatprep.subr.mxu0 %v9274_v9  ;;  %v1450_v45 = vpop.permute.xlu1 %1449  ;;  %v1182_v33 = vpop.permute.xlu0 %1181  ;;  %v1525_v37 = vsel %vm1517_vm9, %v6922_v49, %v9275_v50  ;;  %2349 = vmatprep.subr.mxu1 %v1228_v5 }
 0x1c2   : > { %2395 = vmatpush1.msra.mxu0 %v1633_v52  ;;  %v1190_v34 = vsel %vm1189_vm15, %v1182_v33, %v6740_v23  ;;  %v1192_v8 = vsel %vm1189_vm15, %v6742_v59, %v1182_v33  ;;  %2350 = vmatpush2.msra.mxu1 %v1227_v6  ;;  %v1590_v52 = vmul.f32 %v6929_v19, %v6806_v60  ;;  %v9277_v23 = vld [vmem:[#allocation52_spill] sm:$0xff]  ;;  %v9278_v59 = vld [vmem:[#allocation55_spill] sm:$0xff]  ;;  %v9280_v60 = vld [vmem:[#allocation61_spill] sm:$0xff] }
 0x1c3   : > { %2396 = vmatprep.subr.mxu0 %v9276_v22  ;;  %v1224_v1 = vmul.f32 %v1216_v62, %v1190_v34  ;;  %v1519_v3 = vsel %vm1517_vm9, %v9277_v23, %v6922_v49  ;;  %v1223_v26 = vmul.f32 %v1212_v36, %v1192_v8  ;;  %2217 = vmatprep.mubr.f32.mxu0 %v7002_v53  ;;  %v9281_v36 = vld [vmem:[#allocation60_spill] sm:$0xff]  ;;  %v9283_v6 = vld [vmem:[#allocation59_spill] sm:$0xff] }
 0x1c4   : > { %2397 = vmatpush1.msra.mxu0 %v1629_v7  ;;  %v1518_v62 = vsel %vm1517_vm9, %v9278_v59, %v6946_v0  ;;  %v1556_v49 = vmul.f32 %v1544_v4, %v1525_v37  ;;  %v1461_v7 = vsel %vm1453_vm10, %v1452_v2, %v9281_v36 }
 0x1c5   : > { %2398 = vmatprep.subr.mxu0 %v9280_v60  ;;  %v1118_v19 = vpop.permute.xlu1 %1117  ;;  %2351 = vmatprep.subr.mxu1 %v1224_v1  ;;  %v1120_v29 = vpop.permute.xlu0 %1119  ;;  %v1551_v46 = vmul.f32 %v6973_v17, %v1518_v62  ;;  %v9288_v62 = vld [vmem:[#allocation70_spill] sm:$0xff] }
 0x1c6   : > { %v1126_v56 = vsel %vm9101_vm4, %v1118_v19, %v6813_v54  ;;  %2399 = vmatpush1.msra.mxu0 %v1594_v63  ;;  %v1127_v44 = vsel %vm9101_vm4, %v1120_v29, %v6796_v18  ;;  %v1129_v0 = vsel %vm9101_vm4, %v6771_v31, %v1120_v29  ;;  %v1128_v42 = vsel %vm9101_vm4, %v6815_v25, %v1118_v19  ;;  %v9284_v31 = vld [vmem:[#allocation62_spill] sm:$0xff]  ;;  %v9285_v25 = vld [vmem:[#allocation64_spill] sm:$0xff] }
 0x1c7   : > { %v1163_v55 = vmul.f32 %v1148_v20, %v1129_v0  ;;  %2352 = vmatpush2.msra.mxu1 %v1223_v26  ;;  %2400 = vmatprep.subr.mxu0 %v9282_v48  ;;  %v1164_v5 = vmul.f32 %v1152_v61, %v1127_v44  ;;  %v1555_v54 = vmul.f32 %v6973_v17, %v1519_v3  ;;  %v9287_v3 = vld [vmem:[#allocation73_spill] sm:$0xff]  ;;  %v9290_v19 = vld [vmem:[#allocation18_spill] sm:$0xff] }
 0x1c8   : > { %v1455_v18 = vsel %vm1453_vm10, %v9283_v6, %v1452_v2  ;;  %2401 = vmatpush1.msra.mxu0 %v1590_v52  ;;  %v1552_v63 = vmul.f32 %v1544_v4, %v1524_v57  ;;  %v1454_v9 = vsel %vm1453_vm10, %v9284_v31, %v1450_v45  ;;  %v1460_v33 = vsel %vm1453_vm10, %v1450_v45, %v9285_v25  ;;  %v9289_v57 = vld [vmem:[#allocation67_spill] sm:$0xff]  ;;  %v9300_v31 = vld [vmem:[#allocation85_spill] sm:$0xff] }
 0x1c9   : > { %2402 = vmatprep.subr.mxu0 %v1556_v49  ;;  %v1054_v50 = vpop.permute.xlu1 %1053  ;;  %2353 = vmatprep.subr.mxu1 %v1164_v5  ;;  %v1056_v37 = vpop.permute.xlu0 %1055  ;;  %v1492_v17 = vmul.f32 %v6993_v27, %v1461_v7  ;;  %v1159_v34 = vmul.f32 %v1148_v20, %v1128_v42  ;;  %v1160_v8 = vmul.f32 %v1152_v61, %v1126_v56  ;;  %v9291_v49 = vld [vmem:[#allocation71_spill] sm:$0xff] }
 0x1ca   : > { %2403 = vmatpush1.msra.mxu0 %v1555_v54  ;;  %v1063_v2 = vsel %vm9099_vm8, %v1056_v37, %v6836_v51  ;;  %v1065_v4 = vsel %vm9099_vm8, %v6829_v14, %v1056_v37  ;;  %v1062_v45 = vsel %vm9099_vm8, %v1054_v50, %v6843_v35  ;;  %2354 = vmatpush2.msra.mxu1 %v1163_v55  ;;  %v9286_v35 = vld [vmem:[#allocation66_spill] sm:$0xff]  ;;  %v9292_v7 = vld [vmem:[#allocation79_spill] sm:$0xff] }
 0x1cb   : > { %v1099_v22 = vmul.f32 %v7013_v28, %v1065_v4  ;;  %2404 = vmatprep.subr.mxu0 %v1552_v63  ;;  %v1100_v1 = vmul.f32 %v1088_v15, %v1063_v2  ;;  %v1491_v20 = vmul.f32 %v6989_v38, %v1455_v18  ;;  %v1064_v51 = vsel %vm9099_vm8, %v6845_v24, %v1054_v50  ;;  %v9294_v55 = vld [vmem:[#allocation22_spill] sm:$0xff]  ;;  %v5256_v54 = vld [vmem:[#allocation6 + $0x18] sm:$0xff]  ;;  %v9297_v18 = vld [vmem:[#allocation84_spill] sm:$0xff] }
 0x1cc   : > { %2355 = vmatprep.subr.mxu1 %v1160_v8  ;;  %2405 = vmatpush1.msra.mxu0 %v1551_v46  ;;  %v1024_v14 = vrot.slane %v6841_v58, %v5987_v43  ;;  %v1020_v61 = vrot.slane %v6841_v58, %v5763_v12  ;;  %v999_v52 = vsel %vm997_vm11, %v9286_v35, %v6860_v11  ;;  %v9296_v46 = vld [vmem:[#allocation24_spill] sm:$0xff]  ;;  %v9299_v63 = vld [vmem:[#allocation82_spill] sm:$0xff]  ;;  %vm9330_vm8 = vcmp.lt.s32.totalorder %v5753_v10, 65 }
 0x1cd   : > { %2356 = vmatpush2.msra.mxu1 %v1159_v34  ;;  %2406 = vmatprep.subr.mxu0 %v1492_v17  ;;  %v1488_v23 = vmul.f32 %v6993_v27, %v1460_v33  ;;  %v1856_v24 = vrot.slane %v9287_v3, %v5987_v43  ;;  %v1487_v26 = vmul.f32 %v6989_v38, %v1454_v9  ;;  %vm9332_vm4 = vmmov %vm9330_vm8 }
 0x1ce   : > { %2357 = vmatprep.subr.mxu1 %v1100_v1  ;;  %2407 = vmatpush1.msra.mxu0 %v1491_v20  ;;  %v1096_v59 = vmul.f32 %v1088_v15, %v1062_v45  ;;  %v998_v58 = vsel %vm997_vm11, %v9288_v62, %v6858_v13  ;;  %v1095_v39 = vmul.f32 %v7013_v28, %v1064_v51 }
 0x1cf   : > { %2358 = vmatpush2.msra.mxu1 %v1099_v22  ;;  %2408 = vmatprep.subr.mxu0 %v1488_v23  ;;  %v1907_v11 = vmul.f32 %v6955_v16, %v6873_v47  ;;  %v1852_v27 = vrot.slane %v9287_v3, %v5763_v12  ;;  %v1906_v38 = vmul.f32 %v6938_v40, %v999_v52 }
 0x1d0   : > { %2359 = vmatprep.subr.mxu1 %v1096_v59  ;;  %2409 = vmatpush1.msra.mxu0 %v1487_v26  ;;  %v1036_v15 = vmul.f32 %v1024_v14, %v999_v52  ;;  %v1035_v60 = vmul.f32 %v1020_v61, %v9289_v57  ;;  %v1903_v13 = vmul.f32 %v6955_v16, %v6867_v30  ;;  %v1920_v30 = vld [vmem:[#allocation6 + $0x20] sm:$0xff] }
 0x1d1   : > { %2360 = vmatpush2.msra.mxu1 %v1095_v39  ;;  %2430 = vmatprep.subr.mxu0 %v1907_v11  ;;  %v1902_v28 = vmul.f32 %v6938_v40, %v998_v58  ;;  %v1032_v47 = vmul.f32 %v1024_v14, %v998_v58  ;;  %v1868_v29 = vmul.f32 %v1856_v24, %v9290_v19  ;;  %v9293_v40 = vld [vmem:[#allocation20_spill] sm:$0xff] }
 0x1d2   : > { %2361 = vmatprep.subr.mxu1 %v1036_v15  ;;  %2431 = vmatpush2.msra.mxu0 %v1906_v38  ;;  %v1031_v36 = vmul.f32 %v1020_v61, %v9291_v49  ;;  %v1817_v56 = vrot.slane %v9292_v7, %v5987_v43  ;;  %v1867_v44 = vmul.f32 %v1852_v27, %v6596_v41  ;;  %v9295_v41 = vld [vmem:[#allocation83_spill] sm:$0xff] }
 0x1d3   : > { %2362 = vmatpush2.msra.mxu1 %v1035_v60  ;;  %2432 = vmatprep.subr.mxu0 %v1903_v13  ;;  %v1813_v0 = vrot.slane %v9292_v7, %v5763_v12  ;;  %v1864_v16 = vmul.f32 %v1856_v24, %v9293_v40  ;;  %v1863_v42 = vmul.f32 %v1852_v27, %v6610_v32  ;;  %v5442_v40 = vmov 0  }
 0x1d4   : > { %2363 = vmatprep.subr.mxu1 %v1032_v47  ;;  %2433 = vmatpush2.msra.mxu0 %v1902_v28  ;;  %v1829_v48 = vmul.f32 %v1817_v56, %v9294_v55  ;;  %v1825_v6 = vmul.f32 %v1817_v56, %v9296_v46  ;;  %v465_v55 = vld [vmem:[%s8998_s3 + $0x8] sm:$0xff] }
 0x1d5   : > { %2364 = vmatpush2.msra.mxu1 %v1031_v36  ;;  %2434 = vmatprep.subr.mxu0 %v1868_v29  ;;  %v1828_v5 = vmul.f32 %v1813_v0, %v9295_v41  ;;  %v1824_v32 = vmul.f32 %v1813_v0, %v9297_v18 }
 0x1d6   : > { %2435 = vmatpush2.msra.mxu0 %v1867_v44  ;;  %2366 = vmatmul.mubr.f32.vlgmr.msra.gmra.mxu1 %v6883_v21  ;;  %v9298_v21 = vld [vmem:[#allocation81_spill] sm:$0xff] }
 0x1d7   : > { %2218 = vmatmul.mubr.f32.gmra.mxu0 %v1920_v30  ;;  %2436 = vmatprep.subr.mxu0 %v1864_v16  ;;  %v464_v16 = vld [vmem:[%s8998_s3] sm:$0xff] }
 0x1d8   : > { %2437 = vmatpush2.msra.mxu0 %v1863_v42  ;;  %5082 = vmatprep.mubr.msk.f32.mxu0 %vm2140_vm6, %v5256_v54  ;;  %v467_v42 = vld [vmem:[%s8999_s4 + $0x8] sm:$0xff] }
 0x1d9   : > { %2438 = vmatprep.subr.mxu0 %v1829_v48  ;;  %2371 = vmatprep.mubr.f32.mxu1 %v7002_v53  ;;  %v466_v48 = vld [vmem:[%s8999_s4] sm:$0xff] }
 0x1da   : > { %2439 = vmatpush2.msra.mxu0 %v1828_v5  ;;  %2372 = vmatmul.mubr.f32.gmra.mxu1 %v1920_v30 }
 0x1db   : > { %2440 = vmatprep.subr.mxu0 %v1825_v6  ;;  %5209 = vset.pattern.permute.xlu1 %v5442_v40 }
 0x1dc   : > { %2441 = vmatpush2.msra.mxu0 %v1824_v32  ;;  %5208 = vset.pattern.permute.xlu0 %v5442_v40 }
 0x1dd   : > { %2443 = vmatmul.mubr.f32.vlgmr.msra.gmra.mxu0 %v9298_v21 }
 0x1de   : > { %5083 = vmatprep.mubr.msk.f32.mxu0 %vm2140_vm6, %v9299_v63 }
 0x1e1   : > { %2449 = vmatmul.mubr.f32.gmra.mxu0 %v9300_v31 }
 0x23e   : > { %v2290_v9 = vpop.f32.mrf.mxu1 }
 0x240   : > { %v2292_v25 = vpop.f32.mrf.mxu1 }
 0x242   : > { %v2296_v50 = vpop.f32.mrf.mxu1 }
 0x244   : > { %v2298_v17 = vpop.f32.mrf.mxu1 }
 0x270   : > { %v2213_v33 = vpop.f32.mrf.mxu0 }
 0x271   : > { %v7127_v2 = vadd.f32 %v2290_v9, %v2213_v33 }
 0x272   : > { %v2215_v37 = vpop.f32.mrf.mxu0 }
 0x273   : > { %v7125_v53 = vadd.f32 %v2292_v25, %v2215_v37  ;;  %v2472_v22 = vmul.f32 %v7127_v2, %v7127_v2 }
 0x275   : > { %v2473_v8 = vmul.f32 %v7125_v53, %v7125_v53  ;;  %v2455_v51 = vadd.f32 %v7125_v53, %v7127_v2 }
 0x277   : > { %v2480_v61 = vadd.f32 %v2473_v8, %v2472_v22 }
 0x296   : > { %v2367_v4 = vpop.f32.mrf.mxu1 }
 0x297   : > { %v2219_v34 = vpop.f32.mrf.mxu0 }
 0x298   : > { %v2369_v1 = vpop.f32.mrf.mxu1  ;;  %v7137_v23 = vadd.f32 %v2296_v50, %v2219_v34 }
 0x299   : > { %v2221_v45 = vpop.f32.mrf.mxu0 }
 0x29a   : > { %v2373_v52 = vpop.f32.mrf.mxu1  ;;  %v7144_v59 = vadd.f32 %v2298_v17, %v2221_v45  ;;  %v2476_v57 = vmul.f32 %v7137_v23, %v7137_v23 }
 0x29c   : > { %v2375_v38 = vpop.f32.mrf.mxu1  ;;  %v2477_v28 = vmul.f32 %v7144_v59, %v7144_v59 }
 0x29d   : > { %v2444_v20 = vpop.f32.mrf.mxu0 }
 0x29e   : > { %v7135_v14 = vadd.f32 %v2444_v20, %v2367_v4 }
 0x29f   : > { %v2446_v35 = vpop.f32.mrf.mxu0 }
 0x2a0   : > { %v2456_v3 = vadd.f32 %v2455_v51, %v7135_v14  ;;  %v2474_v24 = vmul.f32 %v7135_v14, %v7135_v14  ;;  %v7142_v26 = vadd.f32 %v2446_v35, %v2369_v1 }
 0x2a1   : > { %v2450_v62 = vpop.f32.mrf.mxu0 }
 0x2a2   : > { %v2481_v58 = vadd.f32 %v2480_v61, %v2474_v24  ;;  %v2457_v39 = vadd.f32 %v2456_v3, %v7142_v26  ;;  %v2475_v11 = vmul.f32 %v7142_v26, %v7142_v26  ;;  %v7149_v27 = vadd.f32 %v2450_v62, %v2373_v52 }
 0x2a3   : > { %v2452_v15 = vpop.f32.mrf.mxu0 }
 0x2a4   : > { %v2458_v60 = vadd.f32 %v2457_v39, %v7137_v23  ;;  %v2482_v13 = vadd.f32 %v2481_v58, %v2475_v11  ;;  %v2478_v29 = vmul.f32 %v7149_v27, %v7149_v27  ;;  %v7159_v49 = vadd.f32 %v2452_v15, %v2375_v38 }
 0x2a6   : > { %v2483_v47 = vadd.f32 %v2482_v13, %v2476_v57  ;;  %v2459_v19 = vadd.f32 %v2458_v60, %v7144_v59  ;;  %v2479_v56 = vmul.f32 %v7159_v49, %v7159_v49 }
 0x2a8   : > { %v2460_v36 = vadd.f32 %v2459_v19, %v7149_v27  ;;  %v2484_v7 = vadd.f32 %v2483_v47, %v2477_v28 }
 0x2aa   : > { %v2461_v44 = vadd.f32 %v2460_v36, %v7159_v49  ;;  %v2485_v0 = vadd.f32 %v2484_v7, %v2478_v29 }
 0x2ac   : > { %2462 = vadd.xlane.f32.xlu0 %v2461_v44  ;;  %v2486_v30 = vadd.f32 %v2485_v0, %v2479_v56 }
 0x2ae   : > { %2487 = vadd.xlane.f32.xlu1 %v2486_v30 }
 0x2bf   : > { %2523 = vperm.xlu1 %5209, %v464_v16  }
 0x2c2   : > { %2528 = vperm.xlu0 %5208, %v465_v55  }
 0x2c3   : > { %2546 = vperm.xlu1 %5209, %v467_v42  }
 0x2c7   : > { %2541 = vperm.xlu1 %5209, %v466_v48  }
 0x335   : > { %v2463_v41 = vpop.xlane.xlu0 %2462 }
 0x336   : > { %v2464_v5 = vrot.slane %v2463_v41, 4 }
 0x337   : > { %v2488_v54 = vpop.xlane.xlu1 %2487 }
 0x338   : > { %v2465_v46 = vadd.f32 %v2464_v5, %v2463_v41  ;;  %v2489_v6 = vrot.slane %v2488_v54, 4 }
 0x33a   : > { %v2490_v18 = vadd.f32 %v2489_v6, %v2488_v54  ;;  %v2466_v32 = vrot.slane %v2465_v46, 2 }
 0x33b   : > { %v2524_v34 = vpop.permute.xlu1 %2523 }
 0x33c   : > { %v2467_v21 = vadd.f32 %v2466_v32, %v2465_v46  ;;  %v2491_v63 = vrot.slane %v2490_v18, 2 }
 0x33d   : > { %v2529_v13 = vpop.permute.xlu0 %2528 }
 0x33e   : > { %v2468_v31 = vrot.slane %v2467_v21, 1  ;;  %v2492_v9 = vadd.f32 %v2491_v63, %v2490_v18 }
 0x33f   : > { %v2547_v1 = vpop.permute.xlu1 %2546 }
 0x340   : > { %v2469_v25 = vadd.f32 %v2468_v31, %v2467_v21  ;;  %v2493_v33 = vrot.slane %v2492_v9, 1 }
 0x342   : > { %5104 = vpush %v2469_v25  ;;  %v2494_v50 = vadd.f32 %v2493_v33, %v2492_v9 }
 0x343   : > { %v2542_v24 = vpop.permute.xlu1 %2541 }
 0x344   : > { %5106 = vpush %v2494_v50 }
 0x373   : > { %s5105_s26 = spop %5104 }
 0x374   : > { %s2471_s29 = smul.f32 0.00012207031, %s5105_s26  ;;  %s9301_s26 = smov 64  }
 0x375   : > { %s5107_s30 = spop %5106 }
 0x376   : > { %s2497_s23 = smul.f32 %s2471_s29, %s2471_s29  ;;  %v2499_v4 = vstv %s2471_s29  ;;  %s9303_s29 = smov 57  }
 0x377   : > { %s2496_s17 = smul.f32 0.00012207031, %s5107_s30  ;;  %v2501_v8 = vsub.f32 %v7125_v53, %v2499_v4  ;;  %v2500_v22 = vsub.f32 %v7127_v2, %v2499_v4  ;;  %v2502_v35 = vsub.f32 %v7135_v14, %v2499_v4  ;;  %v2503_v52 = vsub.f32 %v7142_v26, %v2499_v4  ;;  %s9304_s30 = smov 65  }
 0x378   : > { %v2504_v53 = vsub.f32 %v7137_v23, %v2499_v4  ;;  %v2505_v2 = vsub.f32 %v7144_v59, %v2499_v4  ;;  %v2506_v28 = vsub.f32 %v7149_v27, %v2499_v4  ;;  %v2507_v19 = vsub.f32 %v7159_v49, %v2499_v4 }
 0x379   : > { %s2498_s27 = ssub.f32 %s2496_s17, %s2497_s23  ;;  %s9305_s23 = smov 71  }
 0x37a   : > { %s9306_s17 = smov 72  }
 0x37b   : > { %s2508_s20 = sadd.f32 1e-05, %s2498_s27  ;;  %s9311_s27 = smov 120  }
 0x37d   : > { %v2509_v37 = vstv %s2508_s20  ;;  %s9315_s20 = smov 55  }
 0x37e   : > { %5210 = vrsqrt.f32 %v2509_v37 }
 0x38b   : > { %v5211_v17 = vpop.eup %5210 }
 0x38c   : > { %5108 = vpush %v5211_v17 }
 0x3bd   : > { %s5109_s15 = spop %5108 }
 0x3be   : > { %v2512_v45 = vstv %s5109_s15  ;;  %s9317_s15 = smov 121  }
 0x3bf   : > { %v2514_v20 = vmul.f32 %v2512_v45, %v2501_v8  ;;  %v2513_v51 = vmul.f32 %v2512_v45, %v2500_v22  ;;  %v2515_v62 = vmul.f32 %v2512_v45, %v2502_v35  ;;  %v2516_v58 = vmul.f32 %v2512_v45, %v2503_v52 }
 0x3c0   : > { %v2517_v60 = vmul.f32 %v2512_v45, %v2504_v53  ;;  %v2518_v14 = vmul.f32 %v2512_v45, %v2505_v2  ;;  %v2519_v36 = vmul.f32 %v2512_v45, %v2506_v28  ;;  %v2520_v7 = vmul.f32 %v2512_v45, %v2507_v19 }
 0x3c1   : > { %v2532_v61 = vmul.f32 %v2524_v34, %v2514_v20  ;;  %v2531_v3 = vmul.f32 %v2524_v34, %v2513_v51  ;;  %v2533_v38 = vmul.f32 %v2524_v34, %v2515_v62  ;;  %v2534_v15 = vmul.f32 %v2524_v34, %v2516_v58 }
 0x3c2   : > { %v2535_v59 = vmul.f32 %v2529_v13, %v2517_v60  ;;  %v2536_v56 = vmul.f32 %v2529_v13, %v2518_v14  ;;  %v2537_v40 = vmul.f32 %v2529_v13, %v2519_v36  ;;  %v2538_v16 = vmul.f32 %v2529_v13, %v2520_v7 }
 0x3c3   : > { %v7181_v39 = vadd.f32 %v2542_v24, %v2532_v61  ;;  %v7183_v11 = vadd.f32 %v2542_v24, %v2531_v3  ;;  %v7190_v47 = vadd.f32 %v2542_v24, %v2533_v38  ;;  %v7193_v29 = vadd.f32 %v2542_v24, %v2534_v15 }
 0x3c4   : > { %v7205_v49 = vadd.f32 %v2547_v1, %v2535_v59  ;;  %v7207_v42 = vadd.f32 %v2547_v1, %v2536_v56  ;;  %v7218_v54 = vadd.f32 %v2547_v1, %v2537_v40  ;;  %v7221_v6 = vadd.f32 %v2547_v1, %v2538_v16 }
 0x3c5   : > { %v2566_v57 = vmul.f32 0.70710677, %v7181_v39  ;;  %v2565_v26 = vmul.f32 0.70710677, %v7183_v11  ;;  %v2567_v0 = vmul.f32 0.70710677, %v7190_v47 }
 0x3c6   : > { %v2568_v30 = vmul.f32 0.70710677, %v7193_v29  ;;  %v2569_v46 = vmul.f32 0.70710677, %v7205_v49  ;;  %v2570_v18 = vmul.f32 0.70710677, %v7207_v42 }
 0x3c7   : > { %v7195_v23 = vclamps-f32 %v2566_v57, 4.0  ;;  %v7197_v44 = vclamps-f32 %v2565_v26, 4.0  ;;  %v7213_v48 = vclamps-f32 %v2567_v0, 4.0  ;;  %v2571_v25 = vmul.f32 0.70710677, %v7218_v54 }
 0x3c8   : > { %v7215_v41 = vclamps-f32 %v2568_v30, 4.0  ;;  %v7235_v33 = vclamps-f32 %v2569_v46, 4.0  ;;  %v2572_v37 = vmul.f32 0.70710677, %v7221_v6  ;;  %v7239_v17 = vclamps-f32 %v2570_v18, 4.0 }
 0x3c9   : > { %v7203_v27 = vmul.f32 %v7195_v23, %v7195_v23  ;;  %v7211_v55 = vmul.f32 %v7197_v44, %v7197_v44  ;;  %v7228_v63 = vmul.f32 %v7213_v48, %v7213_v48  ;;  %v7248_v51 = vclamps-f32 %v2571_v25, 4.0 }
 0x3ca   : > { %v7232_v31 = vmul.f32 %v7215_v41, %v7215_v41  ;;  %v7246_v1 = vmul.f32 %v7235_v33, %v7235_v33  ;;  %v7250_v61 = vclamps-f32 %v2572_v37, 4.0  ;;  %v7254_v35 = vmul.f32 %v7239_v17, %v7239_v17 }
 0x3cb   : > { %v2598_v5 = vmul.f32 -2.7261424e-10, %v7203_v27  ;;  %v2597_v32 = vmul.f32 -2.7261424e-10, %v7211_v55  ;;  %v2702_v21 = vmul.f32 -1.45660715e-05, %v7203_v27  ;;  %v7260_v62 = vmul.f32 %v7248_v51, %v7248_v51 }
 0x3cc   : > { %v2701_v50 = vmul.f32 -1.45660715e-05, %v7211_v55  ;;  %v2599_v8 = vmul.f32 -2.7261424e-10, %v7228_v63  ;;  %v2600_v45 = vmul.f32 -2.7261424e-10, %v7232_v31  ;;  %v7264_v58 = vmul.f32 %v7250_v61, %v7250_v61 }
 0x3cd   : > { %v2606_v9 = vadd.f32 2.7706815e-08, %v2598_v5  ;;  %v2605_v34 = vadd.f32 2.7706815e-08, %v2597_v32  ;;  %v2710_v4 = vadd.f32 -0.00021337405, %v2702_v21 }
 0x3ce   : > { %v2709_v20 = vadd.f32 -0.00021337405, %v2701_v50  ;;  %v2607_v24 = vadd.f32 2.7706815e-08, %v2599_v8  ;;  %v2608_v53 = vadd.f32 2.7706815e-08, %v2600_v45 }
 0x3cf   : > { %v2614_v22 = vmul.f32 %v2606_v9, %v7203_v27  ;;  %v2613_v52 = vmul.f32 %v2605_v34, %v7211_v55  ;;  %v2718_v3 = vmul.f32 %v2710_v4, %v7203_v27  ;;  %v2703_v2 = vmul.f32 -1.45660715e-05, %v7228_v63 }
 0x3d0   : > { %v2704_v15 = vmul.f32 -1.45660715e-05, %v7232_v31  ;;  %v2717_v57 = vmul.f32 %v2709_v20, %v7211_v55  ;;  %v2601_v60 = vmul.f32 -2.7261424e-10, %v7246_v1  ;;  %v2602_v14 = vmul.f32 -2.7261424e-10, %v7254_v35 }
 0x3d1   : > { %v2622_v38 = vadd.f32 -2.101024e-06, %v2614_v22  ;;  %v2621_v13 = vadd.f32 -2.101024e-06, %v2613_v52  ;;  %v2726_v26 = vadd.f32 -0.001682827, %v2718_v3  ;;  %v2615_v25 = vmul.f32 %v2607_v24, %v7228_v63 }
 0x3d2   : > { %v2603_v28 = vmul.f32 -2.7261424e-10, %v7260_v62  ;;  %v2604_v19 = vmul.f32 -2.7261424e-10, %v7264_v58  ;;  %v2609_v36 = vadd.f32 2.7706815e-08, %v2601_v60 }
 0x3d3   : > { %v2610_v59 = vadd.f32 2.7706815e-08, %v2602_v14  ;;  %v2630_v7 = vmul.f32 %v2622_v38, %v7203_v27  ;;  %v2705_v0 = vmul.f32 -1.45660715e-05, %v7246_v1  ;;  %v2706_v30 = vmul.f32 -1.45660715e-05, %v7254_v35 }
 0x3d4   : > { %v2611_v56 = vadd.f32 2.7706815e-08, %v2603_v28  ;;  %v2725_v40 = vadd.f32 -0.001682827, %v2717_v57  ;;  %v2617_v16 = vmul.f32 %v2609_v36, %v7246_v1  ;;  %v2707_v46 = vmul.f32 -1.45660715e-05, %v7260_v62 }
 0x3d5   : > { %v2618_v5 = vmul.f32 %v2610_v59, %v7254_v35  ;;  %v2708_v32 = vmul.f32 -1.45660715e-05, %v7264_v58  ;;  %v2713_v21 = vadd.f32 -0.00021337405, %v2705_v0  ;;  %v2714_v9 = vadd.f32 -0.00021337405, %v2706_v30 }
 0x3d6   : > { %v2619_v18 = vmul.f32 %v2611_v56, %v7260_v62  ;;  %v2612_v50 = vadd.f32 2.7706815e-08, %v2604_v19  ;;  %v2625_v37 = vadd.f32 -2.101024e-06, %v2617_v16  ;;  %v2629_v4 = vmul.f32 %v2621_v13, %v7211_v55 }
 0x3d7   : > { %v2626_v34 = vadd.f32 -2.101024e-06, %v2618_v5  ;;  %v2734_v8 = vmul.f32 %v2726_v26, %v7203_v27  ;;  %v2715_v22 = vadd.f32 -0.00021337405, %v2707_v46  ;;  %v2733_v20 = vmul.f32 %v2725_v40, %v7211_v55 }
 0x3d8   : > { %v2627_v45 = vadd.f32 -2.101024e-06, %v2619_v18  ;;  %v2633_v52 = vmul.f32 %v2625_v37, %v7246_v1  ;;  %v2716_v38 = vadd.f32 -0.00021337405, %v2708_v32  ;;  %v2638_v57 = vadd.f32 -5.6925062e-05, %v2630_v7 }
 0x3d9   : > { %v2634_v3 = vmul.f32 %v2626_v34, %v7254_v35  ;;  %v2721_v24 = vmul.f32 %v2713_v21, %v7246_v1  ;;  %v2722_v14 = vmul.f32 %v2714_v9, %v7254_v35  ;;  %v2711_v28 = vadd.f32 -0.00021337405, %v2703_v2 }
 0x3da   : > { %v2635_v60 = vmul.f32 %v2627_v45, %v7260_v62  ;;  %v2620_v13 = vmul.f32 %v2612_v50, %v7264_v58  ;;  %v2641_v26 = vadd.f32 -5.6925062e-05, %v2633_v52  ;;  %v2616_v36 = vmul.f32 %v2608_v53, %v7232_v31 }
 0x3db   : > { %v2642_v19 = vadd.f32 -5.6925062e-05, %v2634_v3  ;;  %v2742_v59 = vadd.f32 -0.0073733293, %v2734_v8  ;;  %v2723_v0 = vmul.f32 %v2715_v22, %v7260_v62  ;;  %v2637_v30 = vadd.f32 -5.6925062e-05, %v2629_v4 }
 0x3dc   : > { %v2643_v56 = vadd.f32 -5.6925062e-05, %v2635_v60  ;;  %v2712_v40 = vadd.f32 -0.00021337405, %v2704_v15  ;;  %v2741_v7 = vadd.f32 -0.0073733293, %v2733_v20  ;;  %v2724_v16 = vmul.f32 %v2716_v38, %v7264_v58 }
 0x3dd   : > { %v2646_v5 = vmul.f32 %v2638_v57, %v7203_v27  ;;  %v2649_v46 = vmul.f32 %v2641_v26, %v7246_v1  ;;  %v2729_v2 = vadd.f32 -0.001682827, %v2721_v24  ;;  %v2730_v18 = vadd.f32 -0.001682827, %v2722_v14 }
 0x3de   : > { %v2623_v32 = vadd.f32 -2.101024e-06, %v2615_v25  ;;  %v2719_v21 = vmul.f32 %v2711_v28, %v7228_v63  ;;  %v2628_v9 = vadd.f32 -2.101024e-06, %v2620_v13  ;;  %v2650_v53 = vmul.f32 %v2642_v19, %v7254_v35 }
 0x3df   : > { %v2624_v50 = vadd.f32 -2.101024e-06, %v2616_v36  ;;  %v2750_v37 = vmul.f32 %v2742_v59, %v7203_v27  ;;  %v2651_v15 = vmul.f32 %v2643_v56, %v7260_v62  ;;  %v2731_v34 = vadd.f32 -0.001682827, %v2723_v0 }
 0x3e0   : > { %v2645_v4 = vmul.f32 %v2637_v30, %v7211_v55  ;;  %v2720_v8 = vmul.f32 %v2712_v40, %v7232_v31  ;;  %v2749_v45 = vmul.f32 %v2741_v7, %v7211_v55  ;;  %v2732_v22 = vadd.f32 -0.001682827, %v2724_v16 }
 0x3e1   : > { %v2654_v20 = vadd.f32 -0.00073499064, %v2646_v5  ;;  %v2657_v25 = vadd.f32 -0.00073499064, %v2649_v46  ;;  %v2737_v52 = vmul.f32 %v2729_v2, %v7246_v1  ;;  %v2738_v3 = vmul.f32 %v2730_v18, %v7254_v35 }
 0x3e2   : > { %v2727_v38 = vadd.f32 -0.001682827, %v2719_v21  ;;  %v2636_v57 = vmul.f32 %v2628_v9, %v7264_v58  ;;  %v2658_v60 = vadd.f32 -0.00073499064, %v2650_v53  ;;  %v2739_v24 = vmul.f32 %v2731_v34, %v7260_v62 }
 0x3e3   : > { %v2631_v14 = vmul.f32 %v2623_v32, %v7228_v63  ;;  %v2758_v28 = vadd.f32 -0.014264739, %v2750_v37  ;;  %v2659_v13 = vadd.f32 -0.00073499064, %v2651_v15  ;;  %v2745_v26 = vadd.f32 -0.0073733293, %v2737_v52 }
 0x3e4   : > { %v2757_v19 = vadd.f32 -0.014264739, %v2749_v45  ;;  %v2740_v36 = vmul.f32 %v2732_v22, %v7264_v58  ;;  %v2746_v59 = vadd.f32 -0.0073733293, %v2738_v3  ;;  %v2747_v56 = vadd.f32 -0.0073733293, %v2739_v24 }
 0x3e5   : > { %v2653_v0 = vadd.f32 -0.00073499064, %v2645_v4  ;;  %v2662_v30 = vmul.f32 %v2654_v20, %v7203_v27  ;;  %v2665_v40 = vmul.f32 %v2657_v25, %v7246_v1  ;;  %v2753_v7 = vmul.f32 %v2745_v26, %v7246_v1 }
 0x3e6   : > { %v2644_v16 = vadd.f32 -5.6925062e-05, %v2636_v57  ;;  %v2666_v5 = vmul.f32 %v2658_v60, %v7254_v35  ;;  %v2754_v46 = vmul.f32 %v2746_v59, %v7254_v35  ;;  %v2755_v2 = vmul.f32 %v2747_v56, %v7260_v62 }
 0x3e7   : > { %v2735_v18 = vmul.f32 %v2727_v38, %v7228_v63  ;;  %5212 = vrcp.f32 %v2758_v28  ;;  %v2667_v32 = vmul.f32 %v2659_v13, %v7260_v62  ;;  %v2761_v21 = vadd.f32 -0.014264739, %v2753_v7 }
 0x3e8   : > { %5214 = vrcp.f32 %v2757_v19  ;;  %v2748_v9 = vadd.f32 -0.0073733293, %v2740_v36  ;;  %v2762_v53 = vadd.f32 -0.014264739, %v2754_v46  ;;  %v2763_v37 = vadd.f32 -0.014264739, %v2755_v2 }
 0x3e9   : > { %v2661_v15 = vmul.f32 %v2653_v0, %v7211_v55  ;;  %v2670_v34 = vadd.f32 -0.0029546, %v2662_v30  ;;  %v2673_v4 = vadd.f32 -0.0029546, %v2665_v40  ;;  %5216 = vrcp.f32 %v2761_v21 }
 0x3ea   : > { %v2639_v45 = vadd.f32 -5.6925062e-05, %v2631_v14  ;;  %v2652_v22 = vmul.f32 %v2644_v16, %v7264_v58  ;;  %v2674_v20 = vadd.f32 -0.0029546, %v2666_v5  ;;  %5218 = vrcp.f32 %v2762_v53 }
 0x3eb   : > { %v2675_v25 = vadd.f32 -0.0029546, %v2667_v32  ;;  %5220 = vrcp.f32 %v2763_v37  ;;  %v2728_v52 = vadd.f32 -0.001682827, %v2720_v8  ;;  %v2743_v3 = vadd.f32 -0.0073733293, %v2735_v18 }
 0x3ec   : > { %v2756_v38 = vmul.f32 %v2748_v9, %v7264_v58  ;;  %v2669_v57 = vadd.f32 -0.0029546, %v2661_v15  ;;  %v2678_v60 = vmul.f32 %v2670_v34, %v7203_v27  ;;  %v2681_v24 = vmul.f32 %v2673_v4, %v7246_v1 }
 0x3ed   : > { %v2632_v28 = vmul.f32 %v2624_v50, %v7232_v31  ;;  %v2647_v13 = vmul.f32 %v2639_v45, %v7228_v63  ;;  %v2660_v14 = vadd.f32 -0.00073499064, %v2652_v22  ;;  %v2682_v26 = vmul.f32 %v2674_v20, %v7254_v35 }
 0x3ee   : > { %v2683_v19 = vmul.f32 %v2675_v25, %v7260_v62  ;;  %v2736_v36 = vmul.f32 %v2728_v52, %v7232_v31  ;;  %v2751_v8 = vmul.f32 %v2743_v3, %v7228_v63  ;;  %v2764_v59 = vadd.f32 -0.014264739, %v2756_v38 }
 0x3ef   : > { %v2677_v56 = vmul.f32 %v2669_v57, %v7211_v55  ;;  %v2686_v0 = vadd.f32 -0.016096033, %v2678_v60  ;;  %v2689_v27 = vadd.f32 -0.016096033, %v2681_v24  ;;  %v2640_v30 = vadd.f32 -5.6925062e-05, %v2632_v28 }
 0x3f0   : > { %v2655_v1 = vadd.f32 -0.00073499064, %v2647_v13  ;;  %v2668_v50 = vmul.f32 %v2660_v14, %v7264_v58  ;;  %v2690_v40 = vadd.f32 -0.016096033, %v2682_v26  ;;  %v2691_v7 = vadd.f32 -0.016096033, %v2683_v19 }
 0x3f1   : > { %v2744_v5 = vadd.f32 -0.0073733293, %v2736_v36  ;;  %v2759_v35 = vadd.f32 -0.014264739, %v2751_v8  ;;  %5222 = vrcp.f32 %v2764_v59  ;;  %v2685_v46 = vadd.f32 -0.016096033, %v2677_v56 }
 0x3f2   : > { %v2694_v2 = vmul.f32 %v7195_v23, %v2686_v0  ;;  %v2697_v18 = vmul.f32 %v7235_v33, %v2689_v27  ;;  %v2648_v55 = vmul.f32 %v2640_v30, %v7232_v31  ;;  %v2663_v21 = vmul.f32 %v2655_v1, %v7228_v63 }
 0x3f3   : > { %v2676_v9 = vadd.f32 -0.0029546, %v2668_v50  ;;  %v2698_v53 = vmul.f32 %v7239_v17, %v2690_v40  ;;  %v2699_v34 = vmul.f32 %v7248_v51, %v2691_v7  ;;  %v2752_v22 = vmul.f32 %v2744_v5, %v7232_v31 }
 0x3f4   : > { %v5213_v16 = vpop.eup %5212  ;;  %5224 = vrcp.f32 %v2759_v35  ;;  %v2561_v23 = vmul.f32 0.5, %v7205_v49  ;;  %v2693_v20 = vmul.f32 %v7197_v44, %v2685_v46  ;;  %v2562_v25 = vmul.f32 0.5, %v7207_v42 }
 0x3f5   : > { %v5215_v62 = vpop.eup %5214  ;;  %v2768_v15 = vmul.f32 %v5213_v16, %v2694_v2  ;;  %v2656_v38 = vadd.f32 -0.00073499064, %v2648_v55  ;;  %v2671_v17 = vadd.f32 -0.0029546, %v2663_v21  ;;  %v2684_v57 = vmul.f32 %v2676_v9, %v7264_v58  ;;  %v9308_v9 = vld [vmem:[#allocation16_spill] sm:$0xff] }
 0x3f6   : > { %v5217_v32 = vpop.eup %5216  ;;  %v2766_v51 = vmul.f32 %v5215_v62, %v2693_v20  ;;  %v2760_v13 = vadd.f32 -0.014264739, %v2752_v22  ;;  %v2558_v49 = vmul.f32 0.5, %v7181_v39  ;;  %v2563_v58 = vmul.f32 0.5, %v7218_v54 }
 0x3f7   : > { %v5219_v37 = vpop.eup %5218  ;;  %v2774_v4 = vmul.f32 %v5217_v32, %v2697_v18  ;;  %v2782_v24 = vadd.f32 1.0, %v2768_v15  ;;  %v2664_v44 = vmul.f32 %v2656_v38, %v7232_v31  ;;  %v2679_v42 = vmul.f32 %v2671_v17, %v7228_v63  ;;  %v7487_v32 = vld [vmem:[#allocation3 + $0x47] ss:$8 sm:$0xf] }
 0x3f8   : > { %v5221_v45 = vpop.eup %5220  ;;  %v2776_v33 = vmul.f32 %v5219_v37, %v2698_v53  ;;  %v2692_v19 = vadd.f32 -0.016096033, %v2684_v57  ;;  %v2781_v36 = vadd.f32 1.0, %v2766_v51  ;;  %5226 = vrcp.f32 %v2760_v13  ;;  %v7491_v55 = vld [vmem:[#allocation3 + $0x5] ss:$8 sm:$0xf] }
 0x3f9   : > { %v2778_v52 = vmul.f32 %v5221_v45, %v2699_v34  ;;  %v2785_v3 = vadd.f32 1.0, %v2774_v4  ;;  %v7353_v8 = vmul.f32 %v2782_v24, %v2558_v49  ;;  %v2557_v56 = vmul.f32 0.5, %v7183_v11  ;;  %v9309_v37 = vld [vmem:[#allocation17_spill] sm:$0xff] }
 0x3fa   : > { %v2786_v60 = vadd.f32 1.0, %v2776_v33  ;;  %v2672_v0 = vadd.f32 -0.0029546, %v2664_v44  ;;  %v2687_v63 = vadd.f32 -0.016096033, %v2679_v42  ;;  %v2700_v54 = vmul.f32 %v7250_v61, %v2692_v19 }
 0x3fb   : > { %v7341_v28 = vmul.f32 %v2785_v3, %v2561_v23  ;;  %v2787_v14 = vadd.f32 1.0, %v2778_v52  ;;  %v7363_v27 = vmul.f32 %v2781_v36, %v2557_v56  ;;  %v2564_v16 = vmul.f32 0.5, %v7221_v6  ;;  %v3259_v52 = vld [vmem:[#allocation3 + $0x7] ss:$8 sm:$0xf] }
 0x3fc   : > { %v7343_v26 = vmul.f32 %v2786_v60, %v2562_v25  ;;  %v2680_v50 = vmul.f32 %v2672_v0, %v7232_v31  ;;  %v2695_v11 = vmul.f32 %v7213_v48, %v2687_v63  ;;  %v2559_v48 = vmul.f32 0.5, %v7190_v47 }
 0x3fd   : > { %3113 = vrot.lane.b32.xlu0 %v7341_v28, %s5425_s16  ;;  %v7355_v59 = vmul.f32 %v2787_v14, %v2563_v58  ;;  %v2560_v47 = vmul.f32 0.5, %v7193_v29  ;;  %v3148_v21 = vrot.slane %v7491_v55, %v5763_v12  ;;  %v4062_v53 = vrot.slane %v7487_v32, %v9308_v9 }
 0x3fe   : > { %3117 = vrot.lane.b32.xlu1 %v7343_v26, %s5425_s16  ;;  %v5223_v39 = vpop.eup %5222  ;;  %v2688_v61 = vadd.f32 -0.016096033, %v2680_v50  ;;  %v4058_v15 = vrot.slane %v7487_v32, %v9309_v37  ;;  %v3268_v38 = vrot.slane %v3259_v52, %v9308_v9  ;;  %v3264_v24 = vrot.slane %v3259_v52, %v9309_v37 }
 0x3ff   : > { %v2780_v30 = vmul.f32 %v5223_v39, %v2700_v54 }
 0x400   : > { %v2696_v62 = vmul.f32 %v7215_v41, %v2688_v61  ;;  %v7592_v61 = vld [vmem:[#allocation3 + $0x4] ss:$8 sm:$0xf] }
 0x401   : > { %3115 = vrot.lane.b32.xlu0 %v7353_v8, %s5425_s16  ;;  %v5225_v1 = vpop.eup %5224  ;;  %v2788_v7 = vadd.f32 1.0, %v2780_v30 }
 0x402   : > { %3121 = vrot.lane.b32.xlu1 %v7355_v59, %s5425_s16  ;;  %v2770_v40 = vmul.f32 %v5225_v1, %v2695_v11  ;;  %v7581_v11 = vld [vmem:[#allocation3 + $0x46] ss:$8 sm:$0xf] }
 0x403   : > { %v7376_v35 = vmul.f32 %v2788_v7, %v2564_v16 }
 0x404   : > { %v2783_v5 = vadd.f32 1.0, %v2770_v40 }
 0x405   : > { %3235 = vrot.lane.b32.xlu0 %v7363_v27, %s5426_s19  ;;  %v5227_v31 = vpop.eup %5226 }
 0x406   : > { %3237 = vrot.lane.b32.xlu1 %v7341_v28, %s5426_s19  ;;  %v2772_v46 = vmul.f32 %v5227_v31, %v2696_v62  ;;  %v7384_v2 = vmul.f32 %v2783_v5, %v2559_v48  ;;  %v3086_v5 = vrot.slane %v7592_v61, %v5763_v12  ;;  %v4024_v31 = vrot.slane %v7581_v11, %v9308_v9 }
 0x407   : > { %v4020_v48 = vrot.slane %v7581_v11, %v9309_v37 }
 0x408   : > { %9302 = vst [vmem:[#allocation39_spill] sm:$0xff] %v7384_v2  ;;  %v2784_v6 = vadd.f32 1.0, %v2772_v46  ;;  %v7603_v46 = vld [vmem:[#allocation3 + $0x6] ss:$8 sm:$0xf] }
 0x409   : > { %3111 = vrot.lane.b32.xlu0 %v7363_v27, %s5425_s16  ;;  %9319 = vst [vmem:[#allocation31_spill] sm:$0xff] %v7603_v46  ;;  %v3202_v52 = vrot.slane %v7603_v46, %v9309_v37 }
 0x40a   : > { %3241 = vrot.lane.b32.xlu1 %v7343_v26, %s5426_s19  ;;  %v7395_v41 = vmul.f32 %v2784_v6, %v2560_v47 }
 0x40d   : > { %3055 = vrot.lane.b32.xlu0 %v7343_v26, %s9301_s26 }
 0x40e   : > { %3249 = vrot.lane.b32.xlu1 %v7376_v35, %s5426_s19 }
 0x411   : > { %3175 = vrot.lane.b32.xlu0 %v7341_v28, %s9303_s29 }
 0x412   : > { %3119 = vrot.lane.b32.xlu1 %v7384_v2, %s5425_s16 }
 0x415   : > { %3051 = vrot.lane.b32.xlu0 %v7341_v28, %s9301_s26 }
 0x416   : > { %3239 = vrot.lane.b32.xlu1 %v7353_v8, %s5426_s19 }
 0x419   : > { %3053 = vrot.lane.b32.xlu0 %v7353_v8, %s9301_s26 }
 0x41a   : > { %3247 = vrot.lane.b32.xlu1 %v7395_v41, %s5426_s19 }
 0x41d   : > { %3173 = vrot.lane.b32.xlu0 %v7363_v27, %s9303_s29 }
 0x41e   : > { %3059 = vrot.lane.b32.xlu1 %v7355_v59, %s9301_s26 }
 0x421   : > { %3049 = vrot.lane.b32.xlu0 %v7363_v27, %s9301_s26 }
 0x422   : > { %3179 = vrot.lane.b32.xlu1 %v7343_v26, %s9303_s29 }
 0x425   : > { %2993 = vrot.lane.b32.xlu0 %v7343_v26, %s9304_s30 }
 0x426   : > { %3187 = vrot.lane.b32.xlu1 %v7376_v35, %s9303_s29 }
 0x429   : > { %2989 = vrot.lane.b32.xlu0 %v7341_v28, %s9304_s30 }
 0x42a   : > { %3057 = vrot.lane.b32.xlu1 %v7384_v2, %s9301_s26 }
 0x42d   : > { %2991 = vrot.lane.b32.xlu0 %v7353_v8, %s9304_s30 }
 0x42e   : > { %3177 = vrot.lane.b32.xlu1 %v7353_v8, %s9303_s29 }
 0x431   : > { %2987 = vrot.lane.b32.xlu0 %v7363_v27, %s9304_s30 }
 0x432   : > { %3185 = vrot.lane.b32.xlu1 %v7395_v41, %s9303_s29 }
 0x435   : > { %2931 = vrot.lane.b32.xlu0 %v7343_v26, %s9305_s23 }
 0x436   : > { %2997 = vrot.lane.b32.xlu1 %v7355_v59, %s9304_s30 }
 0x439   : > { %2927 = vrot.lane.b32.xlu0 %v7341_v28, %s9305_s23 }
 0x43a   : > { %3125 = vrot.lane.b32.xlu1 %v7376_v35, %s5425_s16 }
 0x43d   : > { %2929 = vrot.lane.b32.xlu0 %v7353_v8, %s9305_s23 }
 0x43e   : > { %2995 = vrot.lane.b32.xlu1 %v7384_v2, %s9304_s30 }
 0x441   : > { %2925 = vrot.lane.b32.xlu0 %v7363_v27, %s9305_s23 }
 0x442   : > { %3123 = vrot.lane.b32.xlu1 %v7395_v41, %s5425_s16  ;;  %s9307_s16 = smov 73  }
 0x445   : > { %2869 = vrot.lane.b32.xlu0 %v7343_v26, %s9306_s17 }
 0x446   : > { %2935 = vrot.lane.b32.xlu1 %v7355_v59, %s9305_s23 }
 0x449   : > { %2865 = vrot.lane.b32.xlu0 %v7341_v28, %s9306_s17 }
 0x44a   : > { %3063 = vrot.lane.b32.xlu1 %v7376_v35, %s9301_s26 }
 0x44d   : > { %2867 = vrot.lane.b32.xlu0 %v7353_v8, %s9306_s17 }
 0x44e   : > { %2933 = vrot.lane.b32.xlu1 %v7384_v2, %s9305_s23 }
 0x451   : > { %2863 = vrot.lane.b32.xlu0 %v7363_v27, %s9306_s17 }
 0x452   : > { %3061 = vrot.lane.b32.xlu1 %v7395_v41, %s9301_s26  ;;  %s9326_s26 = smov 127  }
 0x455   : > { %2807 = vrot.lane.b32.xlu0 %v7343_v26, %s9307_s16 }
 0x456   : > { %2873 = vrot.lane.b32.xlu1 %v7355_v59, %s9306_s17 }
 0x459   : > { %2803 = vrot.lane.b32.xlu0 %v7341_v28, %s9307_s16 }
 0x45a   : > { %3001 = vrot.lane.b32.xlu1 %v7376_v35, %s9304_s30 }
 0x45d   : > { %2805 = vrot.lane.b32.xlu0 %v7353_v8, %s9307_s16 }
 0x45e   : > { %2871 = vrot.lane.b32.xlu1 %v7384_v2, %s9306_s17 }
 0x461   : > { %2801 = vrot.lane.b32.xlu0 %v7363_v27, %s9307_s16 }
 0x462   : > { %2999 = vrot.lane.b32.xlu1 %v7395_v41, %s9304_s30  ;;  %s9344_s30 = smov 7  }
 0x465   : > { %3807 = vrot.lane.b32.xlu0 %v7343_v26, %s5433_s18 }
 0x466   : > { %2811 = vrot.lane.b32.xlu1 %v7355_v59, %s9307_s16 }
 0x469   : > { %2877 = vrot.lane.b32.xlu0 %v7376_v35, %s9306_s17 }
 0x46a   : > { %2939 = vrot.lane.b32.xlu1 %v7376_v35, %s9305_s23 }
 0x46d   : > { %3805 = vrot.lane.b32.xlu0 %v7353_v8, %s5433_s18 }
 0x46e   : > { %2809 = vrot.lane.b32.xlu1 %v7384_v2, %s9307_s16 }
 0x46f   : > { %v7485_v29 = vpop.permute.xlu0 %3113 }
 0x470   : > { %v3118_v18 = vpop.permute.xlu1 %3117 }
 0x471   : > { %2875 = vrot.lane.b32.xlu0 %v7395_v41, %s9306_s17  ;;  %v7504_v4 = vsel %vm805_vm0, %v7485_v29, %v3118_v18 }
 0x472   : > { %2937 = vrot.lane.b32.xlu1 %v7395_v41, %s9305_s23  ;;  %v4079_v20 = vmul.f32 %v4058_v15, %v7504_v4  ;;  %s9356_s23 = smov 9  }
 0x473   : > { %v3116_v34 = vpop.permute.xlu0 %3115 }
 0x474   : > { %v7506_v45 = vpop.permute.xlu1 %3121 }
 0x475   : > { %9310 = vst [vmem:[#allocation25_spill] sm:$0xff] %v7506_v45  ;;  %v3130_v22 = vsel %vm805_vm0, %v3118_v18, %v7506_v45  ;;  %3745 = vrot.lane.b32.xlu0 %v7343_v26, %s9311_s27 }
 0x476   : > { %v7513_v23 = vmul.f32 %v3148_v21, %v3130_v22  ;;  %3811 = vrot.lane.b32.xlu1 %v7355_v59, %s5433_s18  ;;  %v4080_v33 = vmul.f32 %v4062_v53, %v3130_v22 }
 0x477   : > { %v3236_v25 = vpop.permute.xlu0 %3235 }
 0x478   : > { %9312 = vst [vmem:[#allocation19_spill] sm:$0xff] %v7513_v23  ;;  %4512 = vmatprep.subr.mxu1 %v4080_v33  ;;  %v3238_v3 = vpop.permute.xlu1 %3237 }
 0x479   : > { %4513 = vmatpush1.msra.mxu1 %v4079_v20  ;;  %2815 = vrot.lane.b32.xlu0 %v7376_v35, %s9307_s16 }
 0x47a   : > { %3803 = vrot.lane.b32.xlu1 %v7341_v28, %s5433_s18 }
 0x47b   : > { %v7523_v17 = vpop.permute.xlu0 %3111 }
 0x47c   : > { %v7525_v57 = vpop.permute.xlu1 %3241  ;;  %v7553_v58 = vsel %vm805_vm0, %v7523_v17, %v3116_v34 }
 0x47d   : > { %v7530_v60 = vsel %vm933_vm1, %v3238_v3, %v7525_v57  ;;  %3743 = vrot.lane.b32.xlu0 %v7353_v8, %s9311_s27  ;;  %v4075_v0 = vmul.f32 %v4058_v15, %v7553_v58  ;;  %v3206_v15 = vrot.slane %v7603_v46, %v9308_v9 }
 0x47e   : > { %3809 = vrot.lane.b32.xlu1 %v7384_v2, %s5433_s18  ;;  %v3286_v51 = vmul.f32 %v3268_v38, %v7530_v60 }
 0x47f   : > { %v3056_v13 = vpop.permute.xlu0 %3055 }
 0x480   : > { %4435 = vmatprep.subr.mxu0 %v3286_v51  ;;  %v7538_v14 = vpop.permute.xlu1 %3249 }
 0x481   : > { %v7543_v49 = vsel %vm933_vm1, %v7538_v14, %v3238_v3  ;;  %2813 = vrot.lane.b32.xlu0 %v7395_v41, %s9307_s16 }
 0x482   : > { %9313 = vst [vmem:[#allocation44_spill] sm:$0xff] %v7543_v49  ;;  %v3285_v44 = vmul.f32 %v3264_v24, %v7543_v49  ;;  %3801 = vrot.lane.b32.xlu1 %v7363_v27, %s5433_s18  ;;  %v3140_v49 = vrot.slane %v7491_v55, %v9309_v37 }
 0x483   : > { %v3176_v42 = vpop.permute.xlu0 %3175 }
 0x484   : > { %4436 = vmatpush1.msra.mxu0 %v3285_v44  ;;  %v7555_v19 = vpop.permute.xlu1 %3119 }
 0x485   : > { %9314 = vst [vmem:[#allocation28_spill] sm:$0xff] %v7555_v19  ;;  %v3129_v36 = vsel %vm805_vm0, %v3116_v34, %v7555_v19  ;;  %3303 = vrot.lane.b32.xlu0 %v7343_v26, %s9315_s20 }
 0x486   : > { %v7562_v39 = vmul.f32 %v3148_v21, %v3129_v36  ;;  %3749 = vrot.lane.b32.xlu1 %v7355_v59, %s9311_s27  ;;  %v4076_v56 = vmul.f32 %v4062_v53, %v3129_v36 }
 0x487   : > { %v7567_v63 = vpop.permute.xlu0 %3051 }
 0x488   : > { %9316 = vst [vmem:[#allocation21_spill] sm:$0xff] %v7562_v39  ;;  %4514 = vmatprep.subr.mxu1 %v4076_v56  ;;  %v7569_v54 = vpop.permute.xlu1 %3239  ;;  %v7608_v6 = vsel %vm741_vm2, %v7567_v63, %v3056_v13 }
 0x489   : > { %v7574_v30 = vsel %vm933_vm1, %v3236_v25, %v7569_v54  ;;  %4515 = vmatpush1.msra.mxu1 %v4075_v0  ;;  %3683 = vrot.lane.b32.xlu0 %v7343_v26, %s9317_s15  ;;  %v4041_v34 = vmul.f32 %v4020_v48, %v7608_v6 }
 0x48a   : > { %3741 = vrot.lane.b32.xlu1 %v7341_v28, %s9311_s27  ;;  %v3282_v1 = vmul.f32 %v3268_v38, %v7574_v30 }
 0x48b   : > { %v3054_v50 = vpop.permute.xlu0 %3053 }
 0x48c   : > { %4437 = vmatprep.subr.mxu0 %v3282_v1  ;;  %v7583_v40 = vpop.permute.xlu1 %3247 }
 0x48d   : > { %v7588_v7 = vsel %vm933_vm1, %v7583_v40, %v3236_v25  ;;  %3299 = vrot.lane.b32.xlu0 %v7341_v28, %s9315_s20 }
 0x48e   : > { %9318 = vst [vmem:[#allocation48_spill] sm:$0xff] %v7588_v7  ;;  %v3281_v16 = vmul.f32 %v3264_v24, %v7588_v7  ;;  %3747 = vrot.lane.b32.xlu1 %v7384_v2, %s9311_s27 }
 0x48f   : > { %v3174_v62 = vpop.permute.xlu0 %3173 }
 0x490   : > { %4438 = vmatpush1.msra.mxu0 %v3281_v16  ;;  %v7610_v47 = vpop.permute.xlu1 %3059 }
 0x491   : > { %9320 = vst [vmem:[#allocation23_spill] sm:$0xff] %v7610_v47  ;;  %v3068_v18 = vsel %vm741_vm2, %v3056_v13, %v7610_v47  ;;  %3301 = vrot.lane.b32.xlu0 %v7353_v8, %s9315_s20 }
 0x492   : > { %v7617_v21 = vmul.f32 %v3086_v5, %v3068_v18  ;;  %3739 = vrot.lane.b32.xlu1 %v7363_v27, %s9311_s27  ;;  %v4042_v53 = vmul.f32 %v4024_v31, %v3068_v18 }
 0x493   : > { %v7624_v22 = vpop.permute.xlu0 %3049 }
 0x494   : > { %9321 = vst [vmem:[#allocation34_spill] sm:$0xff] %v7617_v21  ;;  %4516 = vmatprep.subr.mxu1 %v4042_v53  ;;  %v7626_v33 = vpop.permute.xlu1 %3179  ;;  %v7657_v44 = vsel %vm741_vm2, %v7624_v22, %v3054_v50 }
 0x495   : > { %v7631_v20 = vsel %vm869_vm3, %v3176_v42, %v7626_v33  ;;  %4517 = vmatpush1.msra.mxu1 %v4041_v34  ;;  %3681 = vrot.lane.b32.xlu0 %v7353_v8, %s9317_s15  ;;  %v4037_v1 = vmul.f32 %v4020_v48, %v7657_v44  ;;  %v7687_v48 = vld [vmem:[#allocation3 + $0x45] ss:$8 sm:$0xf] }
 0x496   : > { %3307 = vrot.lane.b32.xlu1 %v7355_v59, %s9315_s20  ;;  %v3224_v25 = vmul.f32 %v3206_v15, %v7631_v20 }
 0x497   : > { %v2994_v3 = vpop.permute.xlu0 %2993 }
 0x498   : > { %4439 = vmatprep.subr.mxu0 %v3224_v25  ;;  %v7640_v38 = vpop.permute.xlu1 %3187 }
 0x499   : > { %9322 = vst [vmem:[#allocation26_spill] sm:$0xff] %v7640_v38  ;;  %v7645_v51 = vsel %vm869_vm3, %v7640_v38, %v3176_v42  ;;  %3297 = vrot.lane.b32.xlu0 %v7363_v27, %s9315_s20 }
 0x49a   : > { %9323 = vst [vmem:[#allocation37_spill] sm:$0xff] %v7645_v51  ;;  %v3223_v24 = vmul.f32 %v3202_v52, %v7645_v51  ;;  %3687 = vrot.lane.b32.xlu1 %v7355_v59, %s9317_s15 }
 0x49b   : > { %v7652_v13 = vpop.permute.xlu0 %2989 }
 0x49c   : > { %4440 = vmatpush1.msra.mxu0 %v3223_v24  ;;  %v7659_v36 = vpop.permute.xlu1 %3057  ;;  %v7698_v24 = vld [vmem:[#allocation3 + $0x3] ss:$8 sm:$0xf]  ;;  %v7713_v51 = vsel %vm9330_vm8, %v7652_v13, %v2994_v3  ;;  %vm9337_vm8 = vmmov %vm9332_vm4 }
 0x49d   : > { %9324 = vst [vmem:[#allocation29_spill] sm:$0xff] %v7659_v36  ;;  %v3067_v42 = vsel %vm741_vm2, %v3054_v50, %v7659_v36  ;;  %3245 = vrot.lane.b32.xlu0 %v7355_v59, %s5426_s19  ;;  %9329 = vst [vmem:[#allocation35_spill] sm:$0xff] %v7698_v24 }
 0x49e   : > { %v7666_v56 = vmul.f32 %v3086_v5, %v3067_v42  ;;  %3679 = vrot.lane.b32.xlu1 %v7341_v28, %s9317_s15  ;;  %v4038_v0 = vmul.f32 %v4024_v31, %v3067_v42  ;;  %v3144_v31 = vrot.slane %v7491_v55, %v9308_v9  ;;  %v3024_v42 = vrot.slane %v7698_v24, %v5763_v12 }
 0x49f   : > { %v2992_v16 = vpop.permute.xlu0 %2991 }
 0x4a0   : > { %9325 = vst [vmem:[#allocation41_spill] sm:$0xff] %v7666_v56  ;;  %4518 = vmatprep.subr.mxu1 %v4038_v0  ;;  %v7671_v18 = vpop.permute.xlu1 %3177  ;;  %v3986_v0 = vrot.slane %v7687_v48, %v9308_v9  ;;  %v3158_v21 = vmul.f32 %v3144_v31, %v7553_v58 }
 0x4a1   : > { %v7676_v53 = vsel %vm869_vm3, %v3174_v62, %v7671_v18  ;;  %4519 = vmatpush1.msra.mxu1 %v4037_v1  ;;  %3625 = vrot.lane.b32.xlu0 %v7355_v59, %s9326_s26 }
 0x4a2   : > { %3305 = vrot.lane.b32.xlu1 %v7384_v2, %s9315_s20  ;;  %v3220_v50 = vmul.f32 %v3206_v15, %v7676_v53 }
 0x4a3   : > { %v7683_v5 = vpop.permute.xlu0 %2987 }
 0x4a4   : > { %4441 = vmatprep.subr.mxu0 %v3220_v50  ;;  %v7689_v34 = vpop.permute.xlu1 %3185  ;;  %v3162_v50 = vmul.f32 %v3144_v31, %v7504_v4 }
 0x4a5   : > { %9327 = vst [vmem:[#allocation32_spill] sm:$0xff] %v7689_v34  ;;  %v7694_v25 = vsel %vm869_vm3, %v7689_v34, %v3174_v62  ;;  %3243 = vrot.lane.b32.xlu0 %v7384_v2, %s5426_s19  ;;  %v3982_v62 = vrot.slane %v7687_v48, %v9309_v37  ;;  %s9338_s19 = smov 1  }
 0x4a6   : > { %9328 = vst [vmem:[#allocation46_spill] sm:$0xff] %v7694_v25  ;;  %v3219_v15 = vmul.f32 %v3202_v52, %v7694_v25  ;;  %3685 = vrot.lane.b32.xlu1 %v7384_v2, %s9317_s15 }
 0x4a7   : > { %v2932_v1 = vpop.permute.xlu0 %2931 }
 0x4a8   : > { %4442 = vmatpush1.msra.mxu0 %v3219_v15  ;;  %v7715_v52 = vpop.permute.xlu1 %2997  ;;  %v4003_v15 = vmul.f32 %v3982_v62, %v7713_v51 }
 0x4a9   : > { %9331 = vst [vmem:[#allocation38_spill] sm:$0xff] %v7715_v52  ;;  %v3006_v25 = vsel %vm9332_vm4, %v2994_v3, %v7715_v52  ;;  %4443 = vmatprep.subr.mxu0 %v3162_v50  ;;  %3623 = vrot.lane.b32.xlu0 %v7384_v2, %s9326_s26  ;;  %v4070_v3 = vrot.slane %v7487_v32, %v5987_v43 }
 0x4aa   : > { %v7722_v7 = vmul.f32 %v3024_v42, %v3006_v25  ;;  %3677 = vrot.lane.b32.xlu1 %v7363_v27, %s9317_s15  ;;  %v4004_v4 = vmul.f32 %v3986_v0, %v3006_v25 }
 0x4ab   : > { %v7729_v56 = vpop.permute.xlu0 %2927 }
 0x4ac   : > { %9333 = vst [vmem:[#allocation42_spill] sm:$0xff] %v7722_v7  ;;  %4520 = vmatprep.subr.mxu1 %v4004_v4  ;;  %v7733_v50 = vpop.permute.xlu1 %3125  ;;  %v7749_v4 = vsel %vm9332_vm4, %v7683_v5, %v2992_v16 }
 0x4ad   : > { %9334 = vst [vmem:[#allocation47_spill] sm:$0xff] %v7733_v50  ;;  %v3134_v7 = vsel %vm805_vm0, %v7733_v50, %v7485_v29  ;;  %4521 = vmatpush1.msra.mxu1 %v4003_v15  ;;  %3183 = vrot.lane.b32.xlu0 %v7355_v59, %s9303_s29 }
 0x4ae   : > { %v3161_v55 = vmul.f32 %v3140_v49, %v3134_v7  ;;  %3621 = vrot.lane.b32.xlu1 %v7343_v26, %s9326_s26  ;;  %v7744_v32 = vmul.f32 %v4070_v3, %v3134_v7  ;;  %v3999_v7 = vmul.f32 %v3982_v62, %v7749_v4 }
 0x4af   : > { %v2930_v25 = vpop.permute.xlu0 %2929 }
 0x4b0   : > { %9335 = vst [vmem:[#allocation74_spill] sm:$0xff] %v7744_v32  ;;  %4444 = vmatpush1.msra.mxu0 %v3161_v55  ;;  %v7751_v29 = vpop.permute.xlu1 %2995  ;;  %v3082_v55 = vrot.slane %v7592_v61, %v9308_v9  ;;  %v7767_v32 = vld [vmem:[#allocation3 + $0x44] ss:$8 sm:$0xf] }
 0x4b1   : > { %9336 = vst [vmem:[#allocation72_spill] sm:$0xff] %v7751_v29  ;;  %v3005_v15 = vsel %vm9337_vm8, %v2992_v16, %v7751_v29  ;;  %4445 = vmatprep.subr.mxu0 %v3158_v21  ;;  %3547 = vrot.lane.b32.xlu0 %v7341_v28, %s9338_s19  ;;  %vm9355_vm8 = vmmov %vm9332_vm4 }
 0x4b2   : > { %v7758_v39 = vmul.f32 %v3024_v42, %v3005_v15  ;;  %3617 = vrot.lane.b32.xlu1 %v7341_v28, %s9326_s26  ;;  %v4000_v58 = vmul.f32 %v3986_v0, %v3005_v15  ;;  %v7777_v42 = vld [vmem:[#allocation3 + $0x2] ss:$8 sm:$0xf]  ;;  %v3948_v15 = vrot.slane %v7767_v32, %v9308_v9 }
 0x4b3   : > { %v7763_v31 = vpop.permute.xlu0 %2925  ;;  %v2962_v62 = vrot.slane %v7777_v42, %v5763_v12  ;;  %v2966_v45 = vrot.slane %v7777_v42, %v5987_v43 }
 0x4b4   : > { %9339 = vst [vmem:[#allocation27_spill] sm:$0xff] %v7758_v39  ;;  %4522 = vmatprep.subr.mxu1 %v4000_v58  ;;  %v7769_v21 = vpop.permute.xlu1 %3123  ;;  %v4208_v58 = vld [vmem:[#allocation8 + $0x18] sm:$0xff]  ;;  %v3100_v39 = vmul.f32 %v3082_v55, %v7608_v6 }
 0x4b5   : > { %9340 = vst [vmem:[#allocation76_spill] sm:$0xff] %v7769_v21  ;;  %v3133_v16 = vsel %vm805_vm0, %v7769_v21, %v7523_v17  ;;  %4523 = vmatpush1.msra.mxu1 %v3999_v7  ;;  %3559 = vrot.lane.b32.xlu0 %v7376_v35, %s9338_s19  ;;  %v3944_v17 = vrot.slane %v7767_v32, %v9309_v37 }
 0x4b6   : > { %v3157_v0 = vmul.f32 %v3140_v49, %v3133_v16  ;;  %3619 = vrot.lane.b32.xlu1 %v7353_v8, %s9326_s26  ;;  %5092 = vmatprep.mubr.msk.f32.mxu1 %vm2140_vm6, %v4208_v58  ;;  %v7789_v29 = vmul.f32 %v4070_v3, %v3133_v16  ;;  %v7794_v49 = vsel %vm613_vm5, %v7729_v56, %v2932_v1 }
 0x4b7   : > { %v2870_v7 = vpop.permute.xlu0 %2869  ;;  %v3078_v16 = vrot.slane %v7592_v61, %v9309_v37 }
 0x4b8   : > { %9341 = vst [vmem:[#allocation75_spill] sm:$0xff] %v7789_v29  ;;  %4446 = vmatpush1.msra.mxu0 %v3157_v0  ;;  %v7796_v52 = vpop.permute.xlu1 %2935  ;;  %v3965_v0 = vmul.f32 %v3944_v17, %v7794_v49 }
 0x4b9   : > { %v2944_v23 = vsel %vm613_vm5, %v2932_v1, %v7796_v52  ;;  %4447 = vmatprep.subr.mxu0 %v3100_v39  ;;  %3549 = vrot.lane.b32.xlu0 %v7353_v8, %s9338_s19  ;;  %v4032_v1 = vrot.slane %v7581_v11, %v5987_v43 }
 0x4ba   : > { %v7803_v6 = vmul.f32 %v2962_v62, %v2944_v23  ;;  %3615 = vrot.lane.b32.xlu1 %v7363_v27, %s9326_s26  ;;  %v3966_v3 = vmul.f32 %v3948_v15, %v2944_v23 }
 0x4bb   : > { %v7810_v58 = vpop.permute.xlu0 %2865 }
 0x4bc   : > { %9342 = vst [vmem:[#allocation77_spill] sm:$0xff] %v7803_v6  ;;  %4524 = vmatprep.subr.mxu1 %v3966_v3  ;;  %v7814_v39 = vpop.permute.xlu1 %3063  ;;  %v3096_v6 = vmul.f32 %v3082_v55, %v7657_v44  ;;  %v7830_v3 = vsel %vm613_vm5, %v7763_v31, %v2930_v25 }
 0x4bd   : > { %9343 = vst [vmem:[#allocation30_spill] sm:$0xff] %v7814_v39  ;;  %v3072_v29 = vsel %vm741_vm2, %v7814_v39, %v7567_v63  ;;  %4525 = vmatpush1.msra.mxu1 %v3965_v0  ;;  %3485 = vrot.lane.b32.xlu0 %v7341_v28, %s9344_s30 }
 0x4be   : > { %v3099_v23 = vmul.f32 %v3078_v16, %v3072_v29  ;;  %3181 = vrot.lane.b32.xlu1 %v7384_v2, %s9303_s29  ;;  %v7825_v11 = vmul.f32 %v4032_v1, %v3072_v29  ;;  %v3961_v29 = vmul.f32 %v3944_v17, %v7830_v3  ;;  %s9349_s29 = smov 8  }
 0x4bf   : > { %v2868_v61 = vpop.permute.xlu0 %2867 }
 0x4c0   : > { %9345 = vst [vmem:[#allocation78_spill] sm:$0xff] %v7825_v11  ;;  %4448 = vmatpush1.msra.mxu0 %v3099_v23  ;;  %v7832_v63 = vpop.permute.xlu1 %2933  ;;  %v3020_v23 = vrot.slane %v7698_v24, %v9308_v9  ;;  %v7848_v11 = vld [vmem:[#allocation3 + $0x43] ss:$8 sm:$0xf] }
 0x4c1   : > { %v2943_v0 = vsel %vm613_vm5, %v2930_v25, %v7832_v63  ;;  %4449 = vmatprep.subr.mxu0 %v3096_v6  ;;  %3497 = vrot.lane.b32.xlu0 %v7376_v35, %s9344_s30 }
 0x4c2   : > { %v7839_v36 = vmul.f32 %v2962_v62, %v2943_v0  ;;  %3551 = vrot.lane.b32.xlu1 %v7343_v26, %s9338_s19  ;;  %v3962_v44 = vmul.f32 %v3948_v15, %v2943_v0  ;;  %v7858_v15 = vld [vmem:[#allocation3 + $0x1] ss:$8 sm:$0xf]  ;;  %v3910_v0 = vrot.slane %v7848_v11, %v9308_v9 }
 0x4c3   : > { %v7844_v55 = vpop.permute.xlu0 %2863  ;;  %v2900_v6 = vrot.slane %v7858_v15, %v5763_v12  ;;  %v2904_v21 = vrot.slane %v7858_v15, %v5987_v43 }
 0x4c4   : > { %9346 = vst [vmem:[#allocation33_spill] sm:$0xff] %v7839_v36  ;;  %4526 = vmatprep.subr.mxu1 %v3962_v44  ;;  %v7850_v25 = vpop.permute.xlu1 %3061  ;;  %v3906_v44 = vrot.slane %v7848_v11, %v9309_v37 }
 0x4c5   : > { %9347 = vst [vmem:[#allocation43_spill] sm:$0xff] %v7850_v25  ;;  %v3071_v62 = vsel %vm741_vm2, %v7850_v25, %v7624_v22  ;;  %4527 = vmatpush1.msra.mxu1 %v3961_v29  ;;  %3487 = vrot.lane.b32.xlu0 %v7353_v8, %s9344_s30  ;;  %v3038_v29 = vmul.f32 %v3020_v23, %v7713_v51 }
 0x4c6   : > { %v3095_v17 = vmul.f32 %v3078_v16, %v3071_v62  ;;  %3545 = vrot.lane.b32.xlu1 %v7363_v27, %s9338_s19  ;;  %v7869_v36 = vmul.f32 %v4032_v1, %v3071_v62  ;;  %v7874_v16 = vsel %vm549_vm7, %v7810_v58, %v2870_v7  ;;  %v3016_v1 = vrot.slane %v7698_v24, %v9309_v37 }
 0x4c7   : > { %v2808_v22 = vpop.permute.xlu0 %2807  ;;  %v3927_v62 = vmul.f32 %v3906_v44, %v7874_v16  ;;  %v7912_v24 = vsel %vm549_vm7, %v7844_v55, %v2868_v61 }
 0x4c8   : > { %9348 = vst [vmem:[#allocation36_spill] sm:$0xff] %v7869_v36  ;;  %4450 = vmatpush1.msra.mxu0 %v3095_v17  ;;  %v7876_v25 = vpop.permute.xlu1 %2873 }
 0x4c9   : > { %v2882_v47 = vsel %vm549_vm7, %v2870_v7, %v7876_v25  ;;  %4451 = vmatprep.subr.mxu0 %v3038_v29  ;;  %3423 = vrot.lane.b32.xlu0 %v7341_v28, %s9349_s29  ;;  %v3994_v7 = vrot.slane %v7687_v48, %v5987_v43  ;;  %v3034_v48 = vmul.f32 %v3020_v23, %v7749_v4 }
 0x4ca   : > { %v7883_v39 = vmul.f32 %v2900_v6, %v2882_v47  ;;  %3557 = vrot.lane.b32.xlu1 %v7395_v41, %s9338_s19  ;;  %v3928_v51 = vmul.f32 %v3910_v0, %v2882_v47  ;;  %v3923_v4 = vmul.f32 %v3906_v44, %v7912_v24 }
 0x4cb   : > { %v7890_v17 = vpop.permute.xlu0 %2803 }
 0x4cc   : > { %9350 = vst [vmem:[#allocation63_spill] sm:$0xff] %v7883_v39  ;;  %4528 = vmatprep.subr.mxu1 %v3928_v51  ;;  %v7894_v29 = vpop.permute.xlu1 %3001 }
 0x4cd   : > { %9351 = vst [vmem:[#allocation40_spill] sm:$0xff] %v7894_v29  ;;  %v3010_v36 = vsel %vm9332_vm4, %v7894_v29, %v7652_v13  ;;  %4529 = vmatpush1.msra.mxu1 %v3927_v62  ;;  %3435 = vrot.lane.b32.xlu0 %v7376_v35, %s9349_s29  ;;  %vm9358_vm4 = vcmp.lt.s32.totalorder %v5753_v10, 73 }
 0x4ce   : > { %v3037_v47 = vmul.f32 %v3016_v1, %v3010_v36  ;;  %3489 = vrot.lane.b32.xlu1 %v7343_v26, %s9344_s30  ;;  %v7907_v51 = vmul.f32 %v3994_v7, %v3010_v36 }
 0x4cf   : > { %v7904_v39 = vpop.permute.xlu0 %2805 }
 0x4d0   : > { %9352 = vst [vmem:[#allocation80_spill] sm:$0xff] %v7907_v51  ;;  %4452 = vmatpush1.msra.mxu0 %v3037_v47  ;;  %v7914_v13 = vpop.permute.xlu1 %2871  ;;  %v2958_v47 = vrot.slane %v7777_v42, %v9308_v9  ;;  %v7930_v51 = vld [vmem:[#allocation3 + $0x42] ss:$8 sm:$0xf] }
 0x4d1   : > { %v2881_v62 = vsel %vm549_vm7, %v2868_v61, %v7914_v13  ;;  %4453 = vmatprep.subr.mxu0 %v3034_v48  ;;  %3425 = vrot.lane.b32.xlu0 %v7353_v8, %s9349_s29  ;;  %v7934_v48 = vld [vmem:[#allocation3] ss:$8 sm:$0xf] }
 0x4d2   : > { %v7921_v29 = vmul.f32 %v2900_v6, %v2881_v62  ;;  %3483 = vrot.lane.b32.xlu1 %v7363_v27, %s9344_s30  ;;  %v3924_v36 = vmul.f32 %v3910_v0, %v2881_v62  ;;  %v2838_v44 = vrot.slane %v7934_v48, %v5763_v12  ;;  %v3872_v62 = vrot.slane %v7930_v51, %v9308_v9 }
 0x4d3   : > { %v7926_v23 = vpop.permute.xlu0 %2801 }
 0x4d4   : > { %9353 = vst [vmem:[#allocation69_spill] sm:$0xff] %v7921_v29  ;;  %4530 = vmatprep.subr.mxu1 %v3924_v36  ;;  %v7932_v61 = vpop.permute.xlu1 %2999  ;;  %v3868_v36 = vrot.slane %v7930_v51, %v9309_v37 }
 0x4d5   : > { %9354 = vst [vmem:[#allocation45_spill] sm:$0xff] %v7932_v61  ;;  %v3009_v6 = vsel %vm9355_vm8, %v7932_v61, %v7683_v5  ;;  %4531 = vmatpush1.msra.mxu1 %v3923_v4  ;;  %3361 = vrot.lane.b32.xlu0 %v7341_v28, %s9356_s23  ;;  %v2976_v5 = vmul.f32 %v2958_v47, %v7794_v49  ;;  %vm9359_vm8 = vmmov %vm9358_vm4 }
 0x4d6   : > { %v3033_v0 = vmul.f32 %v3016_v1, %v3009_v6  ;;  %3495 = vrot.lane.b32.xlu1 %v7395_v41, %s9344_s30  ;;  %v7953_v1 = vmul.f32 %v3994_v7, %v3009_v6  ;;  %v7958_v4 = vsel %vm9358_vm4, %v7890_v17, %v2808_v22  ;;  %v3914_v49 = vrot.slane %v7848_v11, %v5763_v12 }
 0x4d7   : > { %v7950_v29 = vpop.permute.xlu0 %3807  ;;  %v3918_v7 = vrot.slane %v7848_v11, %v5987_v43  ;;  %v3952_v11 = vrot.slane %v7767_v32, %v5763_v12 }
 0x4d8   : > { %9357 = vst [vmem:[#allocation50_spill] sm:$0xff] %v7953_v1  ;;  %4454 = vmatpush1.msra.mxu0 %v3033_v0  ;;  %v7960_v61 = vpop.permute.xlu1 %2811  ;;  %v3889_v0 = vmul.f32 %v3868_v36, %v7958_v4 }
 0x4d9   : > { %v2820_v19 = vsel %vm9359_vm8, %v2808_v22, %v7960_v61  ;;  %4455 = vmatprep.subr.mxu0 %v2976_v5  ;;  %3373 = vrot.lane.b32.xlu0 %v7376_v35, %s9356_s23  ;;  %v2954_v22 = vrot.slane %v7777_v42, %v9309_v37  ;;  %vm9365_vm8 = vmmov %vm9358_vm4 }
 0x4da   : > { %v7971_v6 = vmul.f32 %v2838_v44, %v2820_v19  ;;  %v3890_v1 = vmul.f32 %v3872_v62, %v2820_v19  ;;  %3427 = vrot.lane.b32.xlu1 %v7343_v26, %s9349_s29  ;;  %v3956_v19 = vrot.slane %v7767_v32, %v5987_v43 }
 0x4db   : > { %v2878_v5 = vpop.permute.xlu0 %2877 }
 0x4dc   : > { %9360 = vst [vmem:[#allocation68_spill] sm:$0xff] %v7971_v6  ;;  %v2880_v6 = vsel %vm549_vm7, %v7876_v25, %v2878_v5  ;;  %v2886_v50 = vsel %vm549_vm7, %v2878_v5, %v7810_v58  ;;  %4532 = vmatprep.subr.mxu1 %v3890_v1  ;;  %v2940_v34 = vpop.permute.xlu1 %2939 }
 0x4dd   : > { %v7992_v38 = vmul.f32 %v2904_v21, %v2880_v6  ;;  %v7994_v46 = vmul.f32 %v3914_v49, %v2880_v6  ;;  %v7996_v42 = vmul.f32 %v3918_v7, %v2886_v50  ;;  %4533 = vmatpush1.msra.mxu1 %v3889_v0  ;;  %v2942_v32 = vsel %vm613_vm5, %v7796_v52, %v2940_v34 }
 0x4de   : > { %v2948_v25 = vsel %vm613_vm5, %v2940_v34, %v7729_v56  ;;  %3363 = vrot.lane.b32.xlu0 %v7353_v8, %s9356_s23  ;;  %3421 = vrot.lane.b32.xlu1 %v7363_v27, %s9349_s29  ;;  %v8008_v1 = vmul.f32 %v2966_v45, %v2942_v32  ;;  %v8010_v6 = vmul.f32 %v3952_v11, %v2942_v32 }
 0x4df   : > { %9361 = vst [vmem:[#allocation49_spill] sm:$0xff] %v7994_v46  ;;  %9362 = vst [vmem:[#allocation51_spill] sm:$0xff] %v7996_v42  ;;  %v2975_v58 = vmul.f32 %v2954_v22, %v2948_v25  ;;  %v8012_v0 = vmul.f32 %v3956_v19, %v2948_v25  ;;  %v8014_v5 = vpop.permute.xlu0 %3805  ;;  %v8020_v56 = vsel %vm9358_vm4, %v7926_v23, %v7904_v39 }
 0x4e0   : > { %9363 = vst [vmem:[#allocation56_spill] sm:$0xff] %v8010_v6  ;;  %v8022_v34 = vpop.permute.xlu1 %2809  ;;  %v2972_v52 = vmul.f32 %v2958_v47, %v7830_v3  ;;  %v3885_v42 = vmul.f32 %v3868_v36, %v8020_v56  ;;  %v8036_v3 = vld [vmem:[#allocation3 + $0x41] ss:$8 sm:$0xf]  ;;  %v2892_v36 = vrot.slane %v7858_v15, %v9309_v37 }
 0x4e1   : > { %9364 = vst [vmem:[#allocation54_spill] sm:$0xff] %v8012_v0  ;;  %4456 = vmatpush1.msra.mxu0 %v2975_v58  ;;  %v2819_v32 = vsel %vm9365_vm8, %v7904_v39, %v8022_v34  ;;  %9366 = vst [vmem:[#allocation53_spill] sm:$0xff] %v8036_v3 }
 0x4e2   : > { %v8029_v25 = vmul.f32 %v2838_v44, %v2819_v32  ;;  %v3886_v46 = vmul.f32 %v3872_v62, %v2819_v32  ;;  %4457 = vmatprep.subr.mxu0 %v2972_v52  ;;  %3311 = vrot.lane.b32.xlu0 %v7376_v35, %s9315_s20  ;;  %v2896_v62 = vrot.slane %v7858_v15, %v9308_v9  ;;  %vm9379_vm8 = vmmov %vm9358_vm4 }
 0x4e3   : > { %3433 = vrot.lane.b32.xlu1 %v7395_v41, %s9349_s29  ;;  %v2876_v6 = vpop.permute.xlu0 %2875 }
 0x4e4   : > { %v2879_v47 = vsel %vm549_vm7, %v7914_v13, %v2876_v6  ;;  %v2885_v39 = vsel %vm549_vm7, %v2876_v6, %v7844_v55  ;;  %4534 = vmatprep.subr.mxu1 %v3886_v46  ;;  %v2938_v44 = vpop.permute.xlu1 %2937  ;;  %v2834_v13 = vrot.slane %v7934_v48, %v9308_v9  ;;  %vm9373_vm7 = vmmov %vm9358_vm4 }
 0x4e5   : > { %v8048_v58 = vmul.f32 %v2904_v21, %v2879_v47  ;;  %v8050_v52 = vmul.f32 %v3914_v49, %v2879_v47  ;;  %v8052_v32 = vmul.f32 %v3918_v7, %v2885_v39  ;;  %4535 = vmatpush1.msra.mxu1 %v3885_v42  ;;  %v2941_v46 = vsel %vm613_vm5, %v7832_v63, %v2938_v44 }
 0x4e6   : > { %v2947_v55 = vsel %vm613_vm5, %v2938_v44, %v7763_v31  ;;  %3691 = vrot.lane.b32.xlu0 %v7376_v35, %s9317_s15  ;;  %v3834_v21 = vrot.slane %v8036_v3, %v9308_v9  ;;  %v8066_v49 = vmul.f32 %v2966_v45, %v2941_v46  ;;  %v8068_v7 = vmul.f32 %v3952_v11, %v2941_v46  ;;  %v8085_v11 = vld [vmem:[#allocation8 + $0x8] sm:$0xff]  ;;  %vm9372_vm5 = vmmov %vm9358_vm4 }
 0x4e7   : > { %9367 = vst [vmem:[#allocation58_spill] sm:$0xff] %v8050_v52  ;;  %9368 = vst [vmem:[#allocation52_spill] sm:$0xff] %v8052_v32  ;;  %v2971_v15 = vmul.f32 %v2954_v22, %v2947_v55  ;;  %v8070_v42 = vmul.f32 %v3956_v19, %v2947_v55  ;;  %3365 = vrot.lane.b32.xlu1 %v7343_v26, %s9356_s23  ;;  %v8074_v63 = vpop.permute.xlu0 %3745  ;;  %v2914_v31 = vmul.f32 %v2896_v62, %v7874_v16 }
 0x4e8   : > { %9369 = vst [vmem:[#allocation55_spill] sm:$0xff] %v8068_v7  ;;  %v8076_v6 = vpop.permute.xlu1 %3811  ;;  %v2830_v47 = vrot.slane %v7934_v48, %v9309_v37  ;;  %v2842_v45 = vrot.slane %v7934_v48, %v5987_v43  ;;  %v3876_v22 = vrot.slane %v7930_v51, %v5763_v12  ;;  %v2913_v19 = vmul.f32 %v2892_v36, %v2886_v50 }
 0x4e9   : > { %9370 = vst [vmem:[#allocation57_spill] sm:$0xff] %v8070_v42  ;;  %9371 = vst [vmem:[#allocation61_spill] sm:$0xff] %v8076_v6  ;;  %4458 = vmatpush1.msra.mxu0 %v2971_v15  ;;  %v3820_v44 = vsel %vm1517_vm9, %v7950_v29, %v8076_v6  ;;  %v3880_v16 = vrot.slane %v7930_v51, %v5987_v43  ;;  %4499 = vmatprep.mubr.f32.mxu0 %v8085_v11 }
 0x4ea   : > { %v3852_v46 = vmul.f32 %v3834_v21, %v3820_v44  ;;  %4459 = vmatprep.subr.mxu0 %v2914_v31  ;;  %3629 = vrot.lane.b32.xlu0 %v7376_v35, %s9326_s26  ;;  %v2910_v48 = vmul.f32 %v2896_v62, %v7912_v24  ;;  %v2909_v55 = vmul.f32 %v2892_v36, %v2885_v39 }
 0x4eb   : > { %3359 = vrot.lane.b32.xlu1 %v7363_v27, %s9356_s23  ;;  %4460 = vmatpush1.msra.mxu0 %v2913_v19  ;;  %v2816_v50 = vpop.permute.xlu0 %2815  ;;  %v3830_v15 = vrot.slane %v8036_v3, %v9309_v37  ;;  %v2852_v39 = vmul.f32 %v2834_v13, %v7958_v4  ;;  %v8341_v3 = vld [vmem:[#allocation3 + $0x24] ss:$8 sm:$0xf] }
 0x4ec   : > { %4461 = vmatprep.subr.mxu0 %v2910_v48  ;;  %v2818_v51 = vsel %vm9372_vm5, %v7960_v61, %v2816_v50  ;;  %v2824_v31 = vsel %vm9373_vm7, %v2816_v50, %v7890_v17  ;;  %4536 = vmatprep.subr.mxu1 %v3852_v46  ;;  %v8107_v24 = vpop.permute.xlu1 %3803  ;;  %v2848_v48 = vmul.f32 %v2834_v13, %v8020_v56 }
 0x4ed   : > { %9374 = vst [vmem:[#allocation60_spill] sm:$0xff] %v8107_v24  ;;  %v2851_v62 = vmul.f32 %v2830_v47, %v2824_v31  ;;  %v8110_v36 = vmul.f32 %v2842_v45, %v2818_v51  ;;  %v8112_v19 = vmul.f32 %v3876_v22, %v2818_v51  ;;  %v8114_v44 = vmul.f32 %v3880_v16, %v2824_v31 }
 0x4ee   : > { %4462 = vmatpush1.msra.mxu0 %v2909_v55  ;;  %v3822_v17 = vsel %vm1517_vm9, %v8107_v24, %v7950_v29  ;;  %3555 = vrot.lane.b32.xlu0 %v7355_v59, %s9338_s19  ;;  %v8135_v55 = vld [vmem:[#allocation3 + $0x40] ss:$8 sm:$0xf] }
 0x4ef   : > { %9375 = vst [vmem:[#allocation65_spill] sm:$0xff] %v8112_v19  ;;  %9376 = vst [vmem:[#allocation59_spill] sm:$0xff] %v8114_v44  ;;  %4463 = vmatprep.subr.mxu0 %v2852_v39  ;;  %v3851_v61 = vmul.f32 %v3830_v15, %v3822_v17  ;;  %3371 = vrot.lane.b32.xlu1 %v7395_v41, %s9356_s23  ;;  %v3744_v4 = vpop.permute.xlu0 %3743 }
 0x4f0   : > { %4464 = vmatpush1.msra.mxu0 %v2851_v62  ;;  %v8125_v46 = vpop.permute.xlu1 %3809  ;;  %9378 = vst [vmem:[#allocation64_spill] sm:$0xff] %v8135_v55 }
 0x4f1   : > { %9377 = vst [vmem:[#allocation62_spill] sm:$0xff] %v8125_v46  ;;  %4465 = vmatprep.subr.mxu0 %v2848_v48  ;;  %4537 = vmatpush1.msra.mxu1 %v3851_v61  ;;  %v3819_v56 = vsel %vm1517_vm9, %v8014_v5, %v8125_v46 }
 0x4f2   : > { %v3848_v29 = vmul.f32 %v3834_v21, %v3819_v56  ;;  %3553 = vrot.lane.b32.xlu0 %v7384_v2, %s9338_s19 }
 0x4f3   : > { %3309 = vrot.lane.b32.xlu1 %v7395_v41, %s9315_s20  ;;  %v2814_v13 = vpop.permute.xlu0 %2813 }
 0x4f4   : > { %v2817_v50 = vsel %vm9358_vm4, %v8022_v34, %v2814_v13  ;;  %v2823_v51 = vsel %vm9379_vm8, %v2814_v13, %v7926_v23  ;;  %4538 = vmatprep.subr.mxu1 %v3848_v29  ;;  %v8143_v31 = vpop.permute.xlu1 %3801  ;;  %v3772_v23 = vrot.slane %v8135_v55, %v9308_v9  ;;  %vm9433_vm4 = vcmp.lt.s32.totalorder %v5753_v10, 9 }
 0x4f5   : > { %9380 = vst [vmem:[#allocation66_spill] sm:$0xff] %v8143_v31  ;;  %v2847_v21 = vmul.f32 %v2830_v47, %v2823_v51  ;;  %v8145_v39 = vmul.f32 %v2842_v45, %v2817_v50  ;;  %v8147_v62 = vmul.f32 %v3876_v22, %v2817_v50  ;;  %v8149_v48 = vmul.f32 %v3880_v16, %v2823_v51  ;;  %vm9434_vm8 = vmmov %vm9433_vm4 }
 0x4f6   : > { %v3821_v17 = vsel %vm1517_vm9, %v8143_v31, %v8014_v5  ;;  %3493 = vrot.lane.b32.xlu0 %v7355_v59, %s9344_s30  ;;  %v3768_v16 = vrot.slane %v8135_v55, %v9309_v37 }
 0x4f7   : > { %9381 = vst [vmem:[#allocation73_spill] sm:$0xff] %v8147_v62  ;;  %9382 = vst [vmem:[#allocation70_spill] sm:$0xff] %v8149_v48  ;;  %v3847_v34 = vmul.f32 %v3830_v15, %v3821_v17  ;;  %3689 = vrot.lane.b32.xlu1 %v7395_v41, %s9317_s15  ;;  %v3304_v47 = vpop.permute.xlu0 %3303  ;;  %4466 = vmatpush1.msra.mxu0 %v2847_v21  ;;  %v8194_v17 = vld [vmem:[#allocation3 + $0x62] ss:$8 sm:$0xf] }
 0x4f8   : > { %v8161_v45 = vpop.permute.xlu1 %3749  ;;  %9386 = vst [vmem:[#allocation79_spill] sm:$0xff] %v8194_v17 }
 0x4f9   : > { %9383 = vst [vmem:[#allocation67_spill] sm:$0xff] %v8161_v45  ;;  %4539 = vmatpush1.msra.mxu1 %v3847_v34  ;;  %v3758_v5 = vsel %vm1453_vm10, %v8074_v63, %v8161_v45 }
 0x4fa   : > { %v3790_v22 = vmul.f32 %v3772_v23, %v3758_v5  ;;  %3491 = vrot.lane.b32.xlu0 %v7384_v2, %s9344_s30 }
 0x4fb   : > { %3627 = vrot.lane.b32.xlu1 %v7395_v41, %s9326_s26  ;;  %v3684_v15 = vpop.permute.xlu0 %3683  ;;  %s5443_s26 = smov [#allocation9]  }
 0x4fc   : > { %4540 = vmatprep.subr.mxu1 %v3790_v22  ;;  %v8173_v61 = vpop.permute.xlu1 %3741  ;;  %s5354_s19 = sshll.u32 %s5443_s26, 4  ;;  %s5355_s19 = int_to_ptr.vmem [resolvable:$false] %s5354_s19 }
 0x4fd   : > { %9384 = vst [vmem:[#allocation18_spill] sm:$0xff] %v8173_v61  ;;  %v3760_v56 = vsel %vm1453_vm10, %v8173_v61, %v8074_v63 }
 0x4fe   : > { %v3789_v29 = vmul.f32 %v3768_v16, %v3760_v56  ;;  %3431 = vrot.lane.b32.xlu0 %v7355_v59, %s9349_s29  ;;  %v4172_v56 = vrot.slane %v8194_v17, %v9309_v37 }
 0x4ff   : > { %3815 = vrot.lane.b32.xlu1 %v7376_v35, %s5433_s18  ;;  %v8183_v13 = vpop.permute.xlu0 %3299 }
 0x500   : > { %4541 = vmatpush1.msra.mxu1 %v3789_v29  ;;  %v8185_v50 = vpop.permute.xlu1 %3747 }
 0x501   : > { %9385 = vst [vmem:[#allocation71_spill] sm:$0xff] %v8185_v50  ;;  %v3757_v51 = vsel %vm1453_vm10, %v3744_v4, %v8185_v50 }
 0x502   : > { %v3786_v21 = vmul.f32 %v3772_v23, %v3757_v51  ;;  %3369 = vrot.lane.b32.xlu0 %v7355_v59, %s9356_s23  ;;  %v4176_v23 = vrot.slane %v8194_v17, %v9308_v9  ;;  %v8207_v51 = vld [vmem:[#allocation3 + $0x27] ss:$8 sm:$0xf] }
 0x503   : > { %3813 = vrot.lane.b32.xlu1 %v7395_v41, %s5433_s18  ;;  %v3302_v63 = vpop.permute.xlu0 %3301  ;;  %v3710_v50 = vrot.slane %v8207_v51, %v9308_v9  ;;  %v3706_v61 = vrot.slane %v8207_v51, %v9309_v37 }
 0x504   : > { %4542 = vmatprep.subr.mxu1 %v3786_v21  ;;  %v8196_v34 = vpop.permute.xlu1 %3739  ;;  %v8212_v21 = vsel %vm997_vm11, %v8183_v13, %v3304_v47 }
 0x505   : > { %9387 = vst [vmem:[#allocation20_spill] sm:$0xff] %v8196_v34  ;;  %v3759_v5 = vsel %vm1453_vm10, %v8196_v34, %v3744_v4  ;;  %v4193_v34 = vmul.f32 %v4172_v56, %v8212_v21 }
 0x506   : > { %v3785_v22 = vmul.f32 %v3768_v16, %v3759_v5 }
 0x507   : > { %3753 = vrot.lane.b32.xlu1 %v7376_v35, %s9311_s27  ;;  %v3682_v29 = vpop.permute.xlu0 %3681 }
 0x508   : > { %4543 = vmatpush1.msra.mxu1 %v3785_v22  ;;  %v8214_v4 = vpop.permute.xlu1 %3307 }
 0x509   : > { %9388 = vst [vmem:[#allocation22_spill] sm:$0xff] %v8214_v4  ;;  %v8219_v16 = vsel %vm997_vm11, %v3304_v47, %v8214_v4 }
 0x50a   : > { %9389 = vst [vmem:[#allocation83_spill] sm:$0xff] %v8219_v16  ;;  %v4194_v5 = vmul.f32 %v4176_v23, %v8219_v16 }
 0x50b   : > { %3751 = vrot.lane.b32.xlu1 %v7395_v41, %s9311_s27  ;;  %v8227_v45 = vpop.permute.xlu0 %3297 }
 0x50c   : > { %4564 = vmatprep.subr.mxu1 %v4194_v5  ;;  %v8229_v22 = vpop.permute.xlu1 %3687  ;;  %v8242_v5 = vld [vmem:[#allocation3 + $0x61] ss:$8 sm:$0xf] }
 0x50d   : > { %v3696_v47 = vsel %vm1389_vm12, %v3684_v15, %v8229_v22  ;;  %4565 = vmatpush2.msra.mxu1 %v4193_v34  ;;  %9390 = vst [vmem:[#allocation24_spill] sm:$0xff] %v8242_v5  ;;  %v4134_v44 = vrot.slane %v8242_v5, %v9309_v37 }
 0x50e   : > { %v3728_v62 = vmul.f32 %v3710_v50, %v3696_v47  ;;  %v8254_v47 = vsel %vm997_vm11, %v8227_v45, %v3302_v63 }
 0x50f   : > { %3429 = vrot.lane.b32.xlu1 %v7384_v2, %s9349_s29  ;;  %v8236_v16 = vpop.permute.xlu0 %3245  ;;  %v4189_v52 = vmul.f32 %v4172_v56, %v8254_v47  ;;  %v4151_v56 = vmul.f32 %v4134_v44, %v7574_v30 }
 0x510   : > { %4467 = vmatprep.subr.mxu0 %v3728_v62  ;;  %v8240_v48 = vpop.permute.xlu1 %3679  ;;  %v4138_v62 = vrot.slane %v8242_v5, %v9308_v9 }
 0x511   : > { %v3698_v46 = vsel %vm1389_vm12, %v8240_v48, %v3684_v15 }
 0x512   : > { %v3727_v19 = vmul.f32 %v3706_v61, %v3698_v46  ;;  %v8266_v46 = vsel %vm933_vm1, %v7525_v57, %v8236_v16 }
 0x513   : > { %3367 = vrot.lane.b32.xlu1 %v7384_v2, %s9356_s23  ;;  %v8249_v34 = vpop.permute.xlu0 %3625  ;;  %v4156_v5 = vmul.f32 %v4138_v62, %v8266_v46 }
 0x514   : > { %v8258_v4 = vpop.permute.xlu1 %3305  ;;  %4468 = vmatpush2.msra.mxu0 %v3727_v19 }
 0x515   : > { %9391 = vst [vmem:[#allocation84_spill] sm:$0xff] %v8258_v4  ;;  %v8271_v15 = vsel %vm997_vm11, %v3302_v63, %v8258_v4  ;;  %v4155_v63 = vmul.f32 %v4134_v44, %v7530_v60  ;;  %v8298_v60 = vld [vmem:[#allocation3 + $0x26] ss:$8 sm:$0xf] }
 0x516   : > { %9392 = vst [vmem:[#allocation81_spill] sm:$0xff] %v8271_v15  ;;  %v4190_v31 = vmul.f32 %v4176_v23, %v8271_v15  ;;  %v8292_v15 = vld [vmem:[#allocation3 + $0x60] ss:$8 sm:$0xf] }
 0x517   : > { %v8275_v55 = vpop.permute.xlu0 %3243  ;;  %9393 = vst [vmem:[#allocation82_spill] sm:$0xff] %v8292_v15  ;;  %v4100_v30 = vrot.slane %v8292_v15, %v9308_v9  ;;  %v4096_v44 = vrot.slane %v8292_v15, %v9309_v37 }
 0x518   : > { %v8282_v57 = vsel %vm933_vm1, %v7569_v54, %v8275_v55  ;;  %4566 = vmatprep.subr.mxu1 %v4190_v31  ;;  %v8284_v19 = vpop.permute.xlu1 %3685 }
 0x519   : > { %v4152_v4 = vmul.f32 %v4138_v62, %v8282_v57  ;;  %4567 = vmatpush2.msra.mxu1 %v4189_v52  ;;  %v3695_v23 = vsel %vm1389_vm12, %v3682_v29, %v8284_v19 }
 0x51a   : > { %4568 = vmatprep.subr.mxu1 %v4156_v5  ;;  %v3724_v32 = vmul.f32 %v3710_v50, %v3695_v23 }
 0x51b   : > { %4569 = vmatpush2.msra.mxu1 %v4155_v63  ;;  %v8294_v54 = vpop.permute.xlu0 %3623  ;;  %v4117_v63 = vmul.f32 %v4096_v44, %v7631_v20 }
 0x51c   : > { %4570 = vmatprep.subr.mxu1 %v4152_v4  ;;  %v8296_v31 = vpop.permute.xlu1 %3677  ;;  %4469 = vmatprep.subr.mxu0 %v3724_v32  ;;  %v3648_v4 = vrot.slane %v8298_v60, %v9308_v9 }
 0x51d   : > { %v3697_v52 = vsel %vm1389_vm12, %v8296_v31, %v3682_v29  ;;  %4571 = vmatpush2.msra.mxu1 %v4151_v56 }
 0x51e   : > { %v3723_v50 = vmul.f32 %v3706_v61, %v3697_v52  ;;  %v3644_v61 = vrot.slane %v8298_v60, %v9309_v37 }
 0x51f   : > { %v3184_v5 = vpop.permute.xlu0 %3183 }
 0x520   : > { %v8312_v32 = vsel %vm869_vm3, %v7626_v33, %v3184_v5  ;;  %4470 = vmatpush2.msra.mxu0 %v3723_v50  ;;  %v3622_v62 = vpop.permute.xlu1 %3621 }
 0x521   : > { %v4118_v29 = vmul.f32 %v4100_v30, %v8312_v32  ;;  %v3634_v23 = vsel %vm1325_vm13, %v3622_v62, %v8249_v34 }
 0x522   : > { %v3666_v56 = vmul.f32 %v3648_v4, %v3634_v23 }
 0x523   : > { %v3548_v52 = vpop.permute.xlu0 %3547  ;;  %4572 = vmatprep.subr.mxu1 %v4118_v29 }
 0x524   : > { %v8321_v15 = vpop.permute.xlu1 %3617  ;;  %4573 = vmatpush2.msra.mxu1 %v4117_v63  ;;  %4471 = vmatprep.subr.mxu0 %v3666_v56 }
 0x525   : > { %v3636_v33 = vsel %vm1325_vm13, %v8321_v15, %v3622_v62 }
 0x526   : > { %v3665_v50 = vmul.f32 %v3644_v61, %v3636_v33  ;;  %v5257_v33 = vld [vmem:[#allocation3 + $0x7] ss:$8 sm:$0xf] }
 0x527   : > { %v8326_v20 = vpop.permute.xlu0 %3559 }
 0x528   : > { %4472 = vmatpush2.msra.mxu0 %v3665_v50  ;;  %v3620_v24 = vpop.permute.xlu1 %3619  ;;  %v3276_v50 = vrot.slane %v5257_v33, %v5987_v43 }
 0x529   : > { %v3633_v6 = vsel %vm1325_vm13, %v3620_v24, %v8294_v54 }
 0x52a   : > { %v3662_v23 = vmul.f32 %v3648_v4, %v3633_v6  ;;  %v3272_v6 = vrot.slane %v5257_v33, %v5763_v12  ;;  %v8348_v4 = vsel %vm933_vm1, %v8236_v16, %v7538_v14  ;;  %v8362_v14 = vsel %vm933_vm1, %v8275_v55, %v7583_v40  ;;  %v8380_v55 = vld [vmem:[#allocation8 + $0x38] sm:$0xff]  ;;  %v9398_v33 = vld [vmem:[#allocation26_spill] sm:$0xff] }
 0x52b   : > { %v8331_v7 = vpop.permute.xlu0 %3549  ;;  %9394 = vst [vmem:[#allocation85_spill] sm:$0xff] %v8348_v4  ;;  %v3574_v16 = vrot.slane %v8341_v3, %v9309_v37 }
 0x52c   : > { %4473 = vmatprep.subr.mxu0 %v3662_v23  ;;  %v8333_v29 = vpop.permute.xlu1 %3615  ;;  %v3578_v23 = vrot.slane %v8341_v3, %v9308_v9 }
 0x52d   : > { %v3635_v63 = vsel %vm1325_vm13, %v8333_v29, %v3620_v24 }
 0x52e   : > { %v3661_v62 = vmul.f32 %v3644_v61, %v3635_v63  ;;  %v4113_v63 = vmul.f32 %v4096_v44, %v7676_v53  ;;  %v3568_v44 = vsel %vm1253_vm14, %v8326_v20, %v3548_v52 }
 0x52f   : > { %v8338_v56 = vpop.permute.xlu0 %3485  ;;  %v3595_v2 = vmul.f32 %v3574_v16, %v3568_v44 }
 0x530   : > { %4474 = vmatpush2.msra.mxu0 %v3661_v62  ;;  %v3182_v42 = vpop.permute.xlu1 %3181 }
 0x531   : > { %v3191_v24 = vsel %vm869_vm3, %v7671_v18, %v3182_v42  ;;  %4475 = vmatprep.subr.mxu0 %v7343_v26  ;;  %v8369_v18 = vld [vmem:[#allocation8 + $0x10] sm:$0xff] }
 0x532   : > { %v4114_v61 = vmul.f32 %v4100_v30, %v3191_v24  ;;  %4476 = vmatpush2.msra.mxu0 %v7341_v28  ;;  %9395 = vst [vmem:[#allocation16_spill] sm:$0xff] %v8369_v18  ;;  %v3288_v28 = vmul.f32 %v3276_v50, %v8348_v4  ;;  %v9396_v30 = vld [vmem:[#allocation31_spill] sm:$0xff]  ;;  %v8388_v4 = vsel %vm869_vm3, %v3184_v5, %v9398_v33 }
 0x533   : > { %4477 = vmatprep.subr.mxu0 %v7353_v8  ;;  %v8367_v26 = vpop.permute.xlu0 %3497  ;;  %v3214_v53 = vrot.slane %v9396_v30, %v5987_v43  ;;  %9397 = vst [vmem:[#allocation31_spill] sm:$0xff] %v8380_v55  ;;  %v3287_v8 = vmul.f32 %v3272_v6, %v8266_v46  ;;  %v3210_v62 = vrot.slane %v9396_v30, %v5763_v12  ;;  %9399 = vst [vmem:[#allocation26_spill] sm:$0xff] %v8388_v4  ;;  %v9400_v30 = vld [vmem:[#allocation32_spill] sm:$0xff] }
 0x534   : > { %4478 = vmatpush2.msra.mxu0 %v7363_v27  ;;  %4574 = vmatprep.subr.mxu1 %v4114_v61  ;;  %v8378_v40 = vpop.permute.xlu1 %3551  ;;  %v3284_v27 = vmul.f32 %v3276_v50, %v8362_v14  ;;  %v3283_v46 = vmul.f32 %v3272_v6, %v8282_v57  ;;  %v8399_v17 = vsel %vm869_vm3, %v3182_v42, %v9400_v30  ;;  %v5258_v57 = vld [vmem:[#allocation3 + $0x5] ss:$8 sm:$0xf] }
 0x535   : > { %v3566_v0 = vsel %vm1253_vm14, %v3548_v52, %v8378_v40  ;;  %4575 = vmatpush2.msra.mxu1 %v4113_v63  ;;  %9401 = vst [vmem:[#allocation32_spill] sm:$0xff] %v8399_v17  ;;  %v8405_v52 = vld [vmem:[#allocation8 + $0x30] sm:$0xff]  ;;  %v3152_v6 = vrot.slane %v5258_v57, %v5987_v43  ;;  %v9403_v63 = vld [vmem:[#allocation47_spill] sm:$0xff]  ;;  %v3225_v44 = vmul.f32 %v3210_v62, %v8312_v32  ;;  %v9406_v30 = vld [vmem:[#allocation28_spill] sm:$0xff] }
 0x536   : > { %v3596_v61 = vmul.f32 %v3578_v23, %v3566_v0  ;;  %4589 = vmatprep.subr.mxu1 %v3288_v28  ;;  %4577 = vmatmul.mubr.f32.vlgmr.msra.gmra.mxu1 %v8369_v18  ;;  %9402 = vst [vmem:[#allocation86_spill] sm:$0xff] %v8405_v52  ;;  %v3226_v0 = vmul.f32 %v3214_v53, %v8388_v4  ;;  %v9404_v28 = vld [vmem:[#allocation25_spill] sm:$0xff]  ;;  %v9418_v18 = vld [vmem:[#allocation72_spill] sm:$0xff] }
 0x537   : > { %4590 = vmatpush1.msra.mxu1 %v3287_v8  ;;  %v8401_v5 = vpop.permute.xlu0 %3487  ;;  %5093 = vmatprep.mubr.msk.f32.mxu1 %vm2140_vm6, %v8380_v55  ;;  %v8413_v42 = vsel %vm805_vm0, %v9404_v28, %v9403_v63  ;;  %v3222_v33 = vmul.f32 %v3214_v53, %v8399_v17  ;;  %v3221_v63 = vmul.f32 %v3210_v62, %v3191_v24  ;;  %v9407_v28 = vld [vmem:[#allocation30_spill] sm:$0xff]  ;;  %v9417_v55 = vld [vmem:[#allocation45_spill] sm:$0xff] }
 0x538   : > { %4479 = vmatprep.subr.mxu0 %v3596_v61  ;;  %4591 = vmatprep.subr.mxu1 %v3284_v27  ;;  %v3546_v50 = vpop.permute.xlu1 %3545  ;;  %v9405_v61 = vld [vmem:[#allocation76_spill] sm:$0xff]  ;;  %v3164_v53 = vmul.f32 %v3152_v6, %v8413_v42 }
 0x539   : > { %v3565_v8 = vsel %vm1253_vm14, %v3546_v50, %v8331_v7  ;;  %4480 = vmatpush2.msra.mxu0 %v3595_v2  ;;  %4592 = vmatpush1.msra.mxu1 %v3283_v46  ;;  %v8425_v57 = vsel %vm805_vm0, %v9406_v30, %v9405_v61  ;;  %v8430_v2 = vld [vmem:[#allocation3 + $0x23] ss:$8 sm:$0xf]  ;;  %v5259_v46 = vld [vmem:[#allocation3 + $0x4] ss:$8 sm:$0xf] }
 0x53a   : > { %v3592_v27 = vmul.f32 %v3578_v23, %v3565_v8  ;;  %4593 = vmatprep.subr.mxu1 %v3226_v0  ;;  %4583 = vmatmul.mubr.f32.gmra.mxu1 %v8405_v52  ;;  %v3090_v0 = vrot.slane %v5259_v46, %v5987_v43  ;;  %v9408_v8 = vld [vmem:[#allocation23_spill] sm:$0xff]  ;;  %v9410_v61 = vld [vmem:[#allocation29_spill] sm:$0xff]  ;;  %v3512_v46 = vrot.slane %v8430_v2, %v9309_v37  ;;  %vm9415_vm0 = vcmp.lt.s32.totalorder %v5753_v10, 65 }
 0x53b   : > { %4594 = vmatpush1.msra.mxu1 %v3225_v44  ;;  %v8427_v32 = vpop.permute.xlu0 %3423  ;;  %4653 = vmatprep.mubr.f32.mxu1 %v8085_v11  ;;  %v8440_v24 = vsel %vm741_vm2, %v9408_v8, %v9407_v28  ;;  %v3160_v44 = vmul.f32 %v3152_v6, %v8425_v57  ;;  %v9411_v28 = vld [vmem:[#allocation19_spill] sm:$0xff]  ;;  %vm9419_vm1 = vmmov %vm9415_vm0 }
 0x53c   : > { %4481 = vmatprep.subr.mxu0 %v3592_v27  ;;  %4595 = vmatprep.subr.mxu1 %v3222_v33  ;;  %v8432_v23 = vpop.permute.xlu1 %3557  ;;  %v3516_v33 = vrot.slane %v8430_v2, %v9308_v9  ;;  %v9409_v27 = vld [vmem:[#allocation43_spill] sm:$0xff] }
 0x53d   : > { %v3567_v11 = vsel %vm1253_vm14, %v8432_v23, %v3546_v50  ;;  %4596 = vmatpush1.msra.mxu1 %v3221_v63  ;;  %v8452_v30 = vsel %vm741_vm2, %v9410_v61, %v9409_v27  ;;  %v3102_v63 = vmul.f32 %v3090_v0, %v8440_v24  ;;  %v9414_v27 = vld [vmem:[#allocation38_spill] sm:$0xff]  ;;  %vm9425_vm2 = vcmp.lt.s32.totalorder %v5753_v10, 8 }
 0x53e   : > { %v3591_v62 = vmul.f32 %v3574_v16, %v3567_v11  ;;  %4597 = vmatprep.subr.mxu1 %v3164_v53  ;;  %v3506_v16 = vsel %vm1189_vm15, %v8367_v26, %v8338_v56  ;;  %v9412_v53 = vld [vmem:[#allocation35_spill] sm:$0xff]  ;;  %v9413_v11 = vld [vmem:[#allocation40_spill] sm:$0xff]  ;;  %v3098_v52 = vmul.f32 %v3090_v0, %v8452_v30  ;;  %vm9426_vm3 = vmmov %vm9425_vm2 }
 0x53f   : > { %4598 = vmatpush1.msra.mxu1 %v9411_v28  ;;  %v8457_v50 = vpop.permute.xlu0 %3435  ;;  %v3028_v8 = vrot.slane %v9412_v53, %v5987_v43  ;;  %v8472_v61 = vsel %vm9415_vm0, %v9414_v27, %v9413_v11  ;;  %v8484_v53 = vsel %vm9419_vm1, %v9418_v18, %v9417_v55  ;;  %v3533_v17 = vmul.f32 %v3512_v46, %v3506_v16  ;;  %v9420_v11 = vld [vmem:[#allocation34_spill] sm:$0xff]  ;;  %vm9429_vm5 = vmmov %vm9425_vm2 }
 0x540   : > { %4482 = vmatpush2.msra.mxu0 %v3591_v62  ;;  %4599 = vmatprep.subr.mxu1 %v3160_v44  ;;  %v8463_v6 = vpop.permute.xlu1 %3489  ;;  %v9416_v62 = vld [vmem:[#allocation21_spill] sm:$0xff]  ;;  %v9422_v55 = vld [vmem:[#allocation42_spill] sm:$0xff]  ;;  %vm9432_vm7 = vmmov %vm9425_vm2 }
 0x541   : > { %v3504_v28 = vsel %vm1189_vm15, %v8338_v56, %v8463_v6  ;;  %4600 = vmatpush1.msra.mxu1 %v9416_v62  ;;  %v3040_v62 = vmul.f32 %v3028_v8, %v8472_v61  ;;  %v3036_v18 = vmul.f32 %v3028_v8, %v8484_v53  ;;  %v8496_v16 = vld [vmem:[#allocation3 + $0x22] ss:$8 sm:$0xf]  ;;  %vm9435_vm0 = vmmov %vm9433_vm4 }
 0x542   : > { %v3534_v44 = vmul.f32 %v3516_v33, %v3504_v28  ;;  %4601 = vmatprep.subr.mxu1 %v3102_v63  ;;  %v9421_v63 = vld [vmem:[#allocation41_spill] sm:$0xff]  ;;  %v3450_v8 = vrot.slane %v8496_v16, %v9309_v37  ;;  %vm9436_vm1 = vmmov %vm9435_vm0 }
 0x543   : > { %4602 = vmatpush1.msra.mxu1 %v9420_v11  ;;  %v8487_v27 = vpop.permute.xlu0 %3425 }
 0x544   : > { %4483 = vmatprep.subr.mxu0 %v3534_v44  ;;  %4603 = vmatprep.subr.mxu1 %v3098_v52  ;;  %v3484_v56 = vpop.permute.xlu1 %3483 }
 0x545   : > { %v3503_v0 = vsel %vm1189_vm15, %v3484_v56, %v8401_v5  ;;  %4484 = vmatpush2.msra.mxu0 %v3533_v17  ;;  %4604 = vmatpush1.msra.mxu1 %v9421_v63  ;;  %v9423_v17 = vld [vmem:[#allocation27_spill] sm:$0xff] }
 0x546   : > { %v3530_v28 = vmul.f32 %v3516_v33, %v3503_v0  ;;  %4605 = vmatprep.subr.mxu1 %v3040_v62  ;;  %v3454_v33 = vrot.slane %v8496_v16, %v9308_v9  ;;  %v9424_v62 = vld [vmem:[#allocation77_spill] sm:$0xff]  ;;  %v3444_v0 = vsel %vm9425_vm2, %v8457_v50, %v8427_v32 }
 0x547   : > { %4606 = vmatpush1.msra.mxu1 %v9422_v55  ;;  %v3362_v44 = vpop.permute.xlu0 %3361  ;;  %v3471_v55 = vmul.f32 %v3450_v8, %v3444_v0 }
 0x548   : > { %4485 = vmatprep.subr.mxu0 %v3530_v28  ;;  %4607 = vmatprep.subr.mxu1 %v3036_v18  ;;  %v8498_v52 = vpop.permute.xlu1 %3495 }
 0x549   : > { %v3505_v11 = vsel %vm1189_vm15, %v8498_v52, %v3484_v56  ;;  %4608 = vmatpush1.msra.mxu1 %v9423_v17  ;;  %v9427_v56 = vld [vmem:[#allocation33_spill] sm:$0xff] }
 0x54a   : > { %v3529_v63 = vmul.f32 %v3512_v46, %v3505_v11  ;;  %4609 = vmatprep.subr.mxu1 %v8008_v1  ;;  %v9428_v11 = vld [vmem:[#allocation63_spill] sm:$0xff] }
 0x54b   : > { %4610 = vmatpush1.msra.mxu1 %v9424_v62  ;;  %v8514_v28 = vpop.permute.xlu0 %3373 }
 0x54c   : > { %4486 = vmatpush2.msra.mxu0 %v3529_v63  ;;  %4611 = vmatprep.subr.mxu1 %v8066_v49  ;;  %v8517_v46 = vpop.permute.xlu1 %3427 }
 0x54d   : > { %v3442_v1 = vsel %vm9426_vm3, %v8427_v32, %v8517_v46  ;;  %4612 = vmatpush1.msra.mxu1 %v9427_v56  ;;  %v9430_v32 = vld [vmem:[#allocation69_spill] sm:$0xff]  ;;  %v8545_v56 = vrot.slane %v8207_v51, %v5763_v12  ;;  %vm9469_vm3 = vmmov %vm9425_vm2 }
 0x54e   : > { %v3472_v18 = vmul.f32 %v3454_v33, %v3442_v1  ;;  %4613 = vmatprep.subr.mxu1 %v7992_v38  ;;  %v9431_v38 = vld [vmem:[#allocation68_spill] sm:$0xff] }
 0x54f   : > { %4614 = vmatpush1.msra.mxu1 %v9428_v11  ;;  %v8538_v1 = vld [vmem:[#allocation3 + $0x21] ss:$8 sm:$0xf]  ;;  %v3382_v11 = vsel %vm9433_vm4, %v8514_v28, %v3362_v44 }
 0x550   : > { %v8526_v17 = vpop.permute.xlu0 %3363  ;;  %4487 = vmatprep.subr.mxu0 %v3472_v18  ;;  %4615 = vmatprep.subr.mxu1 %v8048_v58  ;;  %v3422_v49 = vpop.permute.xlu1 %3421  ;;  %v3388_v18 = vrot.slane %v8538_v1, %v9309_v37 }
 0x551   : > { %v3441_v63 = vsel %vm9429_vm5, %v3422_v49, %v8487_v27  ;;  %4488 = vmatpush2.msra.mxu0 %v3471_v55  ;;  %4616 = vmatpush1.msra.mxu1 %v9430_v32  ;;  %vm9474_vm5 = vmmov %vm9435_vm0 }
 0x552   : > { %v3468_v62 = vmul.f32 %v3454_v33, %v3441_v63  ;;  %4617 = vmatprep.subr.mxu1 %v8110_v36  ;;  %v8549_v36 = vrot.slane %v8207_v51, %v5987_v43 }
 0x553   : > { %4618 = vmatpush1.msra.mxu1 %v9431_v38  ;;  %v8576_v38 = vrot.slane %v8298_v60, %v5987_v43 }
 0x554   : > { %v8535_v0 = vpop.permute.xlu0 %3311  ;;  %4489 = vmatprep.subr.mxu0 %v3468_v62  ;;  %4619 = vmatprep.subr.mxu1 %v8145_v39  ;;  %v3392_v39 = vrot.slane %v8538_v1, %v9308_v9 }
 0x555   : > { %v8540_v58 = vpop.permute.xlu1 %3433  ;;  %4620 = vmatpush1.msra.mxu1 %v8029_v25 }
 0x556   : > { %v3443_v33 = vsel %vm9432_vm7, %v8540_v58, %v3422_v49 }
 0x557   : > { %v3467_v55 = vmul.f32 %v3450_v8, %v3443_v33  ;;  %v3409_v33 = vmul.f32 %v3388_v18, %v3382_v11  ;;  %v3582_v11 = vrot.slane %v8341_v3, %v5763_v12 }
 0x558   : > { %v3692_v25 = vpop.permute.xlu0 %3691 }
 0x559   : > { %v3694_v51 = vsel %vm1389_vm12, %v8229_v22, %v3692_v25  ;;  %v3700_v49 = vsel %vm1389_vm12, %v3692_v25, %v8240_v48  ;;  %v8567_v63 = vpop.permute.xlu1 %3365  ;;  %4490 = vmatpush2.msra.mxu0 %v3467_v55  ;;  %v8578_v48 = vld [vmem:[#allocation3 + $0x20] ss:$8 sm:$0xf] }
 0x55a   : > { %v3729_v32 = vmul.f32 %v8545_v56, %v3694_v51  ;;  %v3730_v62 = vmul.f32 %v8549_v36, %v3700_v49  ;;  %v3380_v8 = vsel %vm9434_vm8, %v3362_v44, %v8567_v63  ;;  %v8593_v49 = vrot.slane %v8341_v3, %v5987_v43 }
 0x55b   : > { %v3410_v22 = vmul.f32 %v3392_v39, %v3380_v8  ;;  %v3326_v8 = vrot.slane %v8578_v48, %v9309_v37 }
 0x55c   : > { %v3630_v4 = vpop.permute.xlu0 %3629  ;;  %4621 = vmatprep.subr.mxu1 %v3730_v62 }
 0x55d   : > { %v3638_v25 = vsel %vm1325_vm13, %v3630_v4, %v8321_v15  ;;  %4491 = vmatprep.subr.mxu0 %v3410_v22  ;;  %v3360_v55 = vpop.permute.xlu1 %3359  ;;  %4622 = vmatpush2.msra.mxu1 %v3729_v32  ;;  %v3330_v15 = vrot.slane %v8578_v48, %v9308_v9  ;;  %v8611_v9 = vsel %vm997_vm11, %v8535_v0, %v8183_v13 }
 0x55e   : > { %v8584_v51 = vmul.f32 %v8576_v38, %v3638_v25  ;;  %v3379_v44 = vsel %vm9435_vm0, %v3360_v55, %v8526_v17  ;;  %4492 = vmatpush2.msra.mxu0 %v3409_v33 }
 0x55f   : > { %v3406_v62 = vmul.f32 %v3392_v39, %v3379_v44 }
 0x560   : > { %v3556_v32 = vpop.permute.xlu0 %3555 }
 0x561   : > { %v3562_v22 = vsel %vm1253_vm14, %v3556_v32, %v8326_v20  ;;  %v3564_v33 = vsel %vm1253_vm14, %v8378_v40, %v3556_v32  ;;  %4493 = vmatprep.subr.mxu0 %v3406_v62  ;;  %v8605_v25 = vpop.permute.xlu1 %3371  ;;  %v3348_v40 = vmul.f32 %v3330_v15, %v8212_v21  ;;  %v3347_v32 = vmul.f32 %v3326_v8, %v8611_v9 }
 0x562   : > { %v8613_v3 = vmul.f32 %v3582_v11, %v3564_v33  ;;  %v8616_v39 = vmul.f32 %v8593_v49, %v3562_v22  ;;  %v3381_v20 = vsel %vm9436_vm1, %v8605_v25, %v3360_v55  ;;  %v5260_v22 = vld [vmem:[#allocation3 + $0x47] ss:$8 sm:$0xf]  ;;  %v3344_v55 = vmul.f32 %v3330_v15, %v8254_v47 }
 0x563   : > { %v3405_v44 = vmul.f32 %v3388_v18, %v3381_v20  ;;  %v4066_v37 = vrot.slane %v5260_v22, %v5763_v12 }
 0x564   : > { %v8622_v62 = vpop.permute.xlu0 %3553 }
 0x565   : > { %v3563_v13 = vsel %vm1253_vm14, %v8331_v7, %v8622_v62  ;;  %4494 = vmatpush2.msra.mxu0 %v3405_v44  ;;  %v8629_v33 = vpop.permute.xlu1 %3309  ;;  %v8642_v7 = vld [vmem:[#allocation8] sm:$0xff]  ;;  %v8644_v44 = vld [vmem:[#allocation8 + $0x28] sm:$0xff]  ;;  %v4081_v47 = vmul.f32 %v4066_v37, %v8413_v42 }
 0x566   : > { %v8633_v18 = vmul.f32 %v3582_v11, %v3563_v13  ;;  %v8639_v21 = vsel %vm997_vm11, %v8629_v33, %v8227_v45  ;;  %4495 = vmatprep.subr.mxu0 %v3348_v40  ;;  %v5261_v11 = vld [vmem:[#allocation3 + $0x46] ss:$8 sm:$0xf]  ;;  %v3652_v40 = vrot.slane %v8298_v60, %v5763_v12 }
 0x567   : > { %v3343_v20 = vmul.f32 %v3326_v8, %v8639_v21  ;;  %4496 = vmatpush2.msra.mxu0 %v3347_v32  ;;  %v4028_v15 = vrot.slane %v5261_v11, %v5763_v12  ;;  %v9437_v13 = vld [vmem:[#allocation74_spill] sm:$0xff] }
 0x568   : > { %4497 = vmatprep.subr.mxu0 %v3344_v55  ;;  %v4077_v55 = vmul.f32 %v4066_v37, %v8425_v57  ;;  %v9439_v11 = vld [vmem:[#allocation78_spill] sm:$0xff] }
 0x569   : > { %4498 = vmatpush2.msra.mxu0 %v3343_v20  ;;  %v3690_v22 = vpop.permute.xlu1 %3689  ;;  %v9438_v20 = vld [vmem:[#allocation75_spill] sm:$0xff] }
 0x56a   : > { %v3693_v45 = vsel %vm1389_vm12, %v8284_v19, %v3690_v22  ;;  %v3699_v8 = vsel %vm1389_vm12, %v3690_v22, %v8296_v31  ;;  %4500 = vmatmul.mubr.f32.vlgmr.msra.gmra.mxu0 %v8642_v7  ;;  %4666 = vmatprep.subr.mxu0 %v9437_v13  ;;  %v3632_v19 = vsel %vm1325_vm13, %v8249_v34, %v3630_v4  ;;  %v3494_v31 = vpop.permute.xlu0 %3493  ;;  %v5262_v22 = vld [vmem:[#allocation3 + $0x45] ss:$8 sm:$0xf]  ;;  %vm9450_vm12 = vmmov %vm9425_vm2 }
 0x56b   : > { %v3725_v32 = vmul.f32 %v8545_v56, %v3693_v45  ;;  %v3726_v42 = vmul.f32 %v8549_v36, %v3699_v8  ;;  %4505 = vmatprep.mubr.f32.mxu0 %v8644_v44  ;;  %4667 = vmatpush1.msra.mxu0 %v4081_v47  ;;  %v4043_v56 = vmul.f32 %v4028_v15, %v8440_v24  ;;  %v9440_v45 = vld [vmem:[#allocation36_spill] sm:$0xff] }
 0x56c   : > { %4668 = vmatprep.subr.mxu0 %v9438_v20  ;;  %v3990_v36 = vrot.slane %v5262_v22, %v5763_v12  ;;  %v3667_v4 = vmul.f32 %v3652_v40, %v3632_v19  ;;  %v4039_v24 = vmul.f32 %v4028_v15, %v8452_v30  ;;  %v3561_v30 = vsel %vm1253_vm14, %v8622_v62, %v8432_v23  ;;  %vm9463_vm14 = vmmov %vm9435_vm0 }
 0x56d   : > { %4623 = vmatprep.subr.mxu1 %v3726_v42  ;;  %v3628_v60 = vpop.permute.xlu1 %3627  ;;  %4669 = vmatpush1.msra.mxu0 %v4077_v55  ;;  %v8693_v15 = vrot.slane %v8578_v48, %v5763_v12  ;;  %v3520_v62 = vrot.slane %v8430_v2, %v5763_v12  ;;  %v3502_v55 = vsel %vm1189_vm15, %v8463_v6, %v3494_v31 }
 0x56e   : > { %v3631_v37 = vsel %vm1325_vm13, %v8294_v54, %v3628_v60  ;;  %v3637_v34 = vsel %vm1325_vm13, %v3628_v60, %v8333_v29  ;;  %4624 = vmatpush2.msra.mxu1 %v3725_v32  ;;  %4670 = vmatprep.subr.mxu0 %v9439_v11  ;;  %v4005_v8 = vmul.f32 %v3990_v36, %v8472_v61  ;;  %v3492_v42 = vpop.permute.xlu0 %3491  ;;  %v9441_v29 = vld [vmem:[#allocation80_spill] sm:$0xff]  ;;  %v9444_v32 = vld [vmem:[#allocation39_spill] sm:$0xff]  ;;  %vm9452_vm13 = vmmov %vm9425_vm2 }
 0x56f   : > { %v3663_v57 = vmul.f32 %v3652_v40, %v3631_v37  ;;  %v3664_v47 = vmul.f32 %v8576_v38, %v3637_v34  ;;  %4625 = vmatprep.subr.mxu1 %v8584_v51  ;;  %4671 = vmatpush1.msra.mxu0 %v4043_v56  ;;  %v4001_v38 = vmul.f32 %v3990_v36, %v8484_v53  ;;  %v9442_v51 = vld [vmem:[#allocation50_spill] sm:$0xff]  ;;  %v9448_v56 = vld [vmem:[#allocation53_spill] sm:$0xff]  ;;  %v9451_v37 = vld [vmem:[#allocation51_spill] sm:$0xff] }
 0x570   : > { %4626 = vmatpush2.msra.mxu1 %v3667_v4  ;;  %4672 = vmatprep.subr.mxu0 %v9440_v45  ;;  %v8697_v53 = vrot.slane %v8578_v48, %v5987_v43  ;;  %v3500_v40 = vsel %vm1189_vm15, %v3494_v31, %v8367_v26  ;;  %v9445_v48 = vld [vmem:[#allocation54_spill] sm:$0xff]  ;;  %v3499_v26 = vsel %vm1189_vm15, %v3492_v42, %v8498_v52  ;;  %v9449_v52 = vld [vmem:[#allocation55_spill] sm:$0xff]  ;;  %v9456_v45 = vld [vmem:[#allocation52_spill] sm:$0xff] }
 0x571   : > { %v3816_v54 = vpop.permute.xlu1 %3815  ;;  %4627 = vmatprep.subr.mxu1 %v3664_v47  ;;  %4673 = vmatpush1.msra.mxu0 %v4039_v24  ;;  %v3458_v20 = vrot.slane %v8496_v16, %v5763_v12  ;;  %v3462_v60 = vrot.slane %v8496_v16, %v5987_v43  ;;  %v3838_v22 = vrot.slane %v9448_v56, %v5763_v12  ;;  %v9455_v24 = vld [vmem:[#allocation60_spill] sm:$0xff] }
 0x572   : > { %4628 = vmatpush2.msra.mxu1 %v3663_v57  ;;  %4674 = vmatprep.subr.mxu0 %v9441_v29  ;;  %v3432_v19 = vpop.permute.xlu0 %3431  ;;  %v3535_v36 = vmul.f32 %v3520_v62, %v3502_v55  ;;  %v3396_v4 = vrot.slane %v8538_v1, %v5763_v12  ;;  %v9453_v57 = vld [vmem:[#allocation49_spill] sm:$0xff] }
 0x573   : > { %4629 = vmatprep.subr.mxu1 %v7376_v35  ;;  %4675 = vmatpush1.msra.mxu0 %v4005_v8  ;;  %v3524_v35 = vrot.slane %v8430_v2, %v5987_v43  ;;  %v9446_v2 = vld [vmem:[#allocation56_spill] sm:$0xff]  ;;  %v3438_v16 = vsel %vm9450_vm12, %v3432_v19, %v8457_v50  ;;  %v9454_v50 = vld [vmem:[#allocation61_spill] sm:$0xff] }
 0x574   : > { %4630 = vmatpush2.msra.mxu1 %v7355_v59  ;;  %4676 = vmatprep.subr.mxu0 %v9442_v51  ;;  %v9443_v59 = vld [vmem:[#allocation79_spill] sm:$0xff]  ;;  %v3818_v11 = vsel %vm1517_vm9, %v9454_v50, %v3816_v54  ;;  %v9458_v51 = vld [vmem:[#allocation58_spill] sm:$0xff]  ;;  %v9462_v55 = vld [vmem:[#allocation65_spill] sm:$0xff] }
 0x575   : > { %v8689_v61 = vpop.permute.xlu1 %3813  ;;  %4631 = vmatprep.subr.mxu1 %v7395_v41  ;;  %4677 = vmatpush1.msra.mxu0 %v4001_v38  ;;  %v8704_v23 = vrot.slane %v9443_v59, %v5763_v12  ;;  %v8715_v13 = vrot.slane %v9443_v59, %v5987_v43  ;;  %v3594_v41 = vmul.f32 %v8593_v49, %v3561_v30  ;;  %v9447_v49 = vld [vmem:[#allocation57_spill] sm:$0xff]  ;;  %v9457_v38 = vld [vmem:[#allocation64_spill] sm:$0xff]  ;;  %v9459_v59 = vld [vmem:[#allocation66_spill] sm:$0xff] }
 0x576   : > { %4632 = vmatpush2.msra.mxu1 %v9444_v32  ;;  %4678 = vmatprep.subr.mxu0 %v9445_v48  ;;  %v3536_v31 = vmul.f32 %v3524_v35, %v3500_v40  ;;  %v3532_v34 = vmul.f32 %v3524_v35, %v3499_v26  ;;  %v3370_v29 = vpop.permute.xlu0 %3369  ;;  %v3776_v30 = vrot.slane %v9457_v38, %v5763_v12  ;;  %v9460_v40 = vld [vmem:[#allocation59_spill] sm:$0xff] }
 0x577   : > { %4633 = vmatprep.subr.mxu1 %v8616_v39  ;;  %4679 = vmatpush1.msra.mxu0 %v9446_v2  ;;  %v3501_v39 = vsel %vm1189_vm15, %v8401_v5, %v3492_v42  ;;  %v3440_v5 = vsel %vm9452_vm13, %v8517_v46, %v3432_v19  ;;  %v3474_v46 = vmul.f32 %v3462_v60, %v3438_v16  ;;  %v8775_v19 = vld [vmem:[#allocation8 + $0x20] sm:$0xff]  ;;  %vm9464_vm15 = vmmov %vm9435_vm0  ;;  %v9468_v16 = vld [vmem:[#allocation73_spill] sm:$0xff] }
 0x578   : > { %4634 = vmatpush2.msra.mxu1 %v8613_v3  ;;  %4680 = vmatprep.subr.mxu0 %v9447_v49  ;;  %v3842_v3 = vrot.slane %v9448_v56, %v5987_v43  ;;  %v3531_v47 = vmul.f32 %v3520_v62, %v3501_v39  ;;  %v3400_v42 = vrot.slane %v8538_v1, %v5987_v43  ;;  %v9461_v1 = vld [vmem:[#allocation22_spill] sm:$0xff] }
 0x579   : > { %v3754_v6 = vpop.permute.xlu1 %3753  ;;  %4635 = vmatprep.subr.mxu1 %v3594_v41  ;;  %4681 = vmatpush1.msra.mxu0 %v9449_v52  ;;  %v3473_v35 = vmul.f32 %v3458_v20, %v3440_v5  ;;  %v3780_v62 = vrot.slane %v9457_v38, %v5987_v43  ;;  %v3314_v32 = vsel %vm997_vm11, %v9461_v1, %v8535_v0  ;;  %v9465_v49 = vld [vmem:[#allocation62_spill] sm:$0xff]  ;;  %v9479_v1 = vld [vmem:[#allocation44_spill] sm:$0xff] }
 0x57a   : > { %4636 = vmatpush2.msra.mxu1 %v8633_v18  ;;  %4682 = vmatprep.subr.mxu0 %v9451_v37  ;;  %v3824_v18 = vsel %vm1517_vm9, %v3816_v54, %v9455_v24  ;;  %v3823_v54 = vsel %vm1517_vm9, %v8689_v61, %v9459_v59  ;;  %v3853_v48 = vmul.f32 %v3838_v22, %v3818_v11  ;;  %v9467_v52 = vld [vmem:[#allocation18_spill] sm:$0xff]  ;;  %v9472_v24 = vld [vmem:[#allocation71_spill] sm:$0xff] }
 0x57b   : > { %4637 = vmatprep.subr.mxu1 %v3536_v31  ;;  %4683 = vmatpush1.msra.mxu0 %v9453_v57  ;;  %v3854_v41 = vmul.f32 %v3842_v3, %v3824_v18  ;;  %v3376_v2 = vsel %vm9463_vm14, %v3370_v29, %v8514_v28  ;;  %v3378_v26 = vsel %vm9464_vm15, %v8567_v63, %v3370_v29  ;;  %v9466_v31 = vld [vmem:[#allocation70_spill] sm:$0xff] }
 0x57c   : > { %4638 = vmatpush2.msra.mxu1 %v3535_v36  ;;  %4684 = vmatprep.subr.mxu0 %v9456_v45  ;;  %v3817_v0 = vsel %vm1517_vm9, %v9465_v49, %v8689_v61  ;;  %v3850_v56 = vmul.f32 %v3842_v3, %v3823_v54  ;;  %v3762_v36 = vsel %vm1453_vm10, %v3754_v6, %v9467_v52  ;;  %v9470_v61 = vld [vmem:[#allocation67_spill] sm:$0xff]  ;;  %vm9473_vm9 = vmmov %vm9435_vm0  ;;  %v9478_v54 = vld [vmem:[#allocation81_spill] sm:$0xff] }
 0x57d   : > { %v3752_v8 = vpop.permute.xlu1 %3751  ;;  %4639 = vmatprep.subr.mxu1 %v3532_v34  ;;  %4685 = vmatpush1.msra.mxu0 %v9458_v51  ;;  %v3756_v37 = vsel %vm1453_vm10, %v9470_v61, %v3754_v6  ;;  %v3411_v5 = vmul.f32 %v3396_v4, %v3378_v26  ;;  %v3849_v57 = vmul.f32 %v3838_v22, %v3817_v0  ;;  %v9484_v26 = vld [vmem:[#allocation26_spill] sm:$0xff] }
 0x57e   : > { %4640 = vmatpush2.msra.mxu1 %v3531_v47  ;;  %4686 = vmatprep.subr.mxu0 %v9460_v40  ;;  %v9471_v47 = vld [vmem:[#allocation20_spill] sm:$0xff]  ;;  %v3792_v11 = vmul.f32 %v3780_v62, %v3762_v36  ;;  %v3791_v6 = vmul.f32 %v3776_v30, %v3756_v37 }
 0x57f   : > { %4641 = vmatprep.subr.mxu1 %v3474_v46  ;;  %4687 = vmatpush1.msra.mxu0 %v9462_v55  ;;  %v3761_v50 = vsel %vm1453_vm10, %v3752_v8, %v9471_v47 }
 0x580   : > { %4642 = vmatpush2.msra.mxu1 %v3473_v35  ;;  %4688 = vmatprep.subr.mxu0 %v9466_v31  ;;  %v3788_v45 = vmul.f32 %v3780_v62, %v3761_v50  ;;  %v4196_v35 = vmul.f32 %v8715_v13, %v8611_v9  ;;  %v4192_v9 = vmul.f32 %v8715_v13, %v8639_v21  ;;  %v9486_v31 = vld [vmem:[#allocation32_spill] sm:$0xff] }
 0x581   : > { %v3430_v39 = vpop.permute.xlu1 %3429  ;;  %4689 = vmatpush1.msra.mxu0 %v9468_v16  ;;  %v3345_v62 = vmul.f32 %v8693_v15, %v9478_v54 }
 0x582   : > { %v3437_v28 = vsel %vm9425_vm2, %v3430_v39, %v8540_v58  ;;  %v3439_v63 = vsel %vm9469_vm3, %v8487_v27, %v3430_v39  ;;  %4690 = vmatprep.subr.mxu0 %v3854_v41  ;;  %4506 = vmatmul.mubr.f32.gmra.mxu0 %v8775_v19  ;;  %v5263_v58 = vld [vmem:[#allocation8 + $0x18] sm:$0xff]  ;;  %v3412_v27 = vmul.f32 %v3400_v42, %v3376_v2  ;;  %v9483_v2 = vld [vmem:[#allocation37_spill] sm:$0xff] }
 0x583   : > { %v3469_v34 = vmul.f32 %v3458_v20, %v3439_v63  ;;  %v3470_v3 = vmul.f32 %v3462_v60, %v3437_v28  ;;  %4691 = vmatpush1.msra.mxu0 %v3853_v48  ;;  %5094 = vmatprep.mubr.msk.f32.mxu0 %vm2140_vm6, %v5263_v58  ;;  %v3755_v20 = vsel %vm1453_vm10, %v9472_v24, %v3752_v8  ;;  %v9475_v8 = vld [vmem:[#allocation84_spill] sm:$0xff]  ;;  %v9480_v48 = vld [vmem:[#allocation82_spill] sm:$0xff] }
 0x584   : > { %4692 = vmatprep.subr.mxu0 %v3850_v56  ;;  %v3313_v38 = vsel %vm997_vm11, %v9475_v8, %v8629_v33  ;;  %v3787_v51 = vmul.f32 %v3776_v30, %v3755_v20  ;;  %v4195_v33 = vmul.f32 %v8704_v23, %v3314_v32  ;;  %v4108_v41 = vrot.slane %v9480_v48, %v5987_v43 }
 0x585   : > { %4643 = vmatprep.subr.mxu1 %v3470_v3  ;;  %v3368_v60 = vpop.permute.xlu1 %3367  ;;  %4693 = vmatpush1.msra.mxu0 %v3849_v57  ;;  %v3346_v30 = vmul.f32 %v8697_v53, %v3313_v38  ;;  %v4191_v40 = vmul.f32 %v8704_v23, %v3313_v38  ;;  %v4104_v21 = vrot.slane %v9480_v48, %v5763_v12 }
 0x586   : > { %v3375_v22 = vsel %vm9473_vm9, %v3368_v60, %v8605_v25  ;;  %v3377_v18 = vsel %vm9474_vm5, %v8526_v17, %v3368_v60  ;;  %4644 = vmatpush2.msra.mxu1 %v3469_v34  ;;  %4694 = vmatprep.subr.mxu0 %v3792_v11  ;;  %v3350_v25 = vmul.f32 %v8697_v53, %v3314_v32  ;;  %v9476_v17 = vld [vmem:[#allocation24_spill] sm:$0xff]  ;;  %v9481_v53 = vld [vmem:[#allocation85_spill] sm:$0xff] }
 0x587   : > { %v3407_v46 = vmul.f32 %v3396_v4, %v3377_v18  ;;  %v3408_v29 = vmul.f32 %v3400_v42, %v3375_v22  ;;  %4645 = vmatprep.subr.mxu1 %v3412_v27  ;;  %4695 = vmatpush1.msra.mxu0 %v3791_v6  ;;  %v4146_v4 = vrot.slane %v9476_v17, %v5987_v43  ;;  %v9477_v42 = vld [vmem:[#allocation83_spill] sm:$0xff] }
 0x588   : > { %4646 = vmatpush2.msra.mxu1 %v3411_v5  ;;  %4696 = vmatprep.subr.mxu0 %v3788_v45  ;;  %v3349_v59 = vmul.f32 %v8693_v15, %v9477_v42  ;;  %v4142_v10 = vrot.slane %v9476_v17, %v5763_v12  ;;  %v9482_v15 = vld [vmem:[#allocation48_spill] sm:$0xff]  ;;  %v4120_v43 = vmul.f32 %v4108_v41, %v9483_v2  ;;  %v9485_v12 = vld [vmem:[#allocation46_spill] sm:$0xff] }
 0x589   : > { %4647 = vmatprep.subr.mxu1 %v3408_v29  ;;  %4697 = vmatpush1.msra.mxu0 %v3787_v51  ;;  %v4158_v32 = vmul.f32 %v4146_v4, %v9479_v1  ;;  %v4154_v13 = vmul.f32 %v4146_v4, %v9482_v15  ;;  %v4119_v49 = vmul.f32 %v4104_v21, %v9484_v26 }
 0x58a   : > { %4648 = vmatpush2.msra.mxu1 %v3407_v46  ;;  %4718 = vmatprep.subr.mxu0 %v4196_v35  ;;  %v4157_v55 = vmul.f32 %v4142_v10, %v9481_v53  ;;  %v4153_v23 = vmul.f32 %v4142_v10, %v8362_v14  ;;  %v4116_v0 = vmul.f32 %v4108_v41, %v9485_v12  ;;  %v9487_v14 = vld [vmem:[#allocation16_spill] sm:$0xff]  ;;  %v2798_v41 = vld [vmem:[%s9001_s6 + $0x8] sm:$0xff] }
 0x58b   : > { %4649 = vmatprep.subr.mxu1 %v3350_v25  ;;  %4719 = vmatpush2.msra.mxu0 %v4195_v33  ;;  %v4115_v39 = vmul.f32 %v4104_v21, %v9486_v31  ;;  %v2797_v53 = vld [vmem:[%s9001_s6] sm:$0xff] }
 0x58c   : > { %4650 = vmatpush2.msra.mxu1 %v3349_v59  ;;  %4720 = vmatprep.subr.mxu0 %v4192_v9  ;;  %v2799_v21 = vld [vmem:[%s9002_s7] sm:$0xff] }
 0x58d   : > { %4651 = vmatprep.subr.mxu1 %v3346_v30  ;;  %4721 = vmatpush2.msra.mxu0 %v4191_v40 }
 0x58e   : > { %4652 = vmatpush2.msra.mxu1 %v3345_v62  ;;  %4722 = vmatprep.subr.mxu0 %v4158_v32 }
 0x58f   : > { %4654 = vmatmul.mubr.f32.vlgmr.msra.gmra.mxu1 %v8642_v7  ;;  %4723 = vmatpush2.msra.mxu0 %v4157_v55  ;;  %v9488_v7 = vld [vmem:[#allocation31_spill] sm:$0xff]  ;;  %v2800_v55 = vld [vmem:[%s9002_s7 + $0x8] sm:$0xff] }
 0x590   : > { %4659 = vmatprep.mubr.f32.mxu1 %v8644_v44  ;;  %4724 = vmatprep.subr.mxu0 %v4154_v13  ;;  %v9489_v44 = vld [vmem:[#allocation86_spill] sm:$0xff] }
 0x591   : > { %4725 = vmatpush2.msra.mxu0 %v4153_v23 }
 0x592   : > { %4726 = vmatprep.subr.mxu0 %v4120_v43 }
 0x593   : > { %4660 = vmatmul.mubr.f32.gmra.mxu1 %v8775_v19  ;;  %4727 = vmatpush2.msra.mxu0 %v4119_v49 }
 0x594   : > { %4728 = vmatprep.subr.mxu0 %v4116_v0 }
 0x595   : > { %4729 = vmatpush2.msra.mxu0 %v4115_v39 }
 0x596   : > { %4731 = vmatmul.mubr.f32.vlgmr.msra.gmra.mxu0 %v9487_v14 }
 0x597   : > { %5095 = vmatprep.mubr.msk.f32.mxu0 %vm2140_vm6, %v9488_v7  ;;  %vm4862_vm6 = vcmask 64512  }
 0x59a   : > { %4737 = vmatmul.mubr.f32.gmra.mxu0 %v9489_v44 }
 0x5f6   : > { %v4578_v56 = vpop.f32.mrf.mxu1 }
 0x5f8   : > { %v4580_v52 = vpop.f32.mrf.mxu1 }
 0x5fa   : > { %v4584_v16 = vpop.f32.mrf.mxu1 }
 0x5fc   : > { %v4586_v63 = vpop.f32.mrf.mxu1 }
 0x62a   : > { %v4501_v36 = vpop.f32.mrf.mxu0 }
 0x62b   : > { %v8856_v37 = vadd.f32 %v4578_v56, %v4501_v36 }
 0x62c   : > { %v4503_v28 = vpop.f32.mrf.mxu0 }
 0x62d   : > { %v8854_v61 = vadd.f32 %v4580_v52, %v4503_v28  ;;  %v4760_v57 = vmul.f32 %v8856_v37, %v8856_v37 }
 0x62f   : > { %v4761_v3 = vmul.f32 %v8854_v61, %v8854_v61  ;;  %v4743_v58 = vadd.f32 %v8854_v61, %v8856_v37 }
 0x631   : > { %v4768_v11 = vadd.f32 %v4761_v3, %v4760_v57 }
 0x642   : > { %v4507_v19 = vpop.f32.mrf.mxu0 }
 0x643   : > { %v8866_v60 = vadd.f32 %v4584_v16, %v4507_v19 }
 0x644   : > { %v4509_v5 = vpop.f32.mrf.mxu0 }
 0x645   : > { %v8873_v45 = vadd.f32 %v4586_v63, %v4509_v5  ;;  %v4764_v17 = vmul.f32 %v8866_v60, %v8866_v60 }
 0x647   : > { %v4765_v59 = vmul.f32 %v8873_v45, %v8873_v45 }
 0x64f   : > { %v4655_v34 = vpop.f32.mrf.mxu1 }
 0x651   : > { %v4657_v47 = vpop.f32.mrf.mxu1 }
 0x653   : > { %v4661_v20 = vpop.f32.mrf.mxu1 }
 0x655   : > { %v4663_v25 = vpop.f32.mrf.mxu1 }
 0x656   : > { %v4732_v50 = vpop.f32.mrf.mxu0 }
 0x657   : > { %v8864_v27 = vadd.f32 %v4732_v50, %v4655_v34 }
 0x658   : > { %v4734_v24 = vpop.f32.mrf.mxu0 }
 0x659   : > { %v4744_v6 = vadd.f32 %v4743_v58, %v8864_v27  ;;  %v4762_v22 = vmul.f32 %v8864_v27, %v8864_v27  ;;  %v8871_v18 = vadd.f32 %v4734_v24, %v4657_v47 }
 0x65a   : > { %v4738_v46 = vpop.f32.mrf.mxu0 }
 0x65b   : > { %v4769_v29 = vadd.f32 %v4768_v11, %v4762_v22  ;;  %v4745_v8 = vadd.f32 %v4744_v6, %v8871_v18  ;;  %v4763_v38 = vmul.f32 %v8871_v18, %v8871_v18  ;;  %v8878_v51 = vadd.f32 %v4738_v46, %v4661_v20 }
 0x65c   : > { %v4740_v35 = vpop.f32.mrf.mxu0 }
 0x65d   : > { %v4746_v4 = vadd.f32 %v4745_v8, %v8866_v60  ;;  %v4770_v42 = vadd.f32 %v4769_v29, %v4763_v38  ;;  %v4766_v30 = vmul.f32 %v8878_v51, %v8878_v51  ;;  %v4741_v9 = vadd.f32 %v4740_v35, %v4663_v25 }
 0x65f   : > { %v4771_v10 = vadd.f32 %v4770_v42, %v4764_v17  ;;  %v4747_v33 = vadd.f32 %v4746_v4, %v8873_v45  ;;  %v4767_v40 = vmul.f32 %v4741_v9, %v4741_v9 }
 0x661   : > { %v4748_v54 = vadd.f32 %v4747_v33, %v8878_v51  ;;  %v4772_v62 = vadd.f32 %v4771_v10, %v4765_v59 }
 0x663   : > { %v4749_v1 = vadd.f32 %v4748_v54, %v4741_v9  ;;  %v4773_v32 = vadd.f32 %v4772_v62, %v4766_v30 }
 0x665   : > { %4750 = vadd.xlane.f32.xlu0 %v4749_v1  ;;  %v4774_v48 = vadd.f32 %v4773_v32, %v4767_v40 }
 0x667   : > { %4775 = vadd.xlane.f32.xlu1 %v4774_v48 }
 0x678   : > { %4816 = vperm.xlu1 %5209, %v2798_v41   ;;  %v4859_v41 = vld [vmem:[%s9003_s8 + $0x8] sm:$0xff] }
 0x67b   : > { %4811 = vperm.xlu0 %5208, %v2797_v53  }
 0x67c   : > { %4834 = vperm.xlu1 %5209, %v2800_v55  }
 0x67f   : > { %4829 = vperm.xlu0 %5208, %v2799_v21   ;;  %v4858_v21 = vld [vmem:[%s9003_s8] sm:$0xff] }
 0x6ee   : > { %v4751_v15 = vpop.xlane.xlu0 %4750 }
 0x6ef   : > { %v4752_v13 = vrot.slane %v4751_v15, 4 }
 0x6f0   : > { %v4776_v23 = vpop.xlane.xlu1 %4775 }
 0x6f1   : > { %v4753_v2 = vadd.f32 %v4752_v13, %v4751_v15  ;;  %v4777_v43 = vrot.slane %v4776_v23, 4 }
 0x6f3   : > { %v4754_v26 = vrot.slane %v4753_v2, 2  ;;  %v4778_v49 = vadd.f32 %v4777_v43, %v4776_v23 }
 0x6f4   : > { %v4817_v16 = vpop.permute.xlu1 %4816 }
 0x6f5   : > { %v4779_v12 = vrot.slane %v4778_v49, 2  ;;  %v4755_v0 = vadd.f32 %v4754_v26, %v4753_v2 }
 0x6f6   : > { %v4812_v63 = vpop.permute.xlu0 %4811 }
 0x6f7   : > { %v4756_v31 = vrot.slane %v4755_v0, 1  ;;  %v4780_v39 = vadd.f32 %v4779_v12, %v4778_v49 }
 0x6f9   : > { %v4757_v14 = vadd.f32 %v4756_v31, %v4755_v0  ;;  %v4781_v7 = vrot.slane %v4780_v39, 1 }
 0x6fb   : > { %5110 = vpush %v4757_v14  ;;  %v4782_v44 = vadd.f32 %v4781_v7, %v4780_v39  ;;  %v4872_v7 = vld [vmem:[%s9004_s9] sm:$0x1] }
 0x6fd   : > { %5112 = vpush %v4782_v44 }
 0x72c   : > { %s5111_s30 = spop %5110 }
 0x72d   : > { %s4759_s29 = smul.f32 0.00012207031, %s5111_s30  ;;  %s448_s30 = sand.u32 1, %s5410_s22  }
 0x72e   : > { %s5113_s23 = spop %5112 }
 0x72f   : > { %s4785_s18 = smul.f32 %s4759_s29, %s4759_s29  ;;  %v4787_v36 = vstv %s4759_s29  ;;  %s5077_s29 = sshll.u32 %s448_s30, 6 }
 0x730   : > { %s4784_s17 = smul.f32 0.00012207031, %s5113_s23  ;;  %v4792_v28 = vsub.f32 %v8866_v60, %v4787_v36  ;;  %v4793_v19 = vsub.f32 %v8873_v45, %v4787_v36  ;;  %v4794_v34 = vsub.f32 %v8878_v51, %v4787_v36  ;;  %v4795_v3 = vsub.f32 %v4741_v9, %v4787_v36  ;;  %v4835_v51 = vpop.permute.xlu1 %4834  ;;  %s450_s23 = scalar_lea.vmem [#allocation9], %s5077_s29 }
 0x731   : > { %v4788_v5 = vsub.f32 %v8856_v37, %v4787_v36  ;;  %v4789_v47 = vsub.f32 %v8854_v61, %v4787_v36  ;;  %v4790_v50 = vsub.f32 %v8864_v27, %v4787_v36  ;;  %v4791_v58 = vsub.f32 %v8871_v18, %v4787_v36  ;;  %v4830_v61 = vpop.permute.xlu0 %4829  ;;  %s5356_s29 = scalar_lea.vmem %s5355_s19, 2048 }
 0x732   : > { %s4786_s16 = ssub.f32 %s4784_s17, %s4785_s18  ;;  %s4974_s18 = sshll.u32 %s450_s23, 4  ;;  %s8947_s18 = int_to_ptr.vmem [resolvable:$true] %s4974_s18 }
 0x733   : > { %s5103_s17 = sshll.u32 %s5532_s25, 10  ;;  %s8955_s25 = scalar_lea.sflag [#allocation5], %s448_s30 }
 0x734   : > { %s4796_s27 = sadd.f32 1e-05, %s4786_s16  ;;  %s5350_s15 = scalar_lea.vmem %s8947_s18, 1024 }
 0x735   : > { %p5351_p10 = scmp.ne.s32.totalorder %s8947_s18, %s5350_s15  ;;  %p5357_p7 = scmp.lt.s32.totalorder %s8947_s18, %s5355_s19 }
 0x736   : > { %v4797_v56 = vstv %s4796_s27  ;;  %p5358_p8 = scmp.lt.s32.totalorder %s5356_s29, %s5350_s15 }
 0x737   : > { %5228 = vrsqrt.f32 %v4797_v56  ;;  %p5352_p2 = pnand %p5351_p10, %p9491_p12 }
 0x738   : > { %p5359_p11 = por %p5358_p8, %p5357_p7 }
 0x739   : > { %p5353_p4 = pneg %p5352_p2 }
 0x73b   : > { %p5360_p0 = pnand %p5359_p11, %p5353_p4 }
 0x744   : > { %v5229_v52 = vpop.eup %5228 }
 0x745   : > { %5114 = vpush %v5229_v52 }
 0x776   : > { %s5115_s20 = spop %5114 }
 0x777   : > { %v4800_v57 = vstv %s5115_s20  ;;  %s8945_s20 = scalar_lea.hbm %s9007_s12, %s5103_s17 }
 0x778   : > { %v4805_v11 = vmul.f32 %v4800_v57, %v4792_v28  ;;  %v4806_v24 = vmul.f32 %v4800_v57, %v4793_v19  ;;  %v4807_v20 = vmul.f32 %v4800_v57, %v4794_v34  ;;  %v4808_v60 = vmul.f32 %v4800_v57, %v4795_v3 }
 0x779   : > { %v4801_v6 = vmul.f32 %v4800_v57, %v4788_v5  ;;  %v4802_v22 = vmul.f32 %v4800_v57, %v4789_v47  ;;  %v4803_v46 = vmul.f32 %v4800_v57, %v4790_v50  ;;  %v4804_v45 = vmul.f32 %v4800_v57, %v4791_v58 }
 0x77a   : > { %v4823_v29 = vmul.f32 %v4817_v16, %v4805_v11  ;;  %v4824_v8 = vmul.f32 %v4817_v16, %v4806_v24  ;;  %v4825_v38 = vmul.f32 %v4817_v16, %v4807_v20  ;;  %v4826_v17 = vmul.f32 %v4817_v16, %v4808_v60 }
 0x77b   : > { %v4819_v37 = vmul.f32 %v4812_v63, %v4801_v6  ;;  %v4820_v25 = vmul.f32 %v4812_v63, %v4802_v22  ;;  %v4821_v35 = vmul.f32 %v4812_v63, %v4803_v46  ;;  %v4822_v18 = vmul.f32 %v4812_v63, %v4804_v45 }
 0x77c   : > { %v4841_v27 = vadd.f32 %v4835_v51, %v4823_v29  ;;  %v4842_v4 = vadd.f32 %v4835_v51, %v4824_v8  ;;  %v4843_v10 = vadd.f32 %v4835_v51, %v4825_v38  ;;  %v4844_v54 = vadd.f32 %v4835_v51, %v4826_v17  ;;  %v4904_v17 = vld [vmem:[%s9005_s10] sm:$0xff] }
 0x77d   : > { %v4837_v42 = vadd.f32 %v4830_v61, %v4819_v37  ;;  %v4838_v59 = vadd.f32 %v4830_v61, %v4820_v25  ;;  %v4839_v30 = vadd.f32 %v4830_v61, %v4821_v35  ;;  %v4840_v40 = vadd.f32 %v4830_v61, %v4822_v18  ;;  %v4905_v18 = vld [vmem:[%s9005_s10 + $0x8] sm:$0xff] }
 0x77e   : > { %v4850_v33 = vadd.f32 %v4842_v4, %v4841_v27  ;;  %v9490_v27 = vld [vmem:[#allocation17_spill] sm:$0xff] }
 0x77f   : > { %v4845_v9 = vadd.f32 %v4838_v59, %v4837_v42 }
 0x780   : > { %v4851_v62 = vadd.f32 %v4850_v33, %v4843_v10 }
 0x781   : > { %v4846_v1 = vadd.f32 %v4845_v9, %v4839_v30  ;;  %v4918_v30 = vld [vmem:[%s9006_s11] sm:$0xff] }
 0x782   : > { %v4852_v32 = vadd.f32 %v4851_v62, %v4844_v54  ;;  %v4919_v62 = vld [vmem:[%s9006_s11 + $0x8] sm:$0xff] }
 0x783   : > { %v4847_v48 = vadd.f32 %v4846_v1, %v4840_v40 }
 0x784   : > { %4853 = vadd.xlane.f32.xlu1 %v4852_v32 }
 0x785   : > { %4848 = vadd.xlane.f32.xlu0 %v4847_v48 }
 0x80d   : > { %v4854_v53 = vpop.xlane.xlu1 %4853 }
 0x80e   : > { %v4857_v55 = vmul.f32 0.001953125, %v4854_v53  ;;  %v4849_v15 = vpop.xlane.xlu0 %4848 }
 0x80f   : > { %v4856_v13 = vmul.f32 0.001953125, %v4849_v15 }
 0x810   : > { %v4861_v23 = vmul.f32 %v4859_v41, %v4857_v55 }
 0x811   : > { %v4860_v2 = vmul.f32 %v4858_v21, %v4856_v13 }
 0x812   : > { %v4864_v43 = vsel %vm4862_vm6, %v4861_v23, 0.0 }
 0x813   : > { %v4863_v26 = vsel %vm4862_vm6, %v4860_v2, 0.0 }
 0x814   : > { %v4865_v49 = vadd.f32 %v4864_v43, %v4863_v26  ;;  %v5264_v26 = vld [vmem:[%s5613_s28] sm:$0xff] }
 0x816   : > { %v4866_v12 = vrot.slane %v4865_v49, 4 }
 0x818   : > { %v4867_v0 = vadd.f32 %v4866_v12, %v4865_v49  ;;  %v5265_v12 = vld [vmem:[%s5613_s28 + $0x8] sm:$0xff] }
 0x81a   : > { %v4868_v31 = vrot.slane %v4867_v0, 2 }
 0x81c   : > { %v4869_v39 = vadd.f32 %v4868_v31, %v4867_v0  ;;  %v5266_v31 = vld [vmem:[%s5613_s28 + $0x10] sm:$0xff] }
 0x81e   : > { %v4870_v14 = vrot.slane %v4869_v39, 1 }
 0x820   : > { %v4871_v44 = vadd.f32 %v4870_v14, %v4869_v39  ;;  %v5267_v14 = vld [vmem:[%s5613_s28 + $0x18] sm:$0xff] }
 0x822   : > { %v4873_v56 = vadd.f32 %v4872_v7, %v4871_v44 }
 0x824   : > { %v4875_v52 = vmul.f32 0.70710677, %v4873_v56  ;;  %v4874_v25 = vmul.f32 0.5, %v4873_v56  ;;  %v5268_v56 = vld [vmem:[%s5613_s28 + $0x20] sm:$0xff] }
 0x826   : > { %v5096_v36 = vclamps-f32 %v4875_v52, 4.0 }
 0x828   : > { %v4878_v16 = vmul.f32 %v5096_v36, %v5096_v36 }
 0x82a   : > { %v4879_v28 = vmul.f32 -2.7261424e-10, %v4878_v16  ;;  %v4892_v63 = vmul.f32 -1.45660715e-05, %v4878_v16 }
 0x82c   : > { %v4880_v19 = vadd.f32 2.7706815e-08, %v4879_v28  ;;  %v4893_v34 = vadd.f32 -0.00021337405, %v4892_v63  ;;  %v5270_v28 = vld [vmem:[%s5613_s28 + $0x30] sm:$0xff] }
 0x82e   : > { %v4881_v3 = vmul.f32 %v4880_v19, %v4878_v16  ;;  %v4894_v5 = vmul.f32 %v4893_v34, %v4878_v16  ;;  %v5271_v19 = vld [vmem:[%s5613_s28 + $0x38] sm:$0xff] }
 0x830   : > { %v4882_v57 = vadd.f32 -2.101024e-06, %v4881_v3  ;;  %v4895_v47 = vadd.f32 -0.001682827, %v4894_v5 }
 0x832   : > { %v4883_v50 = vmul.f32 %v4882_v57, %v4878_v16  ;;  %v4896_v58 = vmul.f32 %v4895_v47, %v4878_v16 }
 0x834   : > { %v4884_v11 = vadd.f32 -5.6925062e-05, %v4883_v50  ;;  %v4897_v24 = vadd.f32 -0.0073733293, %v4896_v58 }
 0x836   : > { %v4885_v20 = vmul.f32 %v4884_v11, %v4878_v16  ;;  %v4898_v60 = vmul.f32 %v4897_v24, %v4878_v16 }
 0x838   : > { %v4886_v6 = vadd.f32 -0.00073499064, %v4885_v20  ;;  %v4899_v22 = vadd.f32 -0.014264739, %v4898_v60 }
 0x83a   : > { %v4887_v46 = vmul.f32 %v4886_v6, %v4878_v16  ;;  %5230 = vrcp.f32 %v4899_v22 }
 0x83c   : > { %v4888_v45 = vadd.f32 -0.0029546, %v4887_v46 }
 0x83e   : > { %v4889_v29 = vmul.f32 %v4888_v45, %v4878_v16 }
 0x840   : > { %v4890_v8 = vadd.f32 -0.016096033, %v4889_v29 }
 0x842   : > { %v4891_v38 = vmul.f32 %v5096_v36, %v4890_v8  ;;  %v5269_v36 = vld [vmem:[%s5613_s28 + $0x28] sm:$0xff] }
 0x847   : > { %v5231_v51 = vpop.eup %5230 }
 0x848   : > { %v4901_v37 = vmul.f32 %v5231_v51, %v4891_v38 }
 0x84a   : > { %v4902_v35 = vadd.f32 1.0, %v4901_v37 }
 0x84c   : > { %v4903_v61 = vmul.f32 %v4902_v35, %v4874_v25 }
 0x84e   : > { %v4909_v4 = vrot.slane %v4903_v61, %v9490_v27 }
 0x850   : > { %v4910_v42 = vmul.f32 %v4909_v4, %v4904_v17  ;;  %v4911_v10 = vmul.f32 %v4909_v4, %v4905_v18 }
 0x852   : > { %v4912_v59 = vsel %vm4862_vm6, %v4910_v42, 0.0  ;;  %v4915_v33 = vsel %vm4862_vm6, %v4911_v10, 0.0 }
 0x853   : > { %4913 = vadd.xlane.f32.xlu0 %v4912_v59 }
 0x857   : > { %4916 = vadd.xlane.f32.xlu0 %v4915_v33 }
 0x8dc   : > { %v4914_v9 = vpop.xlane.xlu0 %4913 }
 0x8dd   : > { %v4920_v54 = vadd.f32 %v4918_v30, %v4914_v9 }
 0x8df   : > { %v4922_v40 = vsub.f32 0.0, %v4920_v54 }
 0x8e0   : > { %v4917_v1 = vpop.xlane.xlu0 %4916 }
 0x8e1   : > { %v4924_v32 = vmul.f32 1.442695, %v4922_v40  ;;  %v4921_v48 = vadd.f32 %v4919_v62, %v4917_v1 }
 0x8e3   : > { %5232 = vpow2.f32 %v4924_v32  ;;  %v4923_v41 = vsub.f32 0.0, %v4921_v48 }
 0x8e5   : > { %v4926_v53 = vmul.f32 1.442695, %v4923_v41 }
 0x8e7   : > { %5234 = vpow2.f32 %v4926_v53 }
 0x8f0   : > { %v5233_v55 = vpop.eup %5232 }
 0x8f1   : > { %v4928_v21 = vadd.f32 1.0, %v5233_v55 }
 0x8f3   : > { %5236 = vrcp.f32 %v4928_v21 }
 0x8f4   : > { %v5235_v15 = vpop.eup %5234 }
 0x8f5   : > { %v4929_v13 = vadd.f32 1.0, %v5235_v15 }
 0x8f7   : > { %5238 = vrcp.f32 %v4929_v13 }
 0x900   : > { %v5237_v23 = vpop.eup %5236 }
 0x901   : > { %4936 = vperm.xlu1 %5209, %v5237_v23  }
 0x904   : > { %v5239_v2 = vpop.eup %5238 }
 0x905   : > { %4941 = vperm.xlu0 %5208, %v5239_v2  }
 0x97c   : > { %v4937_v43 = vpop.permute.xlu1 %4936 }
 0x97d   : > { %v4944_v49 = vadd.f32 %v5264_v26, %v4937_v43  ;;  %v4945_v0 = vadd.f32 %v5265_v12, %v4937_v43  ;;  %v4946_v39 = vadd.f32 %v5266_v31, %v4937_v43  ;;  %v4947_v7 = vadd.f32 %v5267_v14, %v4937_v43 }
 0x97f   : > { %4952 = vst [vmem:[%s450_s23] sm:$0xff] %v4944_v49  ;;  %4953 = vst [vmem:[%s450_s23 + $0x8] sm:$0xff] %v4945_v0 }
 0x980   : > { %4954 = vst [vmem:[%s450_s23 + $0x10] sm:$0xff] %v4946_v39  ;;  %4955 = vst [vmem:[%s450_s23 + $0x18] sm:$0xff] %v4947_v7  ;;  %v4942_v44 = vpop.permute.xlu0 %4941 }
 0x981   : > { %v4948_v52 = vadd.f32 %v5268_v56, %v4942_v44  ;;  %v4949_v16 = vadd.f32 %v5269_v36, %v4942_v44  ;;  %v4950_v63 = vadd.f32 %v5270_v28, %v4942_v44  ;;  %v4951_v34 = vadd.f32 %v5271_v19, %v4942_v44 }
 0x983   : > { %4956 = vst [vmem:[%s450_s23 + $0x20] sm:$0xff] %v4948_v52  ;;  %4957 = vst [vmem:[%s450_s23 + $0x28] sm:$0xff] %v4949_v16 }
 0x984   : > { %4958 = vst [vmem:[%s450_s23 + $0x30] sm:$0xff] %v4950_v63  ;;  %4959 = vst [vmem:[%s450_s23 + $0x38] sm:$0xff] %v4951_v34 }
 0x985   : > { %5363 = shalt.err (!%p5360_p0)
}
 0x986   : > { %s5364_s28 = scalar_lea.hbm %s8945_s20, 1024  ;;  %s5368_s17 = scalar_lea.hbm %s9007_s12, 2048 }
 0x987   : > { %p5365_p6 = scmp.ne.s32.totalorder %s8945_s20, %s5364_s28  ;;  %p5369_p1 = scmp.lt.s32.totalorder %s8945_s20, %s9007_s12 }
 0x988   : > { %p5370_p5 = scmp.lt.s32.totalorder %s5368_s17, %s5364_s28 }
 0x989   : > { %p5366_p9 = pnand %p5365_p6, %p9491_p12 }
 0x98a   : > { %p5371_p3 = por %p5370_p5, %p5369_p1 }
 0x98b   : > { %p5367_p13 = pneg %p5366_p9 }
 0x98d   : > { %p5372_p10 = pnand %p5371_p3, %p5367_p13 }
 0x98f   : > { %5375 = shalt.err (!%p5372_p10)
}
 0x990   : > { %s5444_s15 = smov 512   ;;  %s5445_s26 = smov 32  }
 0x991   : > { %5128 = dma.vmem_to_hbm [thread:$0]  (%p9491_p12), %s8947_s18, 1024, %s8945_s20, %s8955_s25, %s5444_s15, %s5444_s15, %s5445_s26  }
 0x992 PF: > { %p5150_p2 = scmp.ge.s32.totalorder %s5418_s24, 2  ;;  %s4989_s19 = sand.u32 1, %s5406_s21  }
 0x993   : > { %p9492_p4 = scmp.ne.s32.totalorder %s9156_s14, 0  ;;  %s4990_s29 = scalar_lea.sflag [#allocation5], %s4989_s19 }
 0x995   : > { %p5141_p7 = pnand %p5150_p2, %p9492_p4 }
 0x997   : > { %p5142_p8 = pneg %p5141_p7 }
 0x999   : > { %5401 = dma.done.wait (%p5142_p8), %s4990_s29, 1024  }
 0x99a   : > { %5403 = vsyncadd (%p5142_p8), %s4990_s29, 4294966272  ;;  %s9493_s24 = sld [smem:[#allocation14_spill]]  ;;  %s9496_s21 = smov %s5410_s22 }
 0x99b   : > { %s9494_s28 = sld [smem:[#allocation13_spill]] }
 0x99c   : > { %s9495_s23 = sld [smem:[#allocation15_spill]] }
 0x9a0   : > { %p24_p11 = scmp.ge.s32.totalorder %s9493_s24, 4  }
 0x9a1   : > { %s9497_s22 = smov %s9494_s28 }
 0x9a2   :  { %26 = sbr.rel (!%p24_p11) target bundleno = 5 (0x5), region = 141 }
 0x9a7   :  { %4995 = vsyncpa [#allocation4], 1 }
 0x9a8   :  { %4997 = vsyncpa [#allocation4 + $0x1], 1 }
 0x9a9   :  { %4998 = vsyncpa [#allocation7], 1 }
 0x9aa   :  { %4999 = vsyncpa [#allocation5], 1 }
 0x9ab   :  { %5001 = vsyncpa [#allocation5 + $0x1], 1 }

</bundles_post_ra>
